<compile_context>
chip_gen: v7x
topology: tpu7x:2x2x1
jax: 0.10.0
libtpu: 0.0.40
codegen_flags: <defaults>
</compile_context>

<pallas_src>
import functools

import jax
import jax.numpy as jnp
from jax import lax
from jax.experimental import pallas as pl
from jax.experimental.pallas import tpu as pltpu

BN_EPS = 1e-5


def _round_up(x, m):
    return ((x + m - 1) // m) * m


# ----------------------------------------------------------------------------
# Kernel 1: fused 3x3 / stride-2 conv + folded BatchNorm affine + ReLU.
#   a_ref    : (tm,   4*cp) bf16  main row-tile of the space-to-depth activation
#   h_ref    : (halo, 4*cp) bf16  halo rows immediately after the main tile
#   w_ref    : (4, 4*cp, cout) bf16  one matrix per 2x2 shift (zero rows where
#                                    a tap falls outside the 3x3 kernel)
#   scale/shift : (1, cout) f32   BN folded into a per-channel affine
#   o_ref    : (tm, cout) bf16
#   win_ref  : (tm+halo, 4*cp) bf16 VMEM scratch (tile + halo stitched together)
# The conv becomes 4 shifted matmuls accumulated in registers (f32); the
# 9x-inflated im2col matrix never exists anywhere.
# ----------------------------------------------------------------------------
def _conv_kernel(a_ref, h_ref, w_ref, scale_ref, shift_ref, o_ref, win_ref, *,
                 offs):
    tm = a_ref.shape[0]
    win_ref[:tm, :] = a_ref[...]
    win_ref[tm:, :] = h_ref[...]
    acc = jnp.zeros((tm, o_ref.shape[-1]), jnp.float32)
    for k, off in enumerate(offs):                       # 4 static shifts
        slab = win_ref[off:off + tm, :]                  # bf16 slab, per-shift load
        acc = acc + jnp.dot(slab, w_ref[k], preferred_element_type=jnp.float32)
    y = acc * scale_ref[...] + shift_ref[...]
    o_ref[...] = jnp.maximum(y, 0.0).astype(o_ref.dtype)


def conv_bn_relu(x_nhwc, ws, scale, shift):
    """x_nhwc: (n, h, w, cp) bf16, channels already matching what ws expects."""
    n, h, w, cp = x_nhwc.shape
    cout = ws.shape[-1]
    kdim = ws.shape[1]
    assert kdim == 4 * cp, (kdim, cp)

    ho = (h - 1) // 2 + 1
    wo = (w - 1) // 2 + 1
    # pad=1 on each side, plus pad bottom/right so padded dims are even
    hp = _round_up(h + 2, 2)
    wp = _round_up(w + 2, 2)
    xp = jnp.pad(x_nhwc, ((0, 0), (1, hp - h - 1), (1, wp - w - 1), (0, 0)))
    hy, wy = hp // 2, wp // 2
    # space-to-depth: Y[nn,U,V,(p*2+q)*cp + c] = xp[nn, 2U+p, 2V+q, c]
    y2 = (xp.reshape(n, hy, 2, wy, 2, cp)
            .transpose(0, 1, 3, 2, 4, 5)
            .reshape(n * hy * wy, kdim))                  # bf16

    r = n * hy * wy
    halo = _round_up(wy + 2, 16)                          # covers shifts up to wy+1
    ratio = max(1, (256 + halo - 1) // halo)              # target tm ~ 256 rows
    tm = ratio * halo
    rpad = _round_up(r, tm)
    y2 = jnp.pad(y2, ((0, rpad + halo - r), (0, 0)))      # room for the last halo

    offs = (0, 1, wy, wy + 1)                 # row offsets of the 4 2x2 shifts
    grid = (rpad // tm,)
    out = pl.pallas_call(
        functools.partial(_conv_kernel, offs=offs),
        out_shape=jax.ShapeDtypeStruct((rpad, cout), jnp.bfloat16),
        grid=grid,
        in_specs=[
            pl.BlockSpec((tm, kdim), lambda m: (m, 0)),            # main tile
            pl.BlockSpec((halo, kdim), lambda m: ((m + 1) * ratio, 0)),  # halo
            pl.BlockSpec(ws.shape, lambda m: (0, 0, 0)),           # weights
            pl.BlockSpec((1, cout), lambda m: (0, 0)),             # bn scale
            pl.BlockSpec((1, cout), lambda m: (0, 0)),             # bn shift
        ],
        out_specs=pl.BlockSpec((tm, cout), lambda m: (m, 0)),
        scratch_shapes=[pltpu.VMEM((tm + halo, kdim), jnp.bfloat16)],
        compiler_params=pltpu.CompilerParams(
            dimension_semantics=("parallel",),
            vmem_limit_bytes=32 * 1024 * 1024),
    )(y2, y2, ws, scale, shift)
    # drop halo / wrapped / padded rows; keep natural channel count
    return out[:r].reshape(n, hy, wy, cout)[:, :ho, :wo, :]


# ----------------------------------------------------------------------------
# Kernel 2: tiled  Y = relu?( X @ W + b ),  bf16 inputs, f32 VMEM accumulator.
# Weights/bias are pre-padded + pre-cast in prepare_params.
# ----------------------------------------------------------------------------
def _linear_kernel(x_ref, w_ref, b_ref, o_ref, acc_ref, *, relu):
    @pl.when(pl.program_id(2) == 0)
    def _():
        acc_ref[...] = jnp.zeros_like(acc_ref)

    acc_ref[...] += jnp.dot(x_ref[...], w_ref[...],
                            preferred_element_type=jnp.float32)

    @pl.when(pl.program_id(2) == pl.num_programs(2) - 1)
    def _():
        y = acc_ref[...] + b_ref[...]
        if relu:
            y = jnp.maximum(y, 0.0)
        o_ref[...] = y.astype(o_ref.dtype)


def _prep_linear(w, b, *, tn, tk):
    """One-time pad + bf16 cast of a Linear layer's parameters."""
    k, n = w.shape
    tn = min(tn, _round_up(n, 128))
    tk = min(tk, _round_up(k, 128))
    kp, np_ = _round_up(k, tk), _round_up(n, tn)
    wp = jnp.pad(w, ((0, kp - k), (0, np_ - n))).astype(jnp.bfloat16)
    bp = jnp.pad(b.astype(jnp.float32).reshape(1, n), ((0, 0), (0, np_ - n)))
    return {"w": wp, "b": bp, "n": n, "tn": tn, "tk": tk}


def linear(x, lp, *, relu, tm=256):
    wp, bp = lp["w"], lp["b"]
    kp, np_ = wp.shape
    tn, tk = lp["tn"], lp["tk"]
    m, k = x.shape
    assert k <= kp, (k, kp)

    tm = min(tm, _round_up(m, 16))
    mp = _round_up(m, tm)
    xp = jnp.pad(x, ((0, mp - m), (0, kp - k))).astype(jnp.bfloat16)

    grid = (mp // tm, np_ // tn, kp // tk)
    cost = pl.CostEstimate(
        flops=2 * mp * np_ * kp,
        transcendentals=0,
        bytes_accessed=2 * (mp * kp + kp * np_) + 4 * (mp * np_ + np_))
    out = pl.pallas_call(
        functools.partial(_linear_kernel, relu=relu),
        out_shape=jax.ShapeDtypeStruct((mp, np_), jnp.float32),
        grid=grid,
        in_specs=[pl.BlockSpec((tm, tk), lambda i, j, kk: (i, kk)),
                  pl.BlockSpec((tk, tn), lambda i, j, kk: (kk, j)),
                  pl.BlockSpec((1, tn), lambda i, j, kk: (0, j))],
        out_specs=pl.BlockSpec((tm, tn), lambda i, j, kk: (i, j)),
        scratch_shapes=[pltpu.VMEM((tm, tn), jnp.float32)],
        compiler_params=pltpu.CompilerParams(
            dimension_semantics=("parallel", "parallel", "arbitrary"),
            vmem_limit_bytes=32 * 1024 * 1024),
        cost_estimate=cost,
    )(xp, wp, bp)
    return out[:m, :lp["n"]]


# ----------------------------------------------------------------------------
# One-time parameter preparation: BN folding, shift-weight construction,
# fc weight padding/bf16 cast, fc1 weight-row permutation (NCHW -> NHWC).
# ----------------------------------------------------------------------------
def prepare_params(params, h, w):
    prepped = {}
    # channel count of the activation entering each conv (conv1 input 3 -> pad 8)
    in_chan = {"conv1": 8, "conv2": 16, "conv3": 32}
    for name in ("conv1", "conv2", "conv3"):
        wc, b, gamma, beta, mean, var = params[name]
        kh, kw, cin, cout = wc.shape
        cp = in_chan[name]
        ws = jnp.zeros((4, 4 * cp, cout), jnp.float32)
        for du in range(2):
            for dv in range(2):
                s_idx = du * 2 + dv
                for p in range(2):
                    for q in range(2):
                        i, j = 2 * du + p, 2 * dv + q
                        if i < kh and j < kw:
                            row0 = (p * 2 + q) * cp
                            ws = ws.at[s_idx, row0:row0 + cin, :].set(wc[i, j])
        s = gamma / jnp.sqrt(var + BN_EPS)
        sh = b * s + beta - mean * s                      # bn(conv(x)+b) folded
        prepped[name] = (ws.astype(jnp.bfloat16),
                         s.reshape(1, cout).astype(jnp.float32),
                         sh.reshape(1, cout).astype(jnp.float32))

    ho, wo = h, w
    for _ in range(3):
        ho = (ho - 1) // 2 + 1
        wo = (wo - 1) // 2 + 1
    w1, b1 = params["fc1"]
    cout3 = params["conv3"][0].shape[-1]
    assert w1.shape[0] == cout3 * ho * wo
    # PyTorch flattens NCHW (row = c*ho*wo + a*wo + b); our conv3 output is
    # NHWC: permute the weight rows once instead of transposing the activation.
    w1p = (w1.reshape(cout3, ho, wo, w1.shape[1])
             .transpose(1, 2, 0, 3)
             .reshape(ho * wo * cout3, w1.shape[1]))
    # fc1: single N block (weight streamed once), large K tile; fc2: tiny N.
    prepped["fc1"] = _prep_linear(w1p, b1, tn=256, tk=1024)
    w2, b2 = params["fc2"]
    prepped["fc2"] = _prep_linear(w2, b2, tn=128, tk=256)
    return prepped


def dqn_forward(x_nchw, prepped):
    n = x_nchw.shape[0]
    x = jnp.transpose(x_nchw, (0, 2, 3, 1))                   # NCHW -> NHWC once
    cp1 = prepped["conv1"][0].shape[1] // 4
    x = jnp.pad(x, ((0, 0), (0, 0), (0, 0), (0, cp1 - x.shape[-1])))
    x = x.astype(jnp.bfloat16)                                # bf16 activations
    for name in ("conv1", "conv2", "conv3"):
        ws, scale, shift = prepped[name]
        x = conv_bn_relu(x, ws, scale, shift)                 # (n, ho, wo, cout) bf16
    x = x.reshape(n, -1)                                      # NHWC flatten
    x = linear(x, prepped["fc1"], relu=True)
    return linear(x, prepped["fc2"], relu=False)


# ----------------------------------------------------------------------------
# Pure-JAX reference (same bf16-matmul / f32-accumulate numerics).
# ----------------------------------------------------------------------------
def dqn_forward_ref(x_nchw, params):
    x = jnp.transpose(x_nchw, (0, 2, 3, 1))
    for name in ("conv1", "conv2", "conv3"):
        wc, b, gamma, beta, mean, var = params[name]
        y = lax.conv_general_dilated(
            x.astype(jnp.bfloat16), wc.astype(jnp.bfloat16),
            window_strides=(2, 2), padding=((1, 1), (1, 1)),
            dimension_numbers=("NHWC", "HWIO", "NHWC"),
            preferred_element_type=jnp.float32)
        s = gamma / jnp.sqrt(var + BN_EPS)
        x = jnp.maximum(y * s + (b * s + beta - mean * s), 0.0)
    x = jnp.transpose(x, (0, 3, 1, 2)).reshape(x.shape[0], -1)
    w1, b1 = params["fc1"]
    x = jnp.maximum(
        jnp.dot(x.astype(jnp.bfloat16), w1.astype(jnp.bfloat16),
                preferred_element_type=jnp.float32) + b1, 0.0)
    w2, b2 = params["fc2"]
    return jnp.dot(x.astype(jnp.bfloat16), w2.astype(jnp.bfloat16),
                   preferred_element_type=jnp.float32) + b2


# ----------------------------------------------------------------------------
# Deterministic parameter init
# ----------------------------------------------------------------------------
def _conv_params(key, cin, cout):
    k1, k2, k3, k4, k5, k6 = jax.random.split(key, 6)
    w = 0.1 * jax.random.normal(k1, (3, 3, cin, cout), jnp.float32)
    b = 0.05 * jax.random.normal(k2, (cout,), jnp.float32)
    gamma = 1.0 + 0.1 * jax.random.normal(k3, (cout,), jnp.float32)
    beta = 0.1 * jax.random.normal(k4, (cout,), jnp.float32)
    mean = 0.1 * jax.random.normal(k5, (cout,), jnp.float32)
    var = 1.0 + jnp.abs(jax.random.normal(k6, (cout,), jnp.float32))
    return (w, b, gamma, beta, mean, var)


def init_params(key, flat_dim, num_actions):
    kc1, kc2, kc3, kw1, kb1, kw2, kb2 = jax.random.split(key, 7)
    return {
        "conv1": _conv_params(kc1, 3, 16),
        "conv2": _conv_params(kc2, 16, 32),
        "conv3": _conv_params(kc3, 32, 64),
        "fc1": (0.05 * jax.random.normal(kw1, (flat_dim, 256), jnp.float32),
                0.05 * jax.random.normal(kb1, (256,), jnp.float32)),
        "fc2": (0.05 * jax.random.normal(kw2, (256, num_actions), jnp.float32),
                0.05 * jax.random.normal(kb2, (num_actions,), jnp.float32)),
    }


if __name__ == "__main__":
    # Small test shapes: batch=2, input 3x16x16 (NCHW, matching PyTorch conv1).
    # Spatial path: 16 -> 8 -> 4 -> 2, so flat_dim = 64 * 2 * 2 = 256.
    # TODO(synk): the original module's Linear(462848, 256) implies a large
    # input resolution; fc1 here is sized to the flattened conv3 output of the
    # test resolution (same network semantics).
    batch, h, w = 2, 16, 16
    num_actions = 11
    flat_dim = 64 * (h // 8) * (w // 8)

    key = jax.random.PRNGKey(0)
    kx, kparam = jax.random.split(key)
    x = jax.random.normal(kx, (batch, 3, h, w), jnp.float32)
    params = init_params(kparam, flat_dim, num_actions)
    prepped = prepare_params(params, h, w)

    fwd = jax.jit(lambda xx: dqn_forward(xx, prepped))
    out = jax.block_until_ready(fwd(x))
    assert out.shape == (batch, num_actions), out.shape

    ref = jax.block_until_ready(dqn_forward_ref(x, params))
    err = float(jnp.max(jnp.abs(out - ref)))
    ref_scale = float(jnp.max(jnp.abs(ref))) + 1e-6
    if err > 3e-3 * ref_scale + 1e-4:
        raise AssertionError(f"Pallas mismatch: max_err={err}, ref_scale={ref_scale}")

    print("KERNEL_OK")
</pallas_src>

<mosaic_0001>
module attributes {stable_mosaic.version = 11 : i64} {
  func.func @_conv_kernel(%arg0: i32, %arg1: memref<256x32xbf16, #tpu.memory_space<vmem>>, %arg2: memref<16x32xbf16, #tpu.memory_space<vmem>>, %arg3: memref<4x32x16xbf16, #tpu.memory_space<vmem>>, %arg4: memref<1x16xf32, #tpu.memory_space<vmem>>, %arg5: memref<1x16xf32, #tpu.memory_space<vmem>>, %arg6: memref<256x16xbf16, #tpu.memory_space<vmem>>, %arg7: memref<272x32xbf16, #tpu.memory_space<vmem>>) attributes {dimension_semantics = [#tpu.dimension_semantics<parallel>], iteration_bounds = array<i64: 1>, scalar_prefetch = 0 : i64, scratch_operands = 1 : i64, tpu.core_type = #tpu.core_type<tc>, window_params = [{transform_indices = @transform_0, window_bounds = array<i64: 256, 32>}, {transform_indices = @transform_1, window_bounds = array<i64: 16, 32>}, {pipeline_mode = #tpu.pipeline_mode<synchronous>, transform_indices = @transform_2, window_bounds = array<i64: 4, 32, 16>}, {pipeline_mode = #tpu.pipeline_mode<synchronous>, transform_indices = @transform_3, window_bounds = array<i64: 1, 16>}, {pipeline_mode = #tpu.pipeline_mode<synchronous>, transform_indices = @transform_4, window_bounds = array<i64: 1, 16>}, {transform_indices = @transform_5, window_bounds = array<i64: 256, 16>}]} {
    %c0 = arith.constant 0 : index
    %c0_0 = arith.constant 0 : index
    %0 = vector.load %arg1[%c0, %c0_0] : memref<256x32xbf16, #tpu.memory_space<vmem>>, vector<256x32xbf16>
    %c0_1 = arith.constant 0 : index
    %c0_2 = arith.constant 0 : index
    %1 = vector.load %arg7[%c0_1, %c0_2] : memref<272x32xbf16, #tpu.memory_space<vmem>>, vector<256x32xbf16>
    tpu.vector_store %arg7[%c0_1, %c0_2], %0 {strides = array<i32>} : memref<272x32xbf16, #tpu.memory_space<vmem>>, vector<256x32xbf16>,
    %c0_3 = arith.constant 0 : index
    %c0_4 = arith.constant 0 : index
    %2 = vector.load %arg2[%c0_3, %c0_4] : memref<16x32xbf16, #tpu.memory_space<vmem>>, vector<16x32xbf16>
    %c256 = arith.constant 256 : index
    %c0_5 = arith.constant 0 : index
    %3 = vector.load %arg7[%c256, %c0_5] : memref<272x32xbf16, #tpu.memory_space<vmem>>, vector<16x32xbf16>
    tpu.vector_store %arg7[%c256, %c0_5], %2 {strides = array<i32>} : memref<272x32xbf16, #tpu.memory_space<vmem>>, vector<16x32xbf16>,
    %cst = arith.constant 0.000000e+00 : f32
    %4 = vector.broadcast %cst : f32 to vector<256x16xf32>
    %c0_6 = arith.constant 0 : index
    %c0_7 = arith.constant 0 : index
    %5 = vector.load %arg7[%c0_6, %c0_7] : memref<272x32xbf16, #tpu.memory_space<vmem>>, vector<256x32xbf16>
    %c0_8 = arith.constant 0 : index
    %c0_9 = arith.constant 0 : index
    %c0_10 = arith.constant 0 : index
    %6 = vector.load %arg3[%c0_8, %c0_9, %c0_10] : memref<4x32x16xbf16, #tpu.memory_space<vmem>>, vector<1x32x16xbf16>
    %7 = vector.shape_cast %6 : vector<1x32x16xbf16> to vector<32x16xbf16>
    %cst_11 = arith.constant dense<0.000000e+00> : vector<256x16xf32>
    %8 = tpu.matmul %5, %7, %cst_11 {dimension_numbers = #tpu.dot_dimension_numbers<[1], [0], [0], [1], [0, 0, 1, 1], [], []>} : vector<256x32xbf16>, vector<32x16xbf16>, vector<256x16xf32> -> vector<256x16xf32>
    %9 = arith.addf %4, %8 : vector<256x16xf32>
    %c1 = arith.constant 1 : index
    %c0_12 = arith.constant 0 : index
    %10 = vector.load %arg7[%c1, %c0_12] : memref<272x32xbf16, #tpu.memory_space<vmem>>, vector<256x32xbf16>
    %c1_13 = arith.constant 1 : index
    %c0_14 = arith.constant 0 : index
    %c0_15 = arith.constant 0 : index
    %11 = vector.load %arg3[%c1_13, %c0_14, %c0_15] : memref<4x32x16xbf16, #tpu.memory_space<vmem>>, vector<1x32x16xbf16>
    %12 = vector.shape_cast %11 : vector<1x32x16xbf16> to vector<32x16xbf16>
    %cst_16 = arith.constant dense<0.000000e+00> : vector<256x16xf32>
    %13 = tpu.matmul %10, %12, %cst_16 {dimension_numbers = #tpu.dot_dimension_numbers<[1], [0], [0], [1], [0, 0, 1, 1], [], []>} : vector<256x32xbf16>, vector<32x16xbf16>, vector<256x16xf32> -> vector<256x16xf32>
    %14 = arith.addf %9, %13 : vector<256x16xf32>
    %c9 = arith.constant 9 : index
    %c0_17 = arith.constant 0 : index
    %15 = vector.load %arg7[%c9, %c0_17] : memref<272x32xbf16, #tpu.memory_space<vmem>>, vector<256x32xbf16>
    %c2 = arith.constant 2 : index
    %c0_18 = arith.constant 0 : index
    %c0_19 = arith.constant 0 : index
    %16 = vector.load %arg3[%c2, %c0_18, %c0_19] : memref<4x32x16xbf16, #tpu.memory_space<vmem>>, vector<1x32x16xbf16>
    %17 = vector.shape_cast %16 : vector<1x32x16xbf16> to vector<32x16xbf16>
    %cst_20 = arith.constant dense<0.000000e+00> : vector<256x16xf32>
    %18 = tpu.matmul %15, %17, %cst_20 {dimension_numbers = #tpu.dot_dimension_numbers<[1], [0], [0], [1], [0, 0, 1, 1], [], []>} : vector<256x32xbf16>, vector<32x16xbf16>, vector<256x16xf32> -> vector<256x16xf32>
    %19 = arith.addf %14, %18 : vector<256x16xf32>
    %c10 = arith.constant 10 : index
    %c0_21 = arith.constant 0 : index
    %20 = vector.load %arg7[%c10, %c0_21] : memref<272x32xbf16, #tpu.memory_space<vmem>>, vector<256x32xbf16>
    %c3 = arith.constant 3 : index
    %c0_22 = arith.constant 0 : index
    %c0_23 = arith.constant 0 : index
    %21 = vector.load %arg3[%c3, %c0_22, %c0_23] : memref<4x32x16xbf16, #tpu.memory_space<vmem>>, vector<1x32x16xbf16>
    %22 = vector.shape_cast %21 : vector<1x32x16xbf16> to vector<32x16xbf16>
    %cst_24 = arith.constant dense<0.000000e+00> : vector<256x16xf32>
    %23 = tpu.matmul %20, %22, %cst_24 {dimension_numbers = #tpu.dot_dimension_numbers<[1], [0], [0], [1], [0, 0, 1, 1], [], []>} : vector<256x32xbf16>, vector<32x16xbf16>, vector<256x16xf32> -> vector<256x16xf32>
    %24 = arith.addf %19, %23 : vector<256x16xf32>
    %c0_25 = arith.constant 0 : index
    %c0_26 = arith.constant 0 : index
    %25 = vector.load %arg4[%c0_25, %c0_26] : memref<1x16xf32, #tpu.memory_space<vmem>>, vector<1x16xf32>
    %26 = vector.broadcast %25 : vector<1x16xf32> to vector<256x16xf32>
    %27 = arith.mulf %24, %26 : vector<256x16xf32>
    %c0_27 = arith.constant 0 : index
    %c0_28 = arith.constant 0 : index
    %28 = vector.load %arg5[%c0_27, %c0_28] : memref<1x16xf32, #tpu.memory_space<vmem>>, vector<1x16xf32>
    %29 = vector.broadcast %28 : vector<1x16xf32> to vector<256x16xf32>
    %30 = arith.addf %27, %29 : vector<256x16xf32>
    %cst_29 = arith.constant 0.000000e+00 : f32
    %31 = vector.broadcast %cst_29 : f32 to vector<256x16xf32>
    %32 = arith.maximumf %30, %31 : vector<256x16xf32>
    %33 = arith.truncf %32 : vector<256x16xf32> to vector<256x16xbf16>
    %c0_30 = arith.constant 0 : index
    %c0_31 = arith.constant 0 : index
    %34 = vector.load %arg6[%c0_30, %c0_31] : memref<256x16xbf16, #tpu.memory_space<vmem>>, vector<256x16xbf16>
    tpu.vector_store %arg6[%c0_30, %c0_31], %33 {strides = array<i32>} : memref<256x16xbf16, #tpu.memory_space<vmem>>, vector<256x16xbf16>,
    return
  }
  func.func @transform_0(%arg0: i32) -> (i32, i32) {
    %c0_i32 = arith.constant 0 : i32
    %c0_i32_0 = arith.constant 0 : i32
    return %arg0, %c0_i32 : i32, i32
  }
  func.func @transform_1(%arg0: i32) -> (i32, i32) {
    %c1_i32 = arith.constant 1 : i32
    %0 = arith.addi %arg0, %c1_i32 : i32
    %c16_i32 = arith.constant 16 : i32
    %1 = arith.muli %0, %c16_i32 : i32
    %c0_i32 = arith.constant 0 : i32
    %c0_i32_0 = arith.constant 0 : i32
    return %1, %c0_i32 : i32, i32
  }
  func.func @transform_2(%arg0: i32) -> (i32, i32, i32) {
    %c0_i32 = arith.constant 0 : i32
    %c0_i32_0 = arith.constant 0 : i32
    %c0_i32_1 = arith.constant 0 : i32
    %c0_i32_2 = arith.constant 0 : i32
    return %c0_i32, %c0_i32_0, %c0_i32_1 : i32, i32, i32
  }
  func.func @transform_3(%arg0: i32) -> (i32, i32) {
    %c0_i32 = arith.constant 0 : i32
    %c0_i32_0 = arith.constant 0 : i32
    %c0_i32_1 = arith.constant 0 : i32
    return %c0_i32, %c0_i32_0 : i32, i32
  }
  func.func @transform_4(%arg0: i32) -> (i32, i32) {
    %c0_i32 = arith.constant 0 : i32
    %c0_i32_0 = arith.constant 0 : i32
    %c0_i32_1 = arith.constant 0 : i32
    return %c0_i32, %c0_i32_0 : i32, i32
  }
  func.func @transform_5(%arg0: i32) -> (i32, i32) {
    %c0_i32 = arith.constant 0 : i32
    %c0_i32_0 = arith.constant 0 : i32
    return %arg0, %c0_i32 : i32, i32
  }
}

module attributes {stable_mosaic.version = 11 : i64} {
  func.func @_conv_kernel(%arg0: i32, %arg1: memref<256x64xbf16, #tpu.memory_space<vmem>>, %arg2: memref<16x64xbf16, #tpu.memory_space<vmem>>, %arg3: memref<4x64x32xbf16, #tpu.memory_space<vmem>>, %arg4: memref<1x32xf32, #tpu.memory_space<vmem>>, %arg5: memref<1x32xf32, #tpu.memory_space<vmem>>, %arg6: memref<256x32xbf16, #tpu.memory_space<vmem>>, %arg7: memref<272x64xbf16, #tpu.memory_space<vmem>>) attributes {dimension_semantics = [#tpu.dimension_semantics<parallel>], iteration_bounds = array<i64: 1>, scalar_prefetch = 0 : i64, scratch_operands = 1 : i64, tpu.core_type = #tpu.core_type<tc>, window_params = [{transform_indices = @transform_0, window_bounds = array<i64: 256, 64>}, {transform_indices = @transform_1, window_bounds = array<i64: 16, 64>}, {pipeline_mode = #tpu.pipeline_mode<synchronous>, transform_indices = @transform_2, window_bounds = array<i64: 4, 64, 32>}, {pipeline_mode = #tpu.pipeline_mode<synchronous>, transform_indices = @transform_3, window_bounds = array<i64: 1, 32>}, {pipeline_mode = #tpu.pipeline_mode<synchronous>, transform_indices = @transform_4, window_bounds = array<i64: 1, 32>}, {transform_indices = @transform_5, window_bounds = array<i64: 256, 32>}]} {
    %c0 = arith.constant 0 : index
    %c0_0 = arith.constant 0 : index
    %0 = vector.load %arg1[%c0, %c0_0] : memref<256x64xbf16, #tpu.memory_space<vmem>>, vector<256x64xbf16>
    %c0_1 = arith.constant 0 : index
    %c0_2 = arith.constant 0 : index
    %1 = vector.load %arg7[%c0_1, %c0_2] : memref<272x64xbf16, #tpu.memory_space<vmem>>, vector<256x64xbf16>
    tpu.vector_store %arg7[%c0_1, %c0_2], %0 {strides = array<i32>} : memref<272x64xbf16, #tpu.memory_space<vmem>>, vector<256x64xbf16>,
    %c0_3 = arith.constant 0 : index
    %c0_4 = arith.constant 0 : index
    %2 = vector.load %arg2[%c0_3, %c0_4] : memref<16x64xbf16, #tpu.memory_space<vmem>>, vector<16x64xbf16>
    %c256 = arith.constant 256 : index
    %c0_5 = arith.constant 0 : index
    %3 = vector.load %arg7[%c256, %c0_5] : memref<272x64xbf16, #tpu.memory_space<vmem>>, vector<16x64xbf16>
    tpu.vector_store %arg7[%c256, %c0_5], %2 {strides = array<i32>} : memref<272x64xbf16, #tpu.memory_space<vmem>>, vector<16x64xbf16>,
    %cst = arith.constant 0.000000e+00 : f32
    %4 = vector.broadcast %cst : f32 to vector<256x32xf32>
    %c0_6 = arith.constant 0 : index
    %c0_7 = arith.constant 0 : index
    %5 = vector.load %arg7[%c0_6, %c0_7] : memref<272x64xbf16, #tpu.memory_space<vmem>>, vector<256x64xbf16>
    %c0_8 = arith.constant 0 : index
    %c0_9 = arith.constant 0 : index
    %c0_10 = arith.constant 0 : index
    %6 = vector.load %arg3[%c0_8, %c0_9, %c0_10] : memref<4x64x32xbf16, #tpu.memory_space<vmem>>, vector<1x64x32xbf16>
    %7 = vector.shape_cast %6 : vector<1x64x32xbf16> to vector<64x32xbf16>
    %cst_11 = arith.constant dense<0.000000e+00> : vector<256x32xf32>
    %8 = tpu.matmul %5, %7, %cst_11 {dimension_numbers = #tpu.dot_dimension_numbers<[1], [0], [0], [1], [0, 0, 1, 1], [], []>} : vector<256x64xbf16>, vector<64x32xbf16>, vector<256x32xf32> -> vector<256x32xf32>
    %9 = arith.addf %4, %8 : vector<256x32xf32>
    %c1 = arith.constant 1 : index
    %c0_12 = arith.constant 0 : index
    %10 = vector.load %arg7[%c1, %c0_12] : memref<272x64xbf16, #tpu.memory_space<vmem>>, vector<256x64xbf16>
    %c1_13 = arith.constant 1 : index
    %c0_14 = arith.constant 0 : index
    %c0_15 = arith.constant 0 : index
    %11 = vector.load %arg3[%c1_13, %c0_14, %c0_15] : memref<4x64x32xbf16, #tpu.memory_space<vmem>>, vector<1x64x32xbf16>
    %12 = vector.shape_cast %11 : vector<1x64x32xbf16> to vector<64x32xbf16>
    %cst_16 = arith.constant dense<0.000000e+00> : vector<256x32xf32>
    %13 = tpu.matmul %10, %12, %cst_16 {dimension_numbers = #tpu.dot_dimension_numbers<[1], [0], [0], [1], [0, 0, 1, 1], [], []>} : vector<256x64xbf16>, vector<64x32xbf16>, vector<256x32xf32> -> vector<256x32xf32>
    %14 = arith.addf %9, %13 : vector<256x32xf32>
    %c5 = arith.constant 5 : index
    %c0_17 = arith.constant 0 : index
    %15 = vector.load %arg7[%c5, %c0_17] : memref<272x64xbf16, #tpu.memory_space<vmem>>, vector<256x64xbf16>
    %c2 = arith.constant 2 : index
    %c0_18 = arith.constant 0 : index
    %c0_19 = arith.constant 0 : index
    %16 = vector.load %arg3[%c2, %c0_18, %c0_19] : memref<4x64x32xbf16, #tpu.memory_space<vmem>>, vector<1x64x32xbf16>
    %17 = vector.shape_cast %16 : vector<1x64x32xbf16> to vector<64x32xbf16>
    %cst_20 = arith.constant dense<0.000000e+00> : vector<256x32xf32>
    %18 = tpu.matmul %15, %17, %cst_20 {dimension_numbers = #tpu.dot_dimension_numbers<[1], [0], [0], [1], [0, 0, 1, 1], [], []>} : vector<256x64xbf16>, vector<64x32xbf16>, vector<256x32xf32> -> vector<256x32xf32>
    %19 = arith.addf %14, %18 : vector<256x32xf32>
    %c6 = arith.constant 6 : index
    %c0_21 = arith.constant 0 : index
    %20 = vector.load %arg7[%c6, %c0_21] : memref<272x64xbf16, #tpu.memory_space<vmem>>, vector<256x64xbf16>
    %c3 = arith.constant 3 : index
    %c0_22 = arith.constant 0 : index
    %c0_23 = arith.constant 0 : index
    %21 = vector.load %arg3[%c3, %c0_22, %c0_23] : memref<4x64x32xbf16, #tpu.memory_space<vmem>>, vector<1x64x32xbf16>
    %22 = vector.shape_cast %21 : vector<1x64x32xbf16> to vector<64x32xbf16>
    %cst_24 = arith.constant dense<0.000000e+00> : vector<256x32xf32>
    %23 = tpu.matmul %20, %22, %cst_24 {dimension_numbers = #tpu.dot_dimension_numbers<[1], [0], [0], [1], [0, 0, 1, 1], [], []>} : vector<256x64xbf16>, vector<64x32xbf16>, vector<256x32xf32> -> vector<256x32xf32>
    %24 = arith.addf %19, %23 : vector<256x32xf32>
    %c0_25 = arith.constant 0 : index
    %c0_26 = arith.constant 0 : index
    %25 = vector.load %arg4[%c0_25, %c0_26] : memref<1x32xf32, #tpu.memory_space<vmem>>, vector<1x32xf32>
    %26 = vector.broadcast %25 : vector<1x32xf32> to vector<256x32xf32>
    %27 = arith.mulf %24, %26 : vector<256x32xf32>
    %c0_27 = arith.constant 0 : index
    %c0_28 = arith.constant 0 : index
    %28 = vector.load %arg5[%c0_27, %c0_28] : memref<1x32xf32, #tpu.memory_space<vmem>>, vector<1x32xf32>
    %29 = vector.broadcast %28 : vector<1x32xf32> to vector<256x32xf32>
    %30 = arith.addf %27, %29 : vector<256x32xf32>
    %cst_29 = arith.constant 0.000000e+00 : f32
    %31 = vector.broadcast %cst_29 : f32 to vector<256x32xf32>
    %32 = arith.maximumf %30, %31 : vector<256x32xf32>
    %33 = arith.truncf %32 : vector<256x32xf32> to vector<256x32xbf16>
    %c0_30 = arith.constant 0 : index
    %c0_31 = arith.constant 0 : index
    %34 = vector.load %arg6[%c0_30, %c0_31] : memref<256x32xbf16, #tpu.memory_space<vmem>>, vector<256x32xbf16>
    tpu.vector_store %arg6[%c0_30, %c0_31], %33 {strides = array<i32>} : memref<256x32xbf16, #tpu.memory_space<vmem>>, vector<256x32xbf16>,
    return
  }
  func.func @transform_0(%arg0: i32) -> (i32, i32) {
    %c0_i32 = arith.constant 0 : i32
    %c0_i32_0 = arith.constant 0 : i32
    return %arg0, %c0_i32 : i32, i32
  }
  func.func @transform_1(%arg0: i32) -> (i32, i32) {
    %c1_i32 = arith.constant 1 : i32
    %0 = arith.addi %arg0, %c1_i32 : i32
    %c16_i32 = arith.constant 16 : i32
    %1 = arith.muli %0, %c16_i32 : i32
    %c0_i32 = arith.constant 0 : i32
    %c0_i32_0 = arith.constant 0 : i32
    return %1, %c0_i32 : i32, i32
  }
  func.func @transform_2(%arg0: i32) -> (i32, i32, i32) {
    %c0_i32 = arith.constant 0 : i32
    %c0_i32_0 = arith.constant 0 : i32
    %c0_i32_1 = arith.constant 0 : i32
    %c0_i32_2 = arith.constant 0 : i32
    return %c0_i32, %c0_i32_0, %c0_i32_1 : i32, i32, i32
  }
  func.func @transform_3(%arg0: i32) -> (i32, i32) {
    %c0_i32 = arith.constant 0 : i32
    %c0_i32_0 = arith.constant 0 : i32
    %c0_i32_1 = arith.constant 0 : i32
    return %c0_i32, %c0_i32_0 : i32, i32
  }
  func.func @transform_4(%arg0: i32) -> (i32, i32) {
    %c0_i32 = arith.constant 0 : i32
    %c0_i32_0 = arith.constant 0 : i32
    %c0_i32_1 = arith.constant 0 : i32
    return %c0_i32, %c0_i32_0 : i32, i32
  }
  func.func @transform_5(%arg0: i32) -> (i32, i32) {
    %c0_i32 = arith.constant 0 : i32
    %c0_i32_0 = arith.constant 0 : i32
    return %arg0, %c0_i32 : i32, i32
  }
}

module attributes {stable_mosaic.version = 11 : i64} {
  func.func @_linear_kernel(%arg0: i32, %arg1: i32, %arg2: i32, %arg3: memref<16x256xbf16, #tpu.memory_space<vmem>>, %arg4: memref<256x256xbf16, #tpu.memory_space<vmem>>, %arg5: memref<1x256xf32, #tpu.memory_space<vmem>>, %arg6: memref<16x256xf32, #tpu.memory_space<vmem>>, %arg7: memref<16x256xf32, #tpu.memory_space<vmem>>) attributes {dimension_semantics = [#tpu.dimension_semantics<parallel>, #tpu.dimension_semantics<parallel>, #tpu.dimension_semantics<arbitrary>], iteration_bounds = array<i64: 1, 1, 1>, scalar_prefetch = 0 : i64, scratch_operands = 1 : i64, tpu.core_type = #tpu.core_type<tc>, window_params = [{transform_indices = @transform_0, window_bounds = array<i64: 16, 256>}, {transform_indices = @transform_1, window_bounds = array<i64: 256, 256>}, {transform_indices = @transform_2, window_bounds = array<i64: 1, 256>}, {transform_indices = @transform_3, window_bounds = array<i64: 16, 256>}]} {
    %c0_i32 = arith.constant 0 : i32
    %0 = arith.cmpi eq, %arg2, %c0_i32 : i32
    %1 = arith.extui %0 : i1 to i32
    %c0_i32_0 = arith.constant 0 : i32
    %2 = arith.cmpi ne, %1, %c0_i32_0 : i32
    scf.if %2 {
      %cst_10 = arith.constant 0.000000e+00 : f32
      %12 = vector.broadcast %cst_10 : f32 to vector<16x256xf32>
      %c0_11 = arith.constant 0 : index
      %c0_12 = arith.constant 0 : index
      %13 = vector.load %arg7[%c0_11, %c0_12] : memref<16x256xf32, #tpu.memory_space<vmem>>, vector<16x256xf32>
      tpu.vector_store %arg7[%c0_11, %c0_12], %12 {strides = array<i32>} : memref<16x256xf32, #tpu.memory_space<vmem>>, vector<16x256xf32>,
    } else {
    }
    %c0 = arith.constant 0 : index
    %c0_1 = arith.constant 0 : index
    %3 = vector.load %arg7[%c0, %c0_1] : memref<16x256xf32, #tpu.memory_space<vmem>>, vector<16x256xf32>
    %c0_2 = arith.constant 0 : index
    %c0_3 = arith.constant 0 : index
    %4 = vector.load %arg3[%c0_2, %c0_3] : memref<16x256xbf16, #tpu.memory_space<vmem>>, vector<16x256xbf16>
    %c0_4 = arith.constant 0 : index
    %c0_5 = arith.constant 0 : index
    %5 = vector.load %arg4[%c0_4, %c0_5] : memref<256x256xbf16, #tpu.memory_space<vmem>>, vector<256x256xbf16>
    %cst = arith.constant dense<0.000000e+00> : vector<16x256xf32>
    %6 = tpu.matmul %4, %5, %cst {dimension_numbers = #tpu.dot_dimension_numbers<[1], [0], [0], [1], [0, 0, 1, 1], [], []>} : vector<16x256xbf16>, vector<256x256xbf16>, vector<16x256xf32> -> vector<16x256xf32>
    %7 = arith.addf %3, %6 : vector<16x256xf32>
    %c0_6 = arith.constant 0 : index
    %c0_7 = arith.constant 0 : index
    %8 = vector.load %arg7[%c0_6, %c0_7] : memref<16x256xf32, #tpu.memory_space<vmem>>, vector<16x256xf32>
    tpu.vector_store %arg7[%c0_6, %c0_7], %7 {strides = array<i32>} : memref<16x256xf32, #tpu.memory_space<vmem>>, vector<16x256xf32>,
    %c0_i32_8 = arith.constant 0 : i32
    %9 = arith.cmpi eq, %arg2, %c0_i32_8 : i32
    %10 = arith.extui %9 : i1 to i32
    %c0_i32_9 = arith.constant 0 : i32
    %11 = arith.cmpi ne, %10, %c0_i32_9 : i32
    scf.if %11 {
      %c0_10 = arith.constant 0 : index
      %c0_11 = arith.constant 0 : index
      %12 = vector.load %arg7[%c0_10, %c0_11] : memref<16x256xf32, #tpu.memory_space<vmem>>, vector<16x256xf32>
      %c0_12 = arith.constant 0 : index
      %c0_13 = arith.constant 0 : index
      %13 = vector.load %arg5[%c0_12, %c0_13] : memref<1x256xf32, #tpu.memory_space<vmem>>, vector<1x256xf32>
      %14 = vector.broadcast %13 : vector<1x256xf32> to vector<16x256xf32>
      %15 = arith.addf %12, %14 : vector<16x256xf32>
      %cst_14 = arith.constant 0.000000e+00 : f32
      %16 = vector.broadcast %cst_14 : f32 to vector<16x256xf32>
      %17 = arith.maximumf %15, %16 : vector<16x256xf32>
      %c0_15 = arith.constant 0 : index
      %c0_16 = arith.constant 0 : index
      %18 = vector.load %arg6[%c0_15, %c0_16] : memref<16x256xf32, #tpu.memory_space<vmem>>, vector<16x256xf32>
      tpu.vector_store %arg6[%c0_15, %c0_16], %17 {strides = array<i32>} : memref<16x256xf32, #tpu.memory_space<vmem>>, vector<16x256xf32>,
    } else {
    }
    return
  }
  func.func @transform_0(%arg0: i32, %arg1: i32, %arg2: i32) -> (i32, i32) {
    %c0_i32 = arith.constant 0 : i32
    return %arg0, %arg2 : i32, i32
  }
  func.func @transform_1(%arg0: i32, %arg1: i32, %arg2: i32) -> (i32, i32) {
    %c0_i32 = arith.constant 0 : i32
    return %arg2, %arg1 : i32, i32
  }
  func.func @transform_2(%arg0: i32, %arg1: i32, %arg2: i32) -> (i32, i32) {
    %c0_i32 = arith.constant 0 : i32
    %c0_i32_0 = arith.constant 0 : i32
    return %c0_i32, %arg1 : i32, i32
  }
  func.func @transform_3(%arg0: i32, %arg1: i32, %arg2: i32) -> (i32, i32) {
    %c0_i32 = arith.constant 0 : i32
    return %arg0, %arg1 : i32, i32
  }
}

module attributes {stable_mosaic.version = 11 : i64} {
  func.func @_conv_kernel(%arg0: i32, %arg1: memref<256x128xbf16, #tpu.memory_space<vmem>>, %arg2: memref<16x128xbf16, #tpu.memory_space<vmem>>, %arg3: memref<4x128x64xbf16, #tpu.memory_space<vmem>>, %arg4: memref<1x64xf32, #tpu.memory_space<vmem>>, %arg5: memref<1x64xf32, #tpu.memory_space<vmem>>, %arg6: memref<256x64xbf16, #tpu.memory_space<vmem>>, %arg7: memref<272x128xbf16, #tpu.memory_space<vmem>>) attributes {dimension_semantics = [#tpu.dimension_semantics<parallel>], iteration_bounds = array<i64: 1>, scalar_prefetch = 0 : i64, scratch_operands = 1 : i64, tpu.core_type = #tpu.core_type<tc>, window_params = [{transform_indices = @transform_0, window_bounds = array<i64: 256, 128>}, {transform_indices = @transform_1, window_bounds = array<i64: 16, 128>}, {pipeline_mode = #tpu.pipeline_mode<synchronous>, transform_indices = @transform_2, window_bounds = array<i64: 4, 128, 64>}, {pipeline_mode = #tpu.pipeline_mode<synchronous>, transform_indices = @transform_3, window_bounds = array<i64: 1, 64>}, {pipeline_mode = #tpu.pipeline_mode<synchronous>, transform_indices = @transform_4, window_bounds = array<i64: 1, 64>}, {transform_indices = @transform_5, window_bounds = array<i64: 256, 64>}]} {
    %c0 = arith.constant 0 : index
    %c0_0 = arith.constant 0 : index
    %0 = vector.load %arg1[%c0, %c0_0] : memref<256x128xbf16, #tpu.memory_space<vmem>>, vector<256x128xbf16>
    %c0_1 = arith.constant 0 : index
    %c0_2 = arith.constant 0 : index
    %1 = vector.load %arg7[%c0_1, %c0_2] : memref<272x128xbf16, #tpu.memory_space<vmem>>, vector<256x128xbf16>
    tpu.vector_store %arg7[%c0_1, %c0_2], %0 {strides = array<i32>} : memref<272x128xbf16, #tpu.memory_space<vmem>>, vector<256x128xbf16>,
    %c0_3 = arith.constant 0 : index
    %c0_4 = arith.constant 0 : index
    %2 = vector.load %arg2[%c0_3, %c0_4] : memref<16x128xbf16, #tpu.memory_space<vmem>>, vector<16x128xbf16>
    %c256 = arith.constant 256 : index
    %c0_5 = arith.constant 0 : index
    %3 = vector.load %arg7[%c256, %c0_5] : memref<272x128xbf16, #tpu.memory_space<vmem>>, vector<16x128xbf16>
    tpu.vector_store %arg7[%c256, %c0_5], %2 {strides = array<i32>} : memref<272x128xbf16, #tpu.memory_space<vmem>>, vector<16x128xbf16>,
    %cst = arith.constant 0.000000e+00 : f32
    %4 = vector.broadcast %cst : f32 to vector<256x64xf32>
    %c0_6 = arith.constant 0 : index
    %c0_7 = arith.constant 0 : index
    %5 = vector.load %arg7[%c0_6, %c0_7] : memref<272x128xbf16, #tpu.memory_space<vmem>>, vector<256x128xbf16>
    %c0_8 = arith.constant 0 : index
    %c0_9 = arith.constant 0 : index
    %c0_10 = arith.constant 0 : index
    %6 = vector.load %arg3[%c0_8, %c0_9, %c0_10] : memref<4x128x64xbf16, #tpu.memory_space<vmem>>, vector<1x128x64xbf16>
    %7 = vector.shape_cast %6 : vector<1x128x64xbf16> to vector<128x64xbf16>
    %cst_11 = arith.constant dense<0.000000e+00> : vector<256x64xf32>
    %8 = tpu.matmul %5, %7, %cst_11 {dimension_numbers = #tpu.dot_dimension_numbers<[1], [0], [0], [1], [0, 0, 1, 1], [], []>} : vector<256x128xbf16>, vector<128x64xbf16>, vector<256x64xf32> -> vector<256x64xf32>
    %9 = arith.addf %4, %8 : vector<256x64xf32>
    %c1 = arith.constant 1 : index
    %c0_12 = arith.constant 0 : index
    %10 = vector.load %arg7[%c1, %c0_12] : memref<272x128xbf16, #tpu.memory_space<vmem>>, vector<256x128xbf16>
    %c1_13 = arith.constant 1 : index
    %c0_14 = arith.constant 0 : index
    %c0_15 = arith.constant 0 : index
    %11 = vector.load %arg3[%c1_13, %c0_14, %c0_15] : memref<4x128x64xbf16, #tpu.memory_space<vmem>>, vector<1x128x64xbf16>
    %12 = vector.shape_cast %11 : vector<1x128x64xbf16> to vector<128x64xbf16>
    %cst_16 = arith.constant dense<0.000000e+00> : vector<256x64xf32>
    %13 = tpu.matmul %10, %12, %cst_16 {dimension_numbers = #tpu.dot_dimension_numbers<[1], [0], [0], [1], [0, 0, 1, 1], [], []>} : vector<256x128xbf16>, vector<128x64xbf16>, vector<256x64xf32> -> vector<256x64xf32>
    %14 = arith.addf %9, %13 : vector<256x64xf32>
    %c3 = arith.constant 3 : index
    %c0_17 = arith.constant 0 : index
    %15 = vector.load %arg7[%c3, %c0_17] : memref<272x128xbf16, #tpu.memory_space<vmem>>, vector<256x128xbf16>
    %c2 = arith.constant 2 : index
    %c0_18 = arith.constant 0 : index
    %c0_19 = arith.constant 0 : index
    %16 = vector.load %arg3[%c2, %c0_18, %c0_19] : memref<4x128x64xbf16, #tpu.memory_space<vmem>>, vector<1x128x64xbf16>
    %17 = vector.shape_cast %16 : vector<1x128x64xbf16> to vector<128x64xbf16>
    %cst_20 = arith.constant dense<0.000000e+00> : vector<256x64xf32>
    %18 = tpu.matmul %15, %17, %cst_20 {dimension_numbers = #tpu.dot_dimension_numbers<[1], [0], [0], [1], [0, 0, 1, 1], [], []>} : vector<256x128xbf16>, vector<128x64xbf16>, vector<256x64xf32> -> vector<256x64xf32>
    %19 = arith.addf %14, %18 : vector<256x64xf32>
    %c4 = arith.constant 4 : index
    %c0_21 = arith.constant 0 : index
    %20 = vector.load %arg7[%c4, %c0_21] : memref<272x128xbf16, #tpu.memory_space<vmem>>, vector<256x128xbf16>
    %c3_22 = arith.constant 3 : index
    %c0_23 = arith.constant 0 : index
    %c0_24 = arith.constant 0 : index
    %21 = vector.load %arg3[%c3_22, %c0_23, %c0_24] : memref<4x128x64xbf16, #tpu.memory_space<vmem>>, vector<1x128x64xbf16>
    %22 = vector.shape_cast %21 : vector<1x128x64xbf16> to vector<128x64xbf16>
    %cst_25 = arith.constant dense<0.000000e+00> : vector<256x64xf32>
    %23 = tpu.matmul %20, %22, %cst_25 {dimension_numbers = #tpu.dot_dimension_numbers<[1], [0], [0], [1], [0, 0, 1, 1], [], []>} : vector<256x128xbf16>, vector<128x64xbf16>, vector<256x64xf32> -> vector<256x64xf32>
    %24 = arith.addf %19, %23 : vector<256x64xf32>
    %c0_26 = arith.constant 0 : index
    %c0_27 = arith.constant 0 : index
    %25 = vector.load %arg4[%c0_26, %c0_27] : memref<1x64xf32, #tpu.memory_space<vmem>>, vector<1x64xf32>
    %26 = vector.broadcast %25 : vector<1x64xf32> to vector<256x64xf32>
    %27 = arith.mulf %24, %26 : vector<256x64xf32>
    %c0_28 = arith.constant 0 : index
    %c0_29 = arith.constant 0 : index
    %28 = vector.load %arg5[%c0_28, %c0_29] : memref<1x64xf32, #tpu.memory_space<vmem>>, vector<1x64xf32>
    %29 = vector.broadcast %28 : vector<1x64xf32> to vector<256x64xf32>
    %30 = arith.addf %27, %29 : vector<256x64xf32>
    %cst_30 = arith.constant 0.000000e+00 : f32
    %31 = vector.broadcast %cst_30 : f32 to vector<256x64xf32>
    %32 = arith.maximumf %30, %31 : vector<256x64xf32>
    %33 = arith.truncf %32 : vector<256x64xf32> to vector<256x64xbf16>
    %c0_31 = arith.constant 0 : index
    %c0_32 = arith.constant 0 : index
    %34 = vector.load %arg6[%c0_31, %c0_32] : memref<256x64xbf16, #tpu.memory_space<vmem>>, vector<256x64xbf16>
    tpu.vector_store %arg6[%c0_31, %c0_32], %33 {strides = array<i32>} : memref<256x64xbf16, #tpu.memory_space<vmem>>, vector<256x64xbf16>,
    return
  }
  func.func @transform_0(%arg0: i32) -> (i32, i32) {
    %c0_i32 = arith.constant 0 : i32
    %c0_i32_0 = arith.constant 0 : i32
    return %arg0, %c0_i32 : i32, i32
  }
  func.func @transform_1(%arg0: i32) -> (i32, i32) {
    %c1_i32 = arith.constant 1 : i32
    %0 = arith.addi %arg0, %c1_i32 : i32
    %c16_i32 = arith.constant 16 : i32
    %1 = arith.muli %0, %c16_i32 : i32
    %c0_i32 = arith.constant 0 : i32
    %c0_i32_0 = arith.constant 0 : i32
    return %1, %c0_i32 : i32, i32
  }
  func.func @transform_2(%arg0: i32) -> (i32, i32, i32) {
    %c0_i32 = arith.constant 0 : i32
    %c0_i32_0 = arith.constant 0 : i32
    %c0_i32_1 = arith.constant 0 : i32
    %c0_i32_2 = arith.constant 0 : i32
    return %c0_i32, %c0_i32_0, %c0_i32_1 : i32, i32, i32
  }
  func.func @transform_3(%arg0: i32) -> (i32, i32) {
    %c0_i32 = arith.constant 0 : i32
    %c0_i32_0 = arith.constant 0 : i32
    %c0_i32_1 = arith.constant 0 : i32
    return %c0_i32, %c0_i32_0 : i32, i32
  }
  func.func @transform_4(%arg0: i32) -> (i32, i32) {
    %c0_i32 = arith.constant 0 : i32
    %c0_i32_0 = arith.constant 0 : i32
    %c0_i32_1 = arith.constant 0 : i32
    return %c0_i32, %c0_i32_0 : i32, i32
  }
  func.func @transform_5(%arg0: i32) -> (i32, i32) {
    %c0_i32 = arith.constant 0 : i32
    %c0_i32_0 = arith.constant 0 : i32
    return %arg0, %c0_i32 : i32, i32
  }
}

module attributes {stable_mosaic.version = 11 : i64} {
  func.func @_linear_kernel(%arg0: i32, %arg1: i32, %arg2: i32, %arg3: memref<16x256xbf16, #tpu.memory_space<vmem>>, %arg4: memref<256x128xbf16, #tpu.memory_space<vmem>>, %arg5: memref<1x128xf32, #tpu.memory_space<vmem>>, %arg6: memref<16x128xf32, #tpu.memory_space<vmem>>, %arg7: memref<16x128xf32, #tpu.memory_space<vmem>>) attributes {dimension_semantics = [#tpu.dimension_semantics<parallel>, #tpu.dimension_semantics<parallel>, #tpu.dimension_semantics<arbitrary>], iteration_bounds = array<i64: 1, 1, 1>, scalar_prefetch = 0 : i64, scratch_operands = 1 : i64, tpu.core_type = #tpu.core_type<tc>, window_params = [{transform_indices = @transform_0, window_bounds = array<i64: 16, 256>}, {transform_indices = @transform_1, window_bounds = array<i64: 256, 128>}, {transform_indices = @transform_2, window_bounds = array<i64: 1, 128>}, {transform_indices = @transform_3, window_bounds = array<i64: 16, 128>}]} {
    %c0_i32 = arith.constant 0 : i32
    %0 = arith.cmpi eq, %arg2, %c0_i32 : i32
    %1 = arith.extui %0 : i1 to i32
    %c0_i32_0 = arith.constant 0 : i32
    %2 = arith.cmpi ne, %1, %c0_i32_0 : i32
    scf.if %2 {
      %cst_10 = arith.constant 0.000000e+00 : f32
      %12 = vector.broadcast %cst_10 : f32 to vector<16x128xf32>
      %c0_11 = arith.constant 0 : index
      %c0_12 = arith.constant 0 : index
      %13 = vector.load %arg7[%c0_11, %c0_12] : memref<16x128xf32, #tpu.memory_space<vmem>>, vector<16x128xf32>
      tpu.vector_store %arg7[%c0_11, %c0_12], %12 {strides = array<i32>} : memref<16x128xf32, #tpu.memory_space<vmem>>, vector<16x128xf32>,
    } else {
    }
    %c0 = arith.constant 0 : index
    %c0_1 = arith.constant 0 : index
    %3 = vector.load %arg7[%c0, %c0_1] : memref<16x128xf32, #tpu.memory_space<vmem>>, vector<16x128xf32>
    %c0_2 = arith.constant 0 : index
    %c0_3 = arith.constant 0 : index
    %4 = vector.load %arg3[%c0_2, %c0_3] : memref<16x256xbf16, #tpu.memory_space<vmem>>, vector<16x256xbf16>
    %c0_4 = arith.constant 0 : index
    %c0_5 = arith.constant 0 : index
    %5 = vector.load %arg4[%c0_4, %c0_5] : memref<256x128xbf16, #tpu.memory_space<vmem>>, vector<256x128xbf16>
    %cst = arith.constant dense<0.000000e+00> : vector<16x128xf32>
    %6 = tpu.matmul %4, %5, %cst {dimension_numbers = #tpu.dot_dimension_numbers<[1], [0], [0], [1], [0, 0, 1, 1], [], []>} : vector<16x256xbf16>, vector<256x128xbf16>, vector<16x128xf32> -> vector<16x128xf32>
    %7 = arith.addf %3, %6 : vector<16x128xf32>
    %c0_6 = arith.constant 0 : index
    %c0_7 = arith.constant 0 : index
    %8 = vector.load %arg7[%c0_6, %c0_7] : memref<16x128xf32, #tpu.memory_space<vmem>>, vector<16x128xf32>
    tpu.vector_store %arg7[%c0_6, %c0_7], %7 {strides = array<i32>} : memref<16x128xf32, #tpu.memory_space<vmem>>, vector<16x128xf32>,
    %c0_i32_8 = arith.constant 0 : i32
    %9 = arith.cmpi eq, %arg2, %c0_i32_8 : i32
    %10 = arith.extui %9 : i1 to i32
    %c0_i32_9 = arith.constant 0 : i32
    %11 = arith.cmpi ne, %10, %c0_i32_9 : i32
    scf.if %11 {
      %c0_10 = arith.constant 0 : index
      %c0_11 = arith.constant 0 : index
      %12 = vector.load %arg7[%c0_10, %c0_11] : memref<16x128xf32, #tpu.memory_space<vmem>>, vector<16x128xf32>
      %c0_12 = arith.constant 0 : index
      %c0_13 = arith.constant 0 : index
      %13 = vector.load %arg5[%c0_12, %c0_13] : memref<1x128xf32, #tpu.memory_space<vmem>>, vector<1x128xf32>
      %14 = vector.broadcast %13 : vector<1x128xf32> to vector<16x128xf32>
      %15 = arith.addf %12, %14 : vector<16x128xf32>
      %c0_14 = arith.constant 0 : index
      %c0_15 = arith.constant 0 : index
      %16 = vector.load %arg6[%c0_14, %c0_15] : memref<16x128xf32, #tpu.memory_space<vmem>>, vector<16x128xf32>
      tpu.vector_store %arg6[%c0_14, %c0_15], %15 {strides = array<i32>} : memref<16x128xf32, #tpu.memory_space<vmem>>, vector<16x128xf32>,
    } else {
    }
    return
  }
  func.func @transform_0(%arg0: i32, %arg1: i32, %arg2: i32) -> (i32, i32) {
    %c0_i32 = arith.constant 0 : i32
    return %arg0, %arg2 : i32, i32
  }
  func.func @transform_1(%arg0: i32, %arg1: i32, %arg2: i32) -> (i32, i32) {
    %c0_i32 = arith.constant 0 : i32
    return %arg2, %arg1 : i32, i32
  }
  func.func @transform_2(%arg0: i32, %arg1: i32, %arg2: i32) -> (i32, i32) {
    %c0_i32 = arith.constant 0 : i32
    %c0_i32_0 = arith.constant 0 : i32
    return %c0_i32, %arg1 : i32, i32
  }
  func.func @transform_3(%arg0: i32, %arg1: i32, %arg2: i32) -> (i32, i32) {
    %c0_i32 = arith.constant 0 : i32
    return %arg0, %arg1 : i32, i32
  }
}

</mosaic_0001>

<bundles_post_ra>
// kernel: _lambda_.5
= control target key start
LH: loop header
LB: loop body
LE: loop exit
PB: predicated region body
PF: predicated region fallthrough
CT: control target
= control target key end

     0   :  { %vm176_vm0 = vcmask 261120   ;;  %vm228_vm1 = vsmask.f32 7424  ;;  %vm794_vm2 = vsmask.f32 3328  ;;  %vm1148_vm3 = vcmask 1042432   ;;  %s2766_s2 = inlined_call_operand.vmem [shape: bf16[4,32,16], index: 2, kind: input, shape index: {}]   ;;  %s2767_s0 = inlined_call_operand.vmem [shape: bf16[272,32], index: 0, kind: input, shape index: {}, may-alias: {0,1}]   ;;  %s2768_s1 = inlined_call_operand.vmem [shape: bf16[272,32], index: 1, kind: input, shape index: {}, may-alias: {0,1}]   ;;  %s2769_s3 = inlined_call_operand.vmem [shape: f32[1,16], index: 3, kind: input, shape index: {}]   ;;  %s2770_s4 = inlined_call_operand.vmem [shape: f32[1,16], index: 4, kind: input, shape index: {}]   ;;  %s2771_s5 = inlined_call_operand.vmem [shape: bf16[256,16], index: 5, kind: output, shape index: {}]  }
   0x1   :  { %v2197_v0 = vld [vmem:[%s2766_s2 + $0x10] sm:$0xff]   ;;  %v2198_v1 = vld [vmem:[%s2766_s2 + $0x20] sm:$0xff]   ;;  %v2199_v2 = vld [vmem:[%s2766_s2 + $0x18] sm:$0xff]   ;;  %vm1673_vm4 = vcmask 125952  }
   0x2   :  { %1957 = vmatprep.subr.bf16.mxu1 %v2197_v0  ;;  %2029 = vmatprep.subr.bf16.mxu0 %v2198_v1  ;;  %v2200_v3 = vld [vmem:[%s2766_s2 + $0x28] sm:$0xff]   ;;  %v2201_v4 = vld [vmem:[%s2767_s0] sm:$0xff]   ;;  %v2280_v7 = vld [vmem:[%s2766_s2 + $0x30] sm:$0xff]  }
   0x3   :  { %1958 = vmatpush3.bf16.msra.mxu1 %v2197_v0  ;;  %2030 = vmatpush3.bf16.msra.mxu0 %v2198_v1  ;;  %v2202_v5 = vld [vmem:[%s2767_s0 + $0x8] sm:$0xff]   ;;  %v2273_v6 = vld [vmem:[%s2766_s2] sm:$0xff]   ;;  %177 = vst.msk [vmem:[#allocation2] sm:$0xff] %vm176_vm0, %v2201_v4  ;;  %v2205_v8 = vld [vmem:[%s2767_s0 + $0x10] sm:$0xff]  }
   0x4   :  { %1959 = vmatprep.subr.bf16.mxu1 %v2199_v2  ;;  %2031 = vmatprep.subr.bf16.mxu0 %v2200_v3  ;;  %178 = vst.msk [vmem:[#allocation2 + $0x8] sm:$0xff] %vm176_vm0, %v2202_v5  ;;  %v2206_v9 = vld [vmem:[%s2767_s0 + $0x18] sm:$0xff]   ;;  %179 = vst.msk [vmem:[#allocation2 + $0x10] sm:$0xff] %vm176_vm0, %v2205_v8  ;;  %v2207_v10 = vld [vmem:[%s2767_s0 + $0x20] sm:$0xff]  }
   0x5   :  { %180 = vst.msk [vmem:[#allocation2 + $0x18] sm:$0xff] %vm176_vm0, %v2206_v9  ;;  %v2208_v11 = vld [vmem:[%s2767_s0 + $0x28] sm:$0xff]   ;;  %181 = vst.msk [vmem:[#allocation2 + $0x20] sm:$0xff] %vm176_vm0, %v2207_v10  ;;  %v2209_v12 = vld [vmem:[%s2767_s0 + $0x30] sm:$0xff]  }
   0x6   :  { %182 = vst.msk [vmem:[#allocation2 + $0x28] sm:$0xff] %vm176_vm0, %v2208_v11  ;;  %v2210_v13 = vld [vmem:[%s2767_s0 + $0x38] sm:$0xff]   ;;  %183 = vst.msk [vmem:[#allocation2 + $0x30] sm:$0xff] %vm176_vm0, %v2209_v12  ;;  %v2211_v23 = vld [vmem:[%s2767_s0 + $0x40] sm:$0xff]  }
   0x7   :  { %1960 = vmatpush3.bf16.msra.mxu1 %v2199_v2  ;;  %2032 = vmatpush3.bf16.msra.mxu0 %v2200_v3  ;;  %184 = vst.msk [vmem:[#allocation2 + $0x38] sm:$0xff] %vm176_vm0, %v2210_v13  ;;  %v2212_v24 = vld [vmem:[%s2767_s0 + $0x48] sm:$0xff]   ;;  %185 = vst.msk [vmem:[#allocation2 + $0x40] sm:$0xff] %vm176_vm0, %v2211_v23  ;;  %v2214_v50 = vld [vmem:[%s2766_s2 + $0x38] sm:$0xff]  }
   0x8   :  { %1993 = vmatprep.subr.bf16.mxu1 %v2273_v6  ;;  %2065 = vmatprep.subr.bf16.mxu0 %v2280_v7  ;;  %186 = vst.msk [vmem:[#allocation2 + $0x48] sm:$0xff] %vm176_vm0, %v2212_v24  ;;  %v2213_v44 = vld [vmem:[%s2766_s2 + $0x8] sm:$0xff]   ;;  %v2215_v60 = vld [vmem:[%s2767_s0 + $0x50] sm:$0xff]  }
   0x9   :  { %187 = vst.msk [vmem:[#allocation2 + $0x50] sm:$0xff] %vm176_vm0, %v2215_v60  ;;  %v2218_v23 = vld [vmem:[%s2767_s0 + $0x68] sm:$0xff]   ;;  %v2219_v24 = vld [vmem:[%s2767_s0 + $0x70] sm:$0xff]  }
   0xa   :  { %v2306_v14 = vld [vmem:[#allocation2] sm:$0xff]  ;;  %190 = vst.msk [vmem:[#allocation2 + $0x68] sm:$0xff] %vm176_vm0, %v2218_v23  ;;  %191 = vst.msk [vmem:[#allocation2 + $0x70] sm:$0xff] %vm176_vm0, %v2219_v24 }
   0xb   :  { %v2308_v15 = vld [vmem:[#allocation2 + $0x8] sm:$0xff]  ;;  %v787_v16 = vld [vmem:[#allocation2] sm:$0xf0]  ;;  %v230_v17 = vshrl.u32 %v2306_v14, 16  ;;  %v232_v18 = vshll.u32 %v2306_v14, 16  ;;  %v2322_v29 = vld [vmem:[#allocation2 + $0x10] sm:$0xff] }
   0xc   :  { %v237_v19 = vshll.u32 %v2308_v15, 16  ;;  %v241_v20 = vshrl.u32 %v2308_v15, 16  ;;  %v796_v21 = vshrl.u32 %v787_v16, 16  ;;  %v799_v22 = vshll.u32 %v787_v16, 16  ;;  %v2326_v34 = vld [vmem:[#allocation2 + $0x18] sm:$0xff]  ;;  %v2331_v43 = vld [vmem:[#allocation2 + $0x20] sm:$0xff] }
   0xd   :  { %v234_v25 = vrot.slane %v232_v18, 1  ;;  %v245_v32 = vshll.u32 %v2322_v29, 16  ;;  %v249_v33 = vshrl.u32 %v2322_v29, 16  ;;  %v253_v38 = vshll.u32 %v2326_v34, 16  ;;  %v2338_v49 = vld [vmem:[#allocation2 + $0x28] sm:$0xff]  ;;  %v2346_v55 = vld [vmem:[#allocation2 + $0x30] sm:$0xff] }
   0xe   :  { %v239_v26 = vrot.slane %v237_v19, 1  ;;  %v803_v27 = vrot.slane %v241_v20, 4  ;;  %v804_v28 = vrot.slane %v237_v19, 5  ;;  %v798_v30 = vrot.slane %v796_v21, 4  ;;  %v2362_v5 = vld [vmem:[#allocation2 + $0x38] sm:$0xff] }
   0xf   :  { %v801_v31 = vrot.slane %v799_v22, 5  ;;  %v235_v35 = vor.u32 %v234_v25, %v230_v17  ;;  %v247_v40 = vrot.slane %v245_v32, 1  ;;  %v807_v41 = vrot.slane %v249_v33, 4  ;;  %v2217_v17 = vld [vmem:[%s2767_s0 + $0x60] sm:$0xff]  }
  0x10   :  { %v243_v36 = vor.u32 %v241_v20, %v239_v26  ;;  %v805_v37 = vor.u32 %v804_v28, %v803_v27  ;;  %v808_v42 = vrot.slane %v245_v32, 5  ;;  %v255_v46 = vrot.slane %v253_v38, 1  ;;  %189 = vst.msk [vmem:[#allocation2 + $0x60] sm:$0xff] %vm176_vm0, %v2217_v17  ;;  %v2220_v27 = vld [vmem:[%s2767_s0 + $0x78] sm:$0xff]  }
  0x11   :  { %v802_v39 = vor.u32 %v801_v31, %v798_v30  ;;  %v240_v45 = vsel %vm228_vm1, %v235_v35, %v239_v26  ;;  %v257_v47 = vshrl.u32 %v2326_v34, 16  ;;  %v812_v48 = vrot.slane %v253_v38, 5  ;;  %192 = vst.msk [vmem:[#allocation2 + $0x78] sm:$0xff] %vm176_vm0, %v2220_v27 }
  0x12   :  { %1961 = vmatprep.mubr.msk.bf16.mxu1 %vm176_vm0, %v240_v45  ;;  %v248_v52 = vsel %vm228_vm1, %v243_v36, %v247_v40  ;;  %v809_v53 = vor.u32 %v808_v42, %v807_v41  ;;  %v251_v54 = vor.u32 %v249_v33, %v247_v40  ;;  %v261_v58 = vshll.u32 %v2331_v43, 16  ;;  %v2394_v33 = vld [vmem:[#allocation2 + $0x40] sm:$0xff]  ;;  %v2399_v36 = vld [vmem:[#allocation2 + $0x48] sm:$0xff] }
  0x13   :  { %v806_v51 = vsel %vm794_vm2, %v802_v39, %v805_v37  ;;  %1962 = vmatmul.mubr.msk.bf16.vlgmr.msra.gmra.mrb[0].mxu1 %vm176_vm0, %v248_v52  ;;  %v811_v56 = vrot.slane %v257_v47, 4  ;;  %v259_v57 = vor.u32 %v257_v47, %v255_v46  ;;  %v265_v59 = vshrl.u32 %v2331_v43, 16  ;;  %v2221_v40 = vld [vmem:[%s2768_s1 + $0x80] sm:$0xff]  }
  0x14   :  { %2033 = vmatprep.mubr.msk.bf16.mxu0 %vm176_vm0, %v806_v51  ;;  %1994 = vmatpush3.bf16.msra.mxu1 %v2273_v6  ;;  %v810_v61 = vsel %vm794_vm2, %v805_v37, %v809_v53  ;;  %v256_v62 = vsel %vm228_vm1, %v251_v54, %v255_v46  ;;  %v269_v63 = vshll.u32 %v2338_v49, 16  ;;  %v273_v0 = vshrl.u32 %v2338_v49, 16  ;;  %v2216_v6 = vld [vmem:[%s2767_s0 + $0x58] sm:$0xff]   ;;  %201 = vst.msk [vmem:[#allocation2 + $0x80] sm:$0xff] %vm176_vm0, %v2221_v40 }
  0x15   :  { %2034 = vmatmul.mubr.msk.bf16.vlgmr.msra.gmra.mrb[0].mxu0 %vm176_vm0, %v810_v61  ;;  %1965 = vmatprep.mubr.msk.bf16.mxu1 %vm176_vm0, %v256_v62  ;;  %v813_v1 = vor.u32 %v812_v48, %v811_v56  ;;  %v263_v2 = vrot.slane %v261_v58, 1  ;;  %v815_v3 = vrot.slane %v265_v59, 4  ;;  %v816_v4 = vrot.slane %v261_v58, 5  ;;  %188 = vst.msk [vmem:[#allocation2 + $0x58] sm:$0xff] %vm176_vm0, %v2216_v6 }
  0x16   :  { %2066 = vmatpush3.bf16.msra.mxu0 %v2280_v7  ;;  %v271_v8 = vrot.slane %v269_v63, 1  ;;  %v819_v9 = vrot.slane %v273_v0, 4  ;;  %v820_v10 = vrot.slane %v269_v63, 5  ;;  %v277_v11 = vshll.u32 %v2346_v55, 16  ;;  %1995 = vmatprep.subr.bf16.mxu1 %v2213_v44 }
  0x17   :  { %v814_v12 = vsel %vm794_vm2, %v809_v53, %v813_v1  ;;  %v817_v13 = vor.u32 %v816_v4, %v815_v3  ;;  %v267_v16 = vor.u32 %v265_v59, %v263_v2  ;;  %2067 = vmatprep.subr.bf16.mxu0 %v2214_v50  ;;  %v264_v7 = vsel %vm228_vm1, %v259_v57, %v263_v2  ;;  %v2417_v59 = vld [vmem:[#allocation2 + $0x50] sm:$0xff] }
  0x18   :  { %2037 = vmatprep.mubr.msk.bf16.mxu0 %vm176_vm0, %v814_v12  ;;  %v821_v18 = vor.u32 %v820_v10, %v819_v9  ;;  %v281_v19 = vshrl.u32 %v2346_v55, 16  ;;  %1996 = vmatpush3.bf16.msra.mxu1 %v2213_v44  ;;  %v824_v21 = vrot.slane %v277_v11, 5  ;;  %v285_v22 = vshll.u32 %v2362_v5, 16 }
  0x19   :  { %v272_v20 = vsel %vm228_vm1, %v267_v16, %v271_v8  ;;  %v818_v25 = vsel %vm794_vm2, %v813_v1, %v817_v13  ;;  %v279_v30 = vrot.slane %v277_v11, 1  ;;  %v289_v31 = vshrl.u32 %v2362_v5, 16 }
  0x1a   :  { %v823_v26 = vrot.slane %v281_v19, 4  ;;  %2068 = vmatpush3.bf16.msra.mxu0 %v2214_v50  ;;  %v822_v28 = vsel %vm794_vm2, %v817_v13, %v821_v18  ;;  %v828_v32 = vrot.slane %v285_v22, 5  ;;  %v275_v35 = vor.u32 %v273_v0, %v271_v8 }
  0x1b   :  { %1966 = vmatmul.mubr.msk.bf16.gmra.mrb[4].mxu1 %vm176_vm0, %v264_v7  ;;  %v283_v37 = vor.u32 %v281_v19, %v279_v30  ;;  %v287_v38 = vrot.slane %v285_v22, 1  ;;  %v827_v39 = vrot.slane %v289_v31, 4  ;;  %v293_v42 = vshll.u32 %v2394_v33, 16 }
  0x1c   :  { %1969 = vmatprep.mubr.msk.bf16.mxu1 %vm176_vm0, %v272_v20  ;;  %v825_v41 = vor.u32 %v824_v21, %v823_v26  ;;  %v297_v44 = vshrl.u32 %v2394_v33, 16  ;;  %v301_v46 = vshll.u32 %v2399_v36, 16  ;;  %v305_v47 = vshrl.u32 %v2399_v36, 16  ;;  %v2420_v61 = vld [vmem:[#allocation2 + $0x58] sm:$0xff]  ;;  %v2436_v20 = vld [vmem:[#allocation2 + $0x68] sm:$0xff] }
  0x1d   :  { %2038 = vmatmul.mubr.msk.bf16.gmra.mrb[4].mxu0 %vm176_vm0, %v818_v25  ;;  %v829_v45 = vor.u32 %v828_v32, %v827_v39  ;;  %v280_v48 = vsel %vm228_vm1, %v275_v35, %v279_v30  ;;  %v288_v50 = vsel %vm228_vm1, %v283_v37, %v287_v38  ;;  %v832_v53 = vrot.slane %v293_v42, 5 }
  0x1e   :  { %2041 = vmatprep.mubr.msk.bf16.mxu0 %vm176_vm0, %v822_v28  ;;  %v826_v51 = vsel %vm794_vm2, %v821_v18, %v825_v41  ;;  %v831_v52 = vrot.slane %v297_v44, 4  ;;  %v295_v56 = vrot.slane %v293_v42, 1  ;;  %v835_v57 = vrot.slane %v305_v47, 4  ;;  %v2433_v18 = vld [vmem:[#allocation2 + $0x60] sm:$0xff]  ;;  %v2449_v42 = vld [vmem:[#allocation2 + $0x70] sm:$0xff] }
  0x1f   :  { %v830_v54 = vsel %vm794_vm2, %v825_v41, %v829_v45  ;;  %v836_v58 = vrot.slane %v301_v46, 5  ;;  %v291_v60 = vor.u32 %v289_v31, %v287_v38  ;;  %v303_v63 = vrot.slane %v301_v46, 1 }
  0x20   :  { %v299_v62 = vor.u32 %v297_v44, %v295_v56  ;;  %v833_v0 = vor.u32 %v832_v53, %v831_v52  ;;  %v309_v1 = vshll.u32 %v2417_v59, 16  ;;  %v313_v2 = vshrl.u32 %v2417_v59, 16 }
  0x21   :  { %v837_v3 = vor.u32 %v836_v58, %v835_v57  ;;  %v317_v4 = vshll.u32 %v2420_v61, 16  ;;  %v321_v6 = vshrl.u32 %v2420_v61, 16  ;;  %v296_v8 = vsel %vm228_vm1, %v291_v60, %v295_v56 }
  0x22   :  { %v304_v9 = vsel %vm228_vm1, %v299_v62, %v303_v63  ;;  %v834_v10 = vsel %vm794_vm2, %v829_v45, %v833_v0  ;;  %v839_v11 = vrot.slane %v313_v2, 4  ;;  %v840_v12 = vrot.slane %v309_v1, 5  ;;  %v2452_v45 = vld [vmem:[#allocation2 + $0x78] sm:$0xff] }
  0x23   :  { %1970 = vmatmul.mubr.msk.bf16.gmra.mrb[8].mxu1 %vm176_vm0, %v280_v48  ;;  %v838_v13 = vsel %vm794_vm2, %v833_v0, %v837_v3  ;;  %v311_v16 = vrot.slane %v309_v1, 1  ;;  %v843_v17 = vrot.slane %v321_v6, 4  ;;  %v844_v7 = vrot.slane %v317_v4, 5 }
  0x24   :  { %1973 = vmatprep.mubr.msk.bf16.mxu1 %vm176_vm0, %v288_v50  ;;  %v307_v19 = vor.u32 %v305_v47, %v303_v63  ;;  %v319_v22 = vrot.slane %v317_v4, 1  ;;  %v841_v23 = vor.u32 %v840_v12, %v839_v11  ;;  %v325_v24 = vshll.u32 %v2433_v18, 16 }
  0x25   :  { %2042 = vmatmul.mubr.msk.bf16.gmra.mrb[8].mxu0 %vm176_vm0, %v826_v51  ;;  %v315_v21 = vor.u32 %v313_v2, %v311_v16  ;;  %v329_v25 = vshrl.u32 %v2433_v18, 16  ;;  %v845_v26 = vor.u32 %v844_v7, %v843_v17  ;;  %v333_v27 = vshll.u32 %v2436_v20, 16 }
  0x26   :  { %2045 = vmatprep.mubr.msk.bf16.mxu0 %vm176_vm0, %v830_v54  ;;  %v337_v28 = vshrl.u32 %v2436_v20, 16  ;;  %v312_v30 = vsel %vm228_vm1, %v307_v19, %v311_v16  ;;  %v842_v32 = vsel %vm794_vm2, %v837_v3, %v841_v23  ;;  %v848_v37 = vrot.slane %v325_v24, 5  ;;  %v2465_v3 = vld [vmem:[#allocation2 + $0x80] sm:$0x1f] }
  0x27   :  { %v320_v31 = vsel %vm228_vm1, %v315_v21, %v319_v22  ;;  %v847_v35 = vrot.slane %v329_v25, 4  ;;  %v846_v38 = vsel %vm794_vm2, %v841_v23, %v845_v26  ;;  %v327_v39 = vrot.slane %v325_v24, 1 }
  0x28   :  { %v851_v40 = vrot.slane %v337_v28, 4  ;;  %v852_v41 = vrot.slane %v333_v27, 5  ;;  %v323_v44 = vor.u32 %v321_v6, %v319_v22  ;;  %v335_v47 = vrot.slane %v333_v27, 1 }
  0x29   :  { %v331_v46 = vor.u32 %v329_v25, %v327_v39  ;;  %v849_v48 = vor.u32 %v848_v37, %v847_v35  ;;  %v341_v50 = vshll.u32 %v2449_v42, 16  ;;  %v345_v51 = vshrl.u32 %v2449_v42, 16 }
  0x2a   :  { %v853_v52 = vor.u32 %v852_v41, %v851_v40  ;;  %v349_v53 = vshll.u32 %v2452_v45, 16  ;;  %v353_v54 = vshrl.u32 %v2452_v45, 16  ;;  %v328_v56 = vsel %vm228_vm1, %v323_v44, %v327_v39 }
  0x2b   :  { %1974 = vmatmul.mubr.msk.bf16.gmra.mrb[12].mxu1 %vm176_vm0, %v296_v8  ;;  %v336_v57 = vsel %vm228_vm1, %v331_v46, %v335_v47  ;;  %v850_v58 = vsel %vm794_vm2, %v845_v26, %v849_v48  ;;  %v855_v60 = vrot.slane %v345_v51, 4  ;;  %v856_v62 = vrot.slane %v341_v50, 5  ;;  %v1125_v26 = vld [vmem:[#allocation2] sm:$0xe0] }
  0x2c   :  { %1977 = vmatprep.mubr.msk.bf16.mxu1 %vm176_vm0, %v304_v9  ;;  %v854_v63 = vsel %vm794_vm2, %v849_v48, %v853_v52  ;;  %v343_v0 = vrot.slane %v341_v50, 1  ;;  %v859_v1 = vrot.slane %v353_v54, 4  ;;  %v860_v2 = vrot.slane %v349_v53, 5  ;;  %v222_v9 = vld [vmem:[#allocation2 + $0x80] sm:$0x1] }
  0x2d   :  { %2046 = vmatmul.mubr.msk.bf16.gmra.mrb[12].mxu0 %vm176_vm0, %v834_v10  ;;  %v339_v4 = vor.u32 %v337_v28, %v335_v47  ;;  %v351_v8 = vrot.slane %v349_v53, 1  ;;  %v857_v10 = vor.u32 %v856_v62, %v855_v60  ;;  %v864_v11 = vshrl.u32 %v2465_v3, 16 }
  0x2e   :  { %2049 = vmatprep.mubr.msk.bf16.mxu0 %vm176_vm0, %v838_v13  ;;  %v347_v6 = vor.u32 %v345_v51, %v343_v0  ;;  %v867_v12 = vshll.u32 %v2465_v3, 16  ;;  %v861_v13 = vor.u32 %v860_v2, %v859_v1  ;;  %v357_v17 = vshll.u32 %v222_v9, 16 }
  0x2f   :  { %v344_v16 = vsel %vm228_vm1, %v339_v4, %v343_v0  ;;  %v858_v19 = vsel %vm794_vm2, %v853_v52, %v857_v10  ;;  %v866_v21 = vrot.slane %v864_v11, 4  ;;  %v355_v24 = vor.u32 %v353_v54, %v351_v8 }
  0x30   :  { %v352_v7 = vsel %vm228_vm1, %v347_v6, %v351_v8  ;;  %v869_v22 = vrot.slane %v867_v12, 5  ;;  %v862_v23 = vsel %vm794_vm2, %v857_v10, %v861_v13  ;;  %v359_v25 = vrot.slane %v357_v17, 1 }
  0x31   :  { %v1149_v28 = vrot.slane %v1125_v26, 5  ;;  %v1152_v37 = vrot.slane %v2322_v29, 5  ;;  %v1158_v41 = vrot.slane %v2338_v49, 5  ;;  %v1162_v46 = vrot.slane %v2362_v5, 5 }
  0x32   :  { %v870_v27 = vor.u32 %v869_v22, %v866_v21  ;;  %v1166_v48 = vrot.slane %v2399_v36, 5  ;;  %v1170_v51 = vrot.slane %v2420_v61, 5  ;;  %v1174_v53 = vrot.slane %v2436_v20, 5 }
  0x33   :  { %1978 = vmatmul.mubr.msk.bf16.gmra.mrb[16].mxu1 %vm176_vm0, %v312_v30  ;;  %v1150_v30 = vrot.slane %v2308_v15, 5 }
  0x34   :  { %1981 = vmatprep.mubr.msk.bf16.mxu1 %vm176_vm0, %v320_v31  ;;  %v360_v31 = vsel %vm228_vm1, %v355_v24, %v359_v25 }
  0x35   :  { %2050 = vmatmul.mubr.msk.bf16.gmra.mrb[16].mxu0 %vm176_vm0, %v842_v32  ;;  %v871_v32 = vsel %vm794_vm2, %v861_v13, %v870_v27  ;;  %v1151_v35 = vsel %vm1148_vm3, %v1149_v28, %v1150_v30  ;;  %v1153_v39 = vsel %vm1148_vm3, %v1150_v30, %v1152_v37 }
  0x36   :  { %2053 = vmatprep.mubr.msk.bf16.mxu0 %vm176_vm0, %v846_v38  ;;  %v1154_v38 = vrot.slane %v2326_v34, 5 }
  0x38   :  { %v1155_v40 = vsel %vm1148_vm3, %v1152_v37, %v1154_v38 }
  0x3b   :  { %1982 = vmatmul.mubr.msk.bf16.gmra.mrb[20].mxu1 %vm176_vm0, %v328_v56  ;;  %v1178_v56 = vrot.slane %v2452_v45, 5 }
  0x3c   :  { %1985 = vmatprep.mubr.msk.bf16.mxu1 %vm176_vm0, %v336_v57 }
  0x3d   :  { %2054 = vmatmul.mubr.msk.bf16.gmra.mrb[20].mxu0 %vm176_vm0, %v850_v58 }
  0x3e   :  { %2057 = vmatprep.mubr.msk.bf16.mxu0 %vm176_vm0, %v854_v63 }
  0x43   :  { %1986 = vmatmul.mubr.msk.bf16.gmra.mrb[24].mxu1 %vm176_vm0, %v344_v16 }
  0x44   :  { %1989 = vmatprep.mubr.msk.bf16.mxu1 %vm176_vm0, %v352_v7 }
  0x45   :  { %2058 = vmatmul.mubr.msk.bf16.gmra.mrb[24].mxu0 %vm176_vm0, %v858_v19 }
  0x46   :  { %2061 = vmatprep.mubr.msk.bf16.mxu0 %vm176_vm0, %v862_v23 }
  0x4b   :  { %1990 = vmatmul.mubr.msk.bf16.gmra.mrb[28].mxu1 %vm176_vm0, %v360_v31 }
  0x4c   :  { %1997 = vmatprep.mubr.msk.bf16.mxu1 %vm176_vm0, %v2306_v14  ;;  %v1156_v14 = vrot.slane %v2331_v43, 5 }
  0x4d   :  { %2062 = vmatmul.mubr.msk.bf16.gmra.mrb[28].mxu0 %vm176_vm0, %v871_v32 }
  0x4e   :  { %2069 = vmatprep.mubr.msk.bf16.mxu0 %vm176_vm0, %v1151_v35  ;;  %v1157_v44 = vsel %vm1148_vm3, %v1154_v38, %v1156_v14 }
  0x53   :  { %1998 = vmatmul.mubr.msk.bf16.vlgmr.msra.gmra.mrb[0].mxu1 %vm176_vm0, %v2308_v15  ;;  %v1159_v15 = vsel %vm1148_vm3, %v1156_v14, %v1158_v41 }
  0x54   :  { %2001 = vmatprep.mubr.msk.bf16.mxu1 %vm176_vm0, %v2322_v29  ;;  %v1160_v29 = vrot.slane %v2346_v55, 5 }
  0x55   :  { %2070 = vmatmul.mubr.msk.bf16.vlgmr.msra.gmra.mrb[0].mxu0 %vm176_vm0, %v1153_v39 }
  0x56   :  { %2073 = vmatprep.mubr.msk.bf16.mxu0 %vm176_vm0, %v1155_v40  ;;  %v1161_v47 = vsel %vm1148_vm3, %v1158_v41, %v1160_v29 }
  0x5b   :  { %2002 = vmatmul.mubr.msk.bf16.gmra.mrb[4].mxu1 %vm176_vm0, %v2326_v34  ;;  %v1163_v34 = vsel %vm1148_vm3, %v1160_v29, %v1162_v46 }
  0x5c   :  { %2005 = vmatprep.mubr.msk.bf16.mxu1 %vm176_vm0, %v2331_v43  ;;  %v1164_v43 = vrot.slane %v2394_v33, 5 }
  0x5d   :  { %2074 = vmatmul.mubr.msk.bf16.gmra.mrb[4].mxu0 %vm176_vm0, %v1157_v44 }
  0x5e   :  { %2077 = vmatprep.mubr.msk.bf16.mxu0 %vm176_vm0, %v1159_v15  ;;  %v1165_v50 = vsel %vm1148_vm3, %v1162_v46, %v1164_v43 }
  0x63   :  { %2006 = vmatmul.mubr.msk.bf16.gmra.mrb[8].mxu1 %vm176_vm0, %v2338_v49  ;;  %v1167_v49 = vsel %vm1148_vm3, %v1164_v43, %v1166_v48 }
  0x64   :  { %2009 = vmatprep.mubr.msk.bf16.mxu1 %vm176_vm0, %v2346_v55  ;;  %v1168_v55 = vrot.slane %v2417_v59, 5 }
  0x65   :  { %2078 = vmatmul.mubr.msk.bf16.gmra.mrb[8].mxu0 %vm176_vm0, %v1161_v47 }
  0x66   :  { %2081 = vmatprep.mubr.msk.bf16.mxu0 %vm176_vm0, %v1163_v34  ;;  %v1169_v52 = vsel %vm1148_vm3, %v1166_v48, %v1168_v55 }
  0x6b   :  { %2010 = vmatmul.mubr.msk.bf16.gmra.mrb[12].mxu1 %vm176_vm0, %v2362_v5  ;;  %v1171_v5 = vsel %vm1148_vm3, %v1168_v55, %v1170_v51 }
  0x6c   :  { %2013 = vmatprep.mubr.msk.bf16.mxu1 %vm176_vm0, %v2394_v33  ;;  %v1172_v33 = vrot.slane %v2433_v18, 5 }
  0x6d   :  { %2082 = vmatmul.mubr.msk.bf16.gmra.mrb[12].mxu0 %vm176_vm0, %v1165_v50 }
  0x6e   :  { %2085 = vmatprep.mubr.msk.bf16.mxu0 %vm176_vm0, %v1167_v49  ;;  %v1173_v54 = vsel %vm1148_vm3, %v1170_v51, %v1172_v33 }
  0x73   :  { %2014 = vmatmul.mubr.msk.bf16.gmra.mrb[16].mxu1 %vm176_vm0, %v2399_v36  ;;  %v1175_v36 = vsel %vm1148_vm3, %v1172_v33, %v1174_v53 }
  0x74   :  { %2017 = vmatprep.mubr.msk.bf16.mxu1 %vm176_vm0, %v2417_v59  ;;  %v1176_v59 = vrot.slane %v2449_v42, 5 }
  0x75   :  { %2086 = vmatmul.mubr.msk.bf16.gmra.mrb[16].mxu0 %vm176_vm0, %v1169_v52 }
  0x76   :  { %2089 = vmatprep.mubr.msk.bf16.mxu0 %vm176_vm0, %v1171_v5  ;;  %v1177_v57 = vsel %vm1148_vm3, %v1174_v53, %v1176_v59 }
  0x7b   :  { %2018 = vmatmul.mubr.msk.bf16.gmra.mrb[20].mxu1 %vm176_vm0, %v2420_v61  ;;  %v1179_v61 = vsel %vm1148_vm3, %v1176_v59, %v1178_v56 }
  0x7c   :  { %2021 = vmatprep.mubr.msk.bf16.mxu1 %vm176_vm0, %v2433_v18  ;;  %v1180_v18 = vrot.slane %v2465_v3, 5  ;;  %v2572_v3 = vld [vmem:[%s2770_s4] ss:$0 sm:$0xff] }
  0x7d   :  { %2090 = vmatmul.mubr.msk.bf16.gmra.mrb[20].mxu0 %vm176_vm0, %v1173_v54 }
  0x7e   :  { %2093 = vmatprep.mubr.msk.bf16.mxu0 %vm176_vm0, %v1175_v36  ;;  %v1181_v58 = vsel %vm1148_vm3, %v1178_v56, %v1180_v18 }
  0x83   :  { %2022 = vmatmul.mubr.msk.bf16.gmra.mrb[24].mxu1 %vm176_vm0, %v2436_v20 }
  0x84   :  { %2025 = vmatprep.mubr.msk.bf16.mxu1 %vm176_vm0, %v2449_v42  ;;  %v2567_v42 = vld [vmem:[%s2769_s3] ss:$0 sm:$0xff] }
  0x85   :  { %2094 = vmatmul.mubr.msk.bf16.gmra.mrb[24].mxu0 %vm176_vm0, %v1177_v57 }
  0x86   :  { %2097 = vmatprep.mubr.msk.bf16.mxu0 %vm176_vm0, %v1179_v61 }
  0x8b   :  { %2026 = vmatmul.mubr.msk.bf16.gmra.mrb[28].mxu1 %vm176_vm0, %v2452_v45 }
  0x8d   :  { %2098 = vmatmul.mubr.msk.bf16.gmra.mrb[28].mxu0 %vm176_vm0, %v1181_v58 }
 0x126   :  { %v1999_v60 = vpop.f32.mrb[0].mxu1 }
 0x127   :  { %v660_v20 = vpop.f32.mrb[1].mxu1 }
 0x128   :  { %v2071_v62 = vpop.f32.mrb[0].mxu0  ;;  %v2000_v63 = vpop.f32.mrb[2].mxu1 }
 0x129   :  { %v2101_v0 = vadd.f32 %v2071_v62, %v1999_v60  ;;  %v1276_v1 = vpop.f32.mrb[1].mxu0  ;;  %v663_v2 = vpop.f32.mrb[3].mxu1 }
 0x12a   :  { %v2102_v45 = vadd.f32 %v1276_v1, %v660_v20  ;;  %v2072_v4 = vpop.f32.mrb[2].mxu0 }
 0x12b   :  { %v1444_v6 = vmul.f32 %v2101_v0, %v2567_v42  ;;  %v2103_v8 = vadd.f32 %v2072_v4, %v2000_v63  ;;  %v1279_v9 = vpop.f32.mrb[3].mxu0 }
 0x12c   :  { %v1442_v10 = vmul.f32 %v2102_v45, %v2567_v42  ;;  %v2104_v11 = vadd.f32 %v1279_v9, %v663_v2 }
 0x12d   :  { %v1483_v12 = vadd.f32 %v2572_v3, %v1444_v6  ;;  %v1445_v13 = vmul.f32 %v2103_v8, %v2567_v42 }
 0x12e   :  { %v1481_v16 = vadd.f32 %v2572_v3, %v1442_v10  ;;  %v1443_v17 = vmul.f32 %v2104_v11, %v2567_v42  ;;  %v2003_v7 = vpop.f32.mrb[4].mxu1 }
 0x12f   :  { %v1515_v19 = vmax.f32 %v1483_v12, 0.0  ;;  %v1484_v21 = vadd.f32 %v2572_v3, %v1445_v13  ;;  %v676_v22 = vpop.f32.mrb[5].mxu1 }
 0x130   :  { %v1513_v23 = vmax.f32 %v1481_v16, 0.0  ;;  %v1482_v24 = vadd.f32 %v2572_v3, %v1443_v17  ;;  %v2075_v25 = vpop.f32.mrb[4].mxu0  ;;  %v2004_v26 = vpop.f32.mrb[6].mxu1 }
 0x131   :  { %v1855_v27 = vpack.c.bf16 %v1515_v19, %v1515_v19  ;;  %v1516_v28 = vmax.f32 %v1484_v21, 0.0  ;;  %v2105_v30 = vadd.f32 %v2075_v25, %v2003_v7  ;;  %v1292_v31 = vpop.f32.mrb[5].mxu0  ;;  %v679_v32 = vpop.f32.mrb[7].mxu1 }
 0x132   :  { %v1853_v35 = vpack.c.bf16 %v1513_v23, %v1513_v23  ;;  %v1514_v37 = vmax.f32 %v1482_v24, 0.0  ;;  %v2106_v38 = vadd.f32 %v1292_v31, %v676_v22  ;;  %v2076_v39 = vpop.f32.mrb[6].mxu0 }
 0x133   :  { %1676 = vst.msk [vmem:[%s2771_s5 + $0x8] sm:$0xf] %vm1673_vm4, %v1855_v27  ;;  %v1856_v40 = vpack.c.bf16 %v1516_v28, %v1516_v28  ;;  %v1448_v14 = vmul.f32 %v2105_v30, %v2567_v42  ;;  %v2107_v41 = vadd.f32 %v2076_v39, %v2004_v26  ;;  %v1295_v44 = vpop.f32.mrb[7].mxu0 }
 0x134   :  { %1674 = vst.msk [vmem:[%s2771_s5] sm:$0xf] %vm1673_vm4, %v1853_v35  ;;  %v1854_v15 = vpack.c.bf16 %v1514_v37, %v1514_v37  ;;  %v1446_v29 = vmul.f32 %v2106_v38, %v2567_v42  ;;  %v2108_v46 = vadd.f32 %v1295_v44, %v679_v32 }
 0x135   :  { %1677 = vst.msk [vmem:[%s2771_s5 + $0xc] sm:$0xf] %vm1673_vm4, %v1856_v40  ;;  %v1487_v47 = vadd.f32 %v2572_v3, %v1448_v14  ;;  %v1449_v34 = vmul.f32 %v2107_v41, %v2567_v42 }
 0x136   :  { %1675 = vst.msk [vmem:[%s2771_s5 + $0x4] sm:$0xf] %vm1673_vm4, %v1854_v15  ;;  %v1485_v43 = vadd.f32 %v2572_v3, %v1446_v29  ;;  %v1447_v48 = vmul.f32 %v2108_v46, %v2567_v42  ;;  %v2007_v50 = vpop.f32.mrb[8].mxu1 }
 0x137   :  { %v1519_v49 = vmax.f32 %v1487_v47, 0.0  ;;  %v1488_v55 = vadd.f32 %v2572_v3, %v1449_v34  ;;  %v692_v51 = vpop.f32.mrb[9].mxu1 }
 0x138   :  { %v1517_v52 = vmax.f32 %v1485_v43, 0.0  ;;  %v1486_v5 = vadd.f32 %v2572_v3, %v1447_v48  ;;  %v2079_v33 = vpop.f32.mrb[8].mxu0  ;;  %v2008_v53 = vpop.f32.mrb[10].mxu1 }
 0x139   :  { %v1859_v54 = vpack.c.bf16 %v1519_v49, %v1519_v49  ;;  %v1520_v36 = vmax.f32 %v1488_v55, 0.0  ;;  %v2109_v59 = vadd.f32 %v2079_v33, %v2007_v50  ;;  %v1308_v56 = vpop.f32.mrb[9].mxu0  ;;  %v695_v57 = vpop.f32.mrb[11].mxu1 }
 0x13a   :  { %v1857_v61 = vpack.c.bf16 %v1517_v52, %v1517_v52  ;;  %v1518_v18 = vmax.f32 %v1486_v5, 0.0  ;;  %v2110_v58 = vadd.f32 %v1308_v56, %v692_v51  ;;  %v2080_v60 = vpop.f32.mrb[10].mxu0 }
 0x13b   :  { %1680 = vst.msk [vmem:[%s2771_s5 + $0x18] sm:$0xf] %vm1673_vm4, %v1859_v54  ;;  %v1860_v20 = vpack.c.bf16 %v1520_v36, %v1520_v36  ;;  %v1452_v62 = vmul.f32 %v2109_v59, %v2567_v42  ;;  %v2111_v63 = vadd.f32 %v2080_v60, %v2008_v53  ;;  %v1311_v0 = vpop.f32.mrb[11].mxu0 }
 0x13c   :  { %1678 = vst.msk [vmem:[%s2771_s5 + $0x10] sm:$0xf] %vm1673_vm4, %v1857_v61  ;;  %v1858_v1 = vpack.c.bf16 %v1518_v18, %v1518_v18  ;;  %v1450_v2 = vmul.f32 %v2110_v58, %v2567_v42  ;;  %v2112_v45 = vadd.f32 %v1311_v0, %v695_v57 }
 0x13d   :  { %1681 = vst.msk [vmem:[%s2771_s5 + $0x1c] sm:$0xf] %vm1673_vm4, %v1860_v20  ;;  %v1491_v4 = vadd.f32 %v2572_v3, %v1452_v62  ;;  %v1453_v6 = vmul.f32 %v2111_v63, %v2567_v42 }
 0x13e   :  { %1679 = vst.msk [vmem:[%s2771_s5 + $0x14] sm:$0xf] %vm1673_vm4, %v1858_v1  ;;  %v1489_v8 = vadd.f32 %v2572_v3, %v1450_v2  ;;  %v1451_v9 = vmul.f32 %v2112_v45, %v2567_v42  ;;  %v2011_v10 = vpop.f32.mrb[12].mxu1 }
 0x13f   :  { %v1523_v11 = vmax.f32 %v1491_v4, 0.0  ;;  %v1492_v12 = vadd.f32 %v2572_v3, %v1453_v6  ;;  %v708_v13 = vpop.f32.mrb[13].mxu1 }
 0x140   :  { %v1521_v16 = vmax.f32 %v1489_v8, 0.0  ;;  %v1490_v17 = vadd.f32 %v2572_v3, %v1451_v9  ;;  %v2083_v7 = vpop.f32.mrb[12].mxu0  ;;  %v2012_v19 = vpop.f32.mrb[14].mxu1 }
 0x141   :  { %v1863_v21 = vpack.c.bf16 %v1523_v11, %v1523_v11  ;;  %v1524_v22 = vmax.f32 %v1492_v12, 0.0  ;;  %v2113_v23 = vadd.f32 %v2083_v7, %v2011_v10  ;;  %v1324_v24 = vpop.f32.mrb[13].mxu0  ;;  %v711_v25 = vpop.f32.mrb[15].mxu1 }
 0x142   :  { %v1861_v26 = vpack.c.bf16 %v1521_v16, %v1521_v16  ;;  %v1522_v27 = vmax.f32 %v1490_v17, 0.0  ;;  %v2114_v28 = vadd.f32 %v1324_v24, %v708_v13  ;;  %v2084_v30 = vpop.f32.mrb[14].mxu0 }
 0x143   :  { %1684 = vst.msk [vmem:[%s2771_s5 + $0x28] sm:$0xf] %vm1673_vm4, %v1863_v21  ;;  %v1864_v31 = vpack.c.bf16 %v1524_v22, %v1524_v22  ;;  %v1456_v32 = vmul.f32 %v2113_v23, %v2567_v42  ;;  %v2115_v35 = vadd.f32 %v2084_v30, %v2012_v19  ;;  %v1327_v37 = vpop.f32.mrb[15].mxu0 }
 0x144   :  { %1682 = vst.msk [vmem:[%s2771_s5 + $0x20] sm:$0xf] %vm1673_vm4, %v1861_v26  ;;  %v1862_v38 = vpack.c.bf16 %v1522_v27, %v1522_v27  ;;  %v1454_v39 = vmul.f32 %v2114_v28, %v2567_v42  ;;  %v2116_v40 = vadd.f32 %v1327_v37, %v711_v25 }
 0x145   :  { %1685 = vst.msk [vmem:[%s2771_s5 + $0x2c] sm:$0xf] %vm1673_vm4, %v1864_v31  ;;  %v1495_v14 = vadd.f32 %v2572_v3, %v1456_v32  ;;  %v1457_v41 = vmul.f32 %v2115_v35, %v2567_v42 }
 0x146   :  { %1683 = vst.msk [vmem:[%s2771_s5 + $0x24] sm:$0xf] %vm1673_vm4, %v1862_v38  ;;  %v1493_v44 = vadd.f32 %v2572_v3, %v1454_v39  ;;  %v1455_v15 = vmul.f32 %v2116_v40, %v2567_v42  ;;  %v2015_v29 = vpop.f32.mrb[16].mxu1 }
 0x147   :  { %v1527_v46 = vmax.f32 %v1495_v14, 0.0  ;;  %v1496_v47 = vadd.f32 %v2572_v3, %v1457_v41  ;;  %v724_v34 = vpop.f32.mrb[17].mxu1 }
 0x148   :  { %v1525_v43 = vmax.f32 %v1493_v44, 0.0  ;;  %v1494_v48 = vadd.f32 %v2572_v3, %v1455_v15  ;;  %v2087_v50 = vpop.f32.mrb[16].mxu0  ;;  %v2016_v49 = vpop.f32.mrb[18].mxu1 }
 0x149   :  { %v1867_v55 = vpack.c.bf16 %v1527_v46, %v1527_v46  ;;  %v1528_v51 = vmax.f32 %v1496_v47, 0.0  ;;  %v2117_v52 = vadd.f32 %v2087_v50, %v2015_v29  ;;  %v1340_v5 = vpop.f32.mrb[17].mxu0  ;;  %v727_v33 = vpop.f32.mrb[19].mxu1 }
 0x14a   :  { %v1865_v53 = vpack.c.bf16 %v1525_v43, %v1525_v43  ;;  %v1526_v54 = vmax.f32 %v1494_v48, 0.0  ;;  %v2118_v36 = vadd.f32 %v1340_v5, %v724_v34  ;;  %v2088_v59 = vpop.f32.mrb[18].mxu0 }
 0x14b   :  { %1688 = vst.msk [vmem:[%s2771_s5 + $0x38] sm:$0xf] %vm1673_vm4, %v1867_v55  ;;  %v1868_v56 = vpack.c.bf16 %v1528_v51, %v1528_v51  ;;  %v1460_v57 = vmul.f32 %v2117_v52, %v2567_v42  ;;  %v2119_v61 = vadd.f32 %v2088_v59, %v2016_v49  ;;  %v1343_v18 = vpop.f32.mrb[19].mxu0 }
 0x14c   :  { %1686 = vst.msk [vmem:[%s2771_s5 + $0x30] sm:$0xf] %vm1673_vm4, %v1865_v53  ;;  %v1866_v58 = vpack.c.bf16 %v1526_v54, %v1526_v54  ;;  %v1458_v60 = vmul.f32 %v2118_v36, %v2567_v42  ;;  %v2120_v20 = vadd.f32 %v1343_v18, %v727_v33 }
 0x14d   :  { %1689 = vst.msk [vmem:[%s2771_s5 + $0x3c] sm:$0xf] %vm1673_vm4, %v1868_v56  ;;  %v1499_v62 = vadd.f32 %v2572_v3, %v1460_v57  ;;  %v1461_v63 = vmul.f32 %v2119_v61, %v2567_v42 }
 0x14e   :  { %1687 = vst.msk [vmem:[%s2771_s5 + $0x34] sm:$0xf] %vm1673_vm4, %v1866_v58  ;;  %v1497_v0 = vadd.f32 %v2572_v3, %v1458_v60  ;;  %v1459_v1 = vmul.f32 %v2120_v20, %v2567_v42  ;;  %v2019_v2 = vpop.f32.mrb[20].mxu1 }
 0x14f   :  { %v1531_v45 = vmax.f32 %v1499_v62, 0.0  ;;  %v1500_v4 = vadd.f32 %v2572_v3, %v1461_v63  ;;  %v740_v6 = vpop.f32.mrb[21].mxu1 }
 0x150   :  { %v1529_v8 = vmax.f32 %v1497_v0, 0.0  ;;  %v1498_v9 = vadd.f32 %v2572_v3, %v1459_v1  ;;  %v2091_v10 = vpop.f32.mrb[20].mxu0  ;;  %v2020_v11 = vpop.f32.mrb[22].mxu1 }
 0x151   :  { %v1871_v12 = vpack.c.bf16 %v1531_v45, %v1531_v45  ;;  %v1532_v13 = vmax.f32 %v1500_v4, 0.0  ;;  %v2121_v16 = vadd.f32 %v2091_v10, %v2019_v2  ;;  %v1356_v17 = vpop.f32.mrb[21].mxu0  ;;  %v743_v7 = vpop.f32.mrb[23].mxu1 }
 0x152   :  { %v1869_v19 = vpack.c.bf16 %v1529_v8, %v1529_v8  ;;  %v1530_v21 = vmax.f32 %v1498_v9, 0.0  ;;  %v2122_v22 = vadd.f32 %v1356_v17, %v740_v6  ;;  %v2092_v23 = vpop.f32.mrb[22].mxu0 }
 0x153   :  { %1692 = vst.msk [vmem:[%s2771_s5 + $0x48] sm:$0xf] %vm1673_vm4, %v1871_v12  ;;  %v1872_v24 = vpack.c.bf16 %v1532_v13, %v1532_v13  ;;  %v1464_v25 = vmul.f32 %v2121_v16, %v2567_v42  ;;  %v2123_v26 = vadd.f32 %v2092_v23, %v2020_v11  ;;  %v1359_v27 = vpop.f32.mrb[23].mxu0 }
 0x154   :  { %1690 = vst.msk [vmem:[%s2771_s5 + $0x40] sm:$0xf] %vm1673_vm4, %v1869_v19  ;;  %v1870_v28 = vpack.c.bf16 %v1530_v21, %v1530_v21  ;;  %v1462_v30 = vmul.f32 %v2122_v22, %v2567_v42  ;;  %v2124_v31 = vadd.f32 %v1359_v27, %v743_v7 }
 0x155   :  { %1693 = vst.msk [vmem:[%s2771_s5 + $0x4c] sm:$0xf] %vm1673_vm4, %v1872_v24  ;;  %v1503_v32 = vadd.f32 %v2572_v3, %v1464_v25  ;;  %v1465_v35 = vmul.f32 %v2123_v26, %v2567_v42 }
 0x156   :  { %1691 = vst.msk [vmem:[%s2771_s5 + $0x44] sm:$0xf] %vm1673_vm4, %v1870_v28  ;;  %v1501_v37 = vadd.f32 %v2572_v3, %v1462_v30  ;;  %v1463_v38 = vmul.f32 %v2124_v31, %v2567_v42  ;;  %v2023_v39 = vpop.f32.mrb[24].mxu1 }
 0x157   :  { %v1535_v40 = vmax.f32 %v1503_v32, 0.0  ;;  %v1504_v14 = vadd.f32 %v2572_v3, %v1465_v35  ;;  %v756_v41 = vpop.f32.mrb[25].mxu1 }
 0x158   :  { %v1533_v44 = vmax.f32 %v1501_v37, 0.0  ;;  %v1502_v15 = vadd.f32 %v2572_v3, %v1463_v38  ;;  %v2095_v29 = vpop.f32.mrb[24].mxu0  ;;  %v2024_v46 = vpop.f32.mrb[26].mxu1 }
 0x159   :  { %v1875_v47 = vpack.c.bf16 %v1535_v40, %v1535_v40  ;;  %v1536_v34 = vmax.f32 %v1504_v14, 0.0  ;;  %v2125_v43 = vadd.f32 %v2095_v29, %v2023_v39  ;;  %v1372_v48 = vpop.f32.mrb[25].mxu0  ;;  %v759_v50 = vpop.f32.mrb[27].mxu1 }
 0x15a   :  { %v1873_v49 = vpack.c.bf16 %v1533_v44, %v1533_v44  ;;  %v1534_v55 = vmax.f32 %v1502_v15, 0.0  ;;  %v2126_v51 = vadd.f32 %v1372_v48, %v756_v41  ;;  %v2096_v52 = vpop.f32.mrb[26].mxu0 }
 0x15b   :  { %1696 = vst.msk [vmem:[%s2771_s5 + $0x58] sm:$0xf] %vm1673_vm4, %v1875_v47  ;;  %v1876_v5 = vpack.c.bf16 %v1536_v34, %v1536_v34  ;;  %v1468_v33 = vmul.f32 %v2125_v43, %v2567_v42  ;;  %v2127_v53 = vadd.f32 %v2096_v52, %v2024_v46  ;;  %v1375_v54 = vpop.f32.mrb[27].mxu0 }
 0x15c   :  { %1694 = vst.msk [vmem:[%s2771_s5 + $0x50] sm:$0xf] %vm1673_vm4, %v1873_v49  ;;  %v1874_v36 = vpack.c.bf16 %v1534_v55, %v1534_v55  ;;  %v1466_v59 = vmul.f32 %v2126_v51, %v2567_v42  ;;  %v2128_v56 = vadd.f32 %v1375_v54, %v759_v50 }
 0x15d   :  { %1697 = vst.msk [vmem:[%s2771_s5 + $0x5c] sm:$0xf] %vm1673_vm4, %v1876_v5  ;;  %v1507_v57 = vadd.f32 %v2572_v3, %v1468_v33  ;;  %v1469_v61 = vmul.f32 %v2127_v53, %v2567_v42 }
 0x15e   :  { %1695 = vst.msk [vmem:[%s2771_s5 + $0x54] sm:$0xf] %vm1673_vm4, %v1874_v36  ;;  %v1505_v18 = vadd.f32 %v2572_v3, %v1466_v59  ;;  %v1467_v58 = vmul.f32 %v2128_v56, %v2567_v42  ;;  %v2027_v60 = vpop.f32.mrb[28].mxu1 }
 0x15f   :  { %v1539_v20 = vmax.f32 %v1507_v57, 0.0  ;;  %v1508_v62 = vadd.f32 %v2572_v3, %v1469_v61  ;;  %v772_v63 = vpop.f32.mrb[29].mxu1 }
 0x160   :  { %v1537_v0 = vmax.f32 %v1505_v18, 0.0  ;;  %v1506_v1 = vadd.f32 %v2572_v3, %v1467_v58  ;;  %v2099_v2 = vpop.f32.mrb[28].mxu0  ;;  %v2028_v45 = vpop.f32.mrb[30].mxu1 }
 0x161   :  { %v1879_v4 = vpack.c.bf16 %v1539_v20, %v1539_v20  ;;  %v1540_v6 = vmax.f32 %v1508_v62, 0.0  ;;  %v2129_v8 = vadd.f32 %v2099_v2, %v2027_v60  ;;  %v1388_v9 = vpop.f32.mrb[29].mxu0  ;;  %v775_v10 = vpop.f32.mrb[31].mxu1 }
 0x162   :  { %v1877_v11 = vpack.c.bf16 %v1537_v0, %v1537_v0  ;;  %v1538_v12 = vmax.f32 %v1506_v1, 0.0  ;;  %v2130_v13 = vadd.f32 %v1388_v9, %v772_v63  ;;  %v2100_v16 = vpop.f32.mrb[30].mxu0 }
 0x163   :  { %1700 = vst.msk [vmem:[%s2771_s5 + $0x68] sm:$0xf] %vm1673_vm4, %v1879_v4  ;;  %v1880_v17 = vpack.c.bf16 %v1540_v6, %v1540_v6  ;;  %v1472_v7 = vmul.f32 %v2129_v8, %v2567_v42  ;;  %v2131_v19 = vadd.f32 %v2100_v16, %v2028_v45  ;;  %v1391_v21 = vpop.f32.mrb[31].mxu0 }
 0x164   :  { %1698 = vst.msk [vmem:[%s2771_s5 + $0x60] sm:$0xf] %vm1673_vm4, %v1877_v11  ;;  %v1878_v22 = vpack.c.bf16 %v1538_v12, %v1538_v12  ;;  %v1470_v23 = vmul.f32 %v2130_v13, %v2567_v42  ;;  %v2132_v24 = vadd.f32 %v1391_v21, %v775_v10 }
 0x165   :  { %1701 = vst.msk [vmem:[%s2771_s5 + $0x6c] sm:$0xf] %vm1673_vm4, %v1880_v17  ;;  %v1511_v25 = vadd.f32 %v2572_v3, %v1472_v7  ;;  %v1473_v26 = vmul.f32 %v2131_v19, %v2567_v42 }
 0x166   :  { %1699 = vst.msk [vmem:[%s2771_s5 + $0x64] sm:$0xf] %vm1673_vm4, %v1878_v22  ;;  %v1509_v27 = vadd.f32 %v2572_v3, %v1470_v23  ;;  %v1471_v28 = vmul.f32 %v2132_v24, %v2567_v42 }
 0x167   :  { %v1543_v30 = vmax.f32 %v1511_v25, 0.0  ;;  %v1512_v31 = vadd.f32 %v2572_v3, %v1473_v26 }
 0x168   :  { %v1541_v32 = vmax.f32 %v1509_v27, 0.0  ;;  %v1510_v35 = vadd.f32 %v2572_v3, %v1471_v28 }
 0x169   :  { %v1883_v37 = vpack.c.bf16 %v1543_v30, %v1543_v30  ;;  %v1544_v38 = vmax.f32 %v1512_v31, 0.0 }
 0x16a   :  { %v1881_v39 = vpack.c.bf16 %v1541_v32, %v1541_v32  ;;  %v1542_v40 = vmax.f32 %v1510_v35, 0.0 }
 0x16b   :  { %1704 = vst.msk [vmem:[%s2771_s5 + $0x78] sm:$0xf] %vm1673_vm4, %v1883_v37  ;;  %v1884_v14 = vpack.c.bf16 %v1544_v38, %v1544_v38 }
 0x16c   :  { %1702 = vst.msk [vmem:[%s2771_s5 + $0x70] sm:$0xf] %vm1673_vm4, %v1881_v39  ;;  %v1882_v42 = vpack.c.bf16 %v1542_v40, %v1542_v40 }
 0x16d   :  { %1705 = vst.msk [vmem:[%s2771_s5 + $0x7c] sm:$0xf] %vm1673_vm4, %v1884_v14 }
 0x16e   :  { %1703 = vst.msk [vmem:[%s2771_s5 + $0x74] sm:$0xf] %vm1673_vm4, %v1882_v42 }

// kernel: _lambda_.6
= control target key start
LH: loop header
LB: loop body
LE: loop exit
PB: predicated region body
PF: predicated region fallthrough
CT: control target
= control target key end

     0   :  { %vm176_vm0 = vcmask 523264   ;;  %vm236_vm1 = vsmask.f32 7424  ;;  %vm830_vm2 = vsmask.f32 5376  ;;  %vm1200_vm3 = vcmask 1044480   ;;  %s2906_s2 = inlined_call_operand.vmem [shape: bf16[4,64,32], index: 2, kind: input, shape index: {}]   ;;  %s2907_s0 = inlined_call_operand.vmem [shape: bf16[272,64], index: 0, kind: input, shape index: {}, may-alias: {0,1}]   ;;  %s2908_s1 = inlined_call_operand.vmem [shape: bf16[272,64], index: 1, kind: input, shape index: {}, may-alias: {0,1}]   ;;  %s2909_s3 = inlined_call_operand.vmem [shape: f32[1,32], index: 3, kind: input, shape index: {}]   ;;  %s2910_s4 = inlined_call_operand.vmem [shape: f32[1,32], index: 4, kind: input, shape index: {}]   ;;  %s2911_s5 = inlined_call_operand.vmem [shape: bf16[256,32], index: 5, kind: output, shape index: {}]  }
   0x1   :  { %v2305_v0 = vld [vmem:[%s2906_s2 + $0x20] sm:$0xff]   ;;  %v2307_v2 = vld [vmem:[%s2906_s2 + $0x28] sm:$0xff]   ;;  %v2309_v4 = vld [vmem:[%s2906_s2 + $0x30] sm:$0xff]   ;;  %vm1737_vm4 = vcmask 257024  }
   0x2   :  { %v2306_v1 = vld [vmem:[%s2906_s2 + $0x40] sm:$0xff]   ;;  %2049 = vmatprep.subr.bf16.mxu1 %v2305_v0  ;;  %v2308_v3 = vld [vmem:[%s2906_s2 + $0x48] sm:$0xff]   ;;  %v2310_v5 = vld [vmem:[%s2906_s2 + $0x50] sm:$0xff]  }
   0x3   :  { %2129 = vmatprep.subr.bf16.mxu0 %v2306_v1  ;;  %2050 = vmatpush3.bf16.msra.mxu1 %v2305_v0  ;;  %v2311_v6 = vld [vmem:[%s2906_s2 + $0x38] sm:$0xff]   ;;  %v2313_v8 = vld [vmem:[%s2907_s0] sm:$0xff]   ;;  %v2314_v9 = vld [vmem:[%s2907_s0 + $0x8] sm:$0xff]  }
   0x4   :  { %2130 = vmatpush3.bf16.msra.mxu0 %v2306_v1  ;;  %2051 = vmatprep.subr.bf16.mxu1 %v2307_v2  ;;  %v2312_v7 = vld [vmem:[%s2906_s2 + $0x58] sm:$0xff]   ;;  %v2315_v10 = vld [vmem:[%s2907_s0 + $0x10] sm:$0xff]   ;;  %177 = vst.msk [vmem:[#allocation2] sm:$0xff] %vm176_vm0, %v2313_v8  ;;  %178 = vst.msk [vmem:[#allocation2 + $0x8] sm:$0xff] %vm176_vm0, %v2314_v9 }
   0x5   :  { %2131 = vmatprep.subr.bf16.mxu0 %v2308_v3  ;;  %v2406_v11 = vld [vmem:[%s2906_s2] sm:$0xff]   ;;  %179 = vst.msk [vmem:[#allocation2 + $0x10] sm:$0xff] %vm176_vm0, %v2315_v10  ;;  %v2318_v13 = vld [vmem:[%s2907_s0 + $0x18] sm:$0xff]   ;;  %v2320_v15 = vld [vmem:[%s2907_s0 + $0x28] sm:$0xff]  }
   0x6   :  { %v2412_v12 = vld [vmem:[%s2906_s2 + $0x60] sm:$0xff]   ;;  %180 = vst.msk [vmem:[#allocation2 + $0x18] sm:$0xff] %vm176_vm0, %v2318_v13  ;;  %v2321_v16 = vld [vmem:[%s2907_s0 + $0x30] sm:$0xff]   ;;  %182 = vst.msk [vmem:[#allocation2 + $0x28] sm:$0xff] %vm176_vm0, %v2320_v15 }
   0x7   :  { %2052 = vmatpush3.bf16.msra.mxu1 %v2307_v2  ;;  %v2319_v14 = vld [vmem:[%s2907_s0 + $0x20] sm:$0xff]   ;;  %183 = vst.msk [vmem:[#allocation2 + $0x30] sm:$0xff] %vm176_vm0, %v2321_v16  ;;  %v2324_v38 = vld [vmem:[%s2907_s0 + $0x38] sm:$0xff]   ;;  %v2322_v49 = vld [vmem:[%s2906_s2 + $0x8] sm:$0xff]  }
   0x8   :  { %2132 = vmatpush3.bf16.msra.mxu0 %v2308_v3  ;;  %2053 = vmatprep.subr.bf16.mxu1 %v2309_v4  ;;  %181 = vst.msk [vmem:[#allocation2 + $0x20] sm:$0xff] %vm176_vm0, %v2319_v14  ;;  %v2323_v50 = vld [vmem:[%s2906_s2 + $0x68] sm:$0xff]   ;;  %184 = vst.msk [vmem:[#allocation2 + $0x38] sm:$0xff] %vm176_vm0, %v2324_v38  ;;  %v2325_v51 = vld [vmem:[%s2907_s0 + $0x40] sm:$0xff]  }
   0x9   :  { %2133 = vmatprep.subr.bf16.mxu0 %v2310_v5  ;;  %185 = vst.msk [vmem:[#allocation2 + $0x40] sm:$0xff] %vm176_vm0, %v2325_v51  ;;  %v2326_v61 = vld [vmem:[%s2907_s0 + $0x48] sm:$0xff]   ;;  %v2327_v2 = vld [vmem:[%s2907_s0 + $0x50] sm:$0xff]   ;;  %v2335_v51 = vld [vmem:[%s2906_s2 + $0x78] sm:$0xff]  }
   0xa   :  { %186 = vst.msk [vmem:[#allocation2 + $0x48] sm:$0xff] %vm176_vm0, %v2326_v61  ;;  %187 = vst.msk [vmem:[#allocation2 + $0x50] sm:$0xff] %vm176_vm0, %v2327_v2  ;;  %v2329_v13 = vld [vmem:[%s2906_s2 + $0x70] sm:$0xff]  }
   0xb   :  { %2054 = vmatpush3.bf16.msra.mxu1 %v2309_v4  ;;  %v2431_v17 = vld [vmem:[#allocation2] sm:$0xff]  ;;  %v2433_v18 = vld [vmem:[#allocation2 + $0x8] sm:$0xff] }
   0xc   :  { %2134 = vmatpush3.bf16.msra.mxu0 %v2310_v5  ;;  %2055 = vmatprep.subr.bf16.mxu1 %v2311_v6  ;;  %v819_v19 = vld [vmem:[#allocation2] sm:$0xfc]  ;;  %v238_v20 = vshrl.u32 %v2431_v17, 16  ;;  %v240_v21 = vshll.u32 %v2431_v17, 16  ;;  %v245_v22 = vshll.u32 %v2433_v18, 16  ;;  %v249_v23 = vshrl.u32 %v2433_v18, 16 }
   0xd   :  { %2135 = vmatprep.subr.bf16.mxu0 %v2312_v7  ;;  %v2440_v24 = vld [vmem:[#allocation2 + $0x10] sm:$0xff]  ;;  %v832_v25 = vshrl.u32 %v819_v19, 16  ;;  %v835_v26 = vshll.u32 %v819_v19, 16  ;;  %v2444_v37 = vld [vmem:[#allocation2 + $0x18] sm:$0xff]  ;;  %v2453_v48 = vld [vmem:[#allocation2 + $0x28] sm:$0xff] }
   0xe   :  { %v253_v27 = vshll.u32 %v2440_v24, 16  ;;  %v257_v28 = vshrl.u32 %v2440_v24, 16  ;;  %v242_v29 = vrot.slane %v240_v21, 1  ;;  %v247_v30 = vrot.slane %v245_v22, 1  ;;  %v2468_v56 = vld [vmem:[#allocation2 + $0x30] sm:$0xff] }
   0xf   :  { %2056 = vmatpush3.bf16.msra.mxu1 %v2311_v6  ;;  %v839_v31 = vrot.slane %v249_v23, 2  ;;  %v840_v32 = vrot.slane %v245_v22, 3  ;;  %v834_v33 = vrot.slane %v832_v25, 2  ;;  %v837_v34 = vrot.slane %v835_v26, 3  ;;  %v2449_v43 = vld [vmem:[#allocation2 + $0x20] sm:$0xff]  ;;  %v2502_v21 = vld [vmem:[#allocation2 + $0x38] sm:$0xff] }
  0x10   :  { %2136 = vmatpush3.bf16.msra.mxu0 %v2312_v7  ;;  %2089 = vmatprep.subr.bf16.mxu1 %v2406_v11  ;;  %v255_v35 = vrot.slane %v253_v27, 1  ;;  %v843_v36 = vrot.slane %v257_v28, 2  ;;  %v243_v39 = vor.u32 %v242_v29, %v238_v20  ;;  %v251_v40 = vor.u32 %v249_v23, %v247_v30  ;;  %v2328_v7 = vld [vmem:[%s2906_s2 + $0x10] sm:$0xff]  }
  0x11   :  { %2169 = vmatprep.subr.bf16.mxu0 %v2412_v12  ;;  %v841_v41 = vor.u32 %v840_v32, %v839_v31  ;;  %v844_v42 = vrot.slane %v253_v27, 3  ;;  %v838_v44 = vor.u32 %v837_v34, %v834_v33  ;;  %v261_v46 = vshll.u32 %v2444_v37, 16  ;;  %v2330_v27 = vld [vmem:[%s2907_s0 + $0x58] sm:$0xff]   ;;  %v2556_v2 = vld [vmem:[#allocation2 + $0x50] sm:$0xff] }
  0x12   :  { %v259_v45 = vor.u32 %v257_v28, %v255_v35  ;;  %v265_v47 = vshrl.u32 %v2444_v37, 16  ;;  %v248_v52 = vsel %vm236_vm1, %v243_v39, %v247_v30  ;;  %v256_v53 = vsel %vm236_vm1, %v251_v40, %v255_v35  ;;  %v2331_v28 = vld [vmem:[%s2907_s0 + $0x60] sm:$0xff]   ;;  %188 = vst.msk [vmem:[#allocation2 + $0x58] sm:$0xff] %vm176_vm0, %v2330_v27  ;;  %v2524_v39 = vld [vmem:[#allocation2 + $0x48] sm:$0xff]  ;;  %v2333_v40 = vld [vmem:[%s2907_s0 + $0x70] sm:$0xff]  }
  0x13   :  { %v845_v54 = vor.u32 %v844_v42, %v843_v36  ;;  %v269_v55 = vshll.u32 %v2449_v43, 16  ;;  %2057 = vmatprep.mubr.msk.bf16.mxu1 %vm176_vm0, %v248_v52  ;;  %v842_v57 = vsel %vm830_vm2, %v838_v44, %v841_v41  ;;  %v263_v58 = vrot.slane %v261_v46, 1  ;;  %v2515_v35 = vld [vmem:[#allocation2 + $0x40] sm:$0xff]  ;;  %189 = vst.msk [vmem:[#allocation2 + $0x60] sm:$0xff] %vm176_vm0, %v2331_v28  ;;  %v2332_v36 = vld [vmem:[%s2907_s0 + $0x68] sm:$0xff]   ;;  %191 = vst.msk [vmem:[#allocation2 + $0x70] sm:$0xff] %vm176_vm0, %v2333_v40 }
  0x14   :  { %v847_v59 = vrot.slane %v265_v47, 2  ;;  %v848_v60 = vrot.slane %v261_v46, 3  ;;  %2137 = vmatprep.mubr.msk.bf16.mxu0 %vm176_vm0, %v842_v57  ;;  %2058 = vmatmul.mubr.msk.bf16.vlgmr.msra.gmra.mrb[0].mxu1 %vm176_vm0, %v256_v53  ;;  %v273_v0 = vshrl.u32 %v2449_v43, 16  ;;  %v277_v6 = vshll.u32 %v2453_v48, 16  ;;  %190 = vst.msk [vmem:[#allocation2 + $0x68] sm:$0xff] %vm176_vm0, %v2332_v36  ;;  %v2337_v57 = vld [vmem:[%s2908_s1 + $0x80] sm:$0xff]  }
  0x15   :  { %v846_v62 = vsel %vm830_vm2, %v841_v41, %v845_v54  ;;  %v271_v63 = vrot.slane %v269_v55, 1  ;;  %v852_v1 = vrot.slane %v269_v55, 3  ;;  %2090 = vmatpush3.bf16.msra.mxu1 %v2406_v11  ;;  %v264_v3 = vsel %vm236_vm1, %v259_v45, %v263_v58  ;;  %v2334_v45 = vld [vmem:[%s2906_s2 + $0x18] sm:$0xff]   ;;  %201 = vst.msk [vmem:[#allocation2 + $0x80] sm:$0xff] %vm176_vm0, %v2337_v57 }
  0x16   :  { %2138 = vmatmul.mubr.msk.bf16.vlgmr.msra.gmra.mrb[0].mxu0 %vm176_vm0, %v846_v62  ;;  %v849_v4 = vor.u32 %v848_v60, %v847_v59  ;;  %v267_v5 = vor.u32 %v265_v47, %v263_v58  ;;  %2061 = vmatprep.mubr.msk.bf16.mxu1 %vm176_vm0, %v264_v3  ;;  %v851_v8 = vrot.slane %v273_v0, 2  ;;  %v281_v10 = vshrl.u32 %v2453_v48, 16  ;;  %v2336_v55 = vld [vmem:[%s2907_s0 + $0x78] sm:$0xff]  }
  0x17   :  { %2170 = vmatpush3.bf16.msra.mxu0 %v2412_v12  ;;  %v275_v9 = vor.u32 %v273_v0, %v271_v63  ;;  %v285_v11 = vshll.u32 %v2468_v56, 16  ;;  %v279_v15 = vrot.slane %v277_v6, 1  ;;  %v856_v16 = vrot.slane %v277_v6, 3  ;;  %2091 = vmatprep.subr.bf16.mxu1 %v2322_v49  ;;  %192 = vst.msk [vmem:[#allocation2 + $0x78] sm:$0xff] %vm176_vm0, %v2336_v55 }
  0x18   :  { %v850_v14 = vsel %vm830_vm2, %v845_v54, %v849_v4  ;;  %2171 = vmatprep.subr.bf16.mxu0 %v2323_v50  ;;  %v853_v12 = vor.u32 %v852_v1, %v851_v8  ;;  %v855_v19 = vrot.slane %v281_v10, 2  ;;  %v289_v20 = vshrl.u32 %v2468_v56, 16 }
  0x19   :  { %2141 = vmatprep.mubr.msk.bf16.mxu0 %vm176_vm0, %v850_v14  ;;  %v272_v22 = vsel %vm236_vm1, %v267_v5, %v271_v63  ;;  %v280_v23 = vsel %vm236_vm1, %v275_v9, %v279_v15  ;;  %v287_v25 = vrot.slane %v285_v11, 1  ;;  %2092 = vmatpush3.bf16.msra.mxu1 %v2322_v49  ;;  %v293_v26 = vshll.u32 %v2502_v21, 16 }
  0x1a   :  { %v854_v29 = vsel %vm830_vm2, %v849_v4, %v853_v12  ;;  %v857_v30 = vor.u32 %v856_v16, %v855_v19  ;;  %v859_v31 = vrot.slane %v289_v20, 2  ;;  %v860_v32 = vrot.slane %v285_v11, 3  ;;  %2093 = vmatprep.subr.bf16.mxu1 %v2328_v7  ;;  %v2559_v4 = vld [vmem:[#allocation2 + $0x58] sm:$0xff] }
  0x1b   :  { %2172 = vmatpush3.bf16.msra.mxu0 %v2323_v50  ;;  %v297_v33 = vshrl.u32 %v2502_v21, 16  ;;  %v864_v34 = vrot.slane %v293_v26, 3  ;;  %v283_v41 = vor.u32 %v281_v10, %v279_v15  ;;  %v291_v42 = vor.u32 %v289_v20, %v287_v25  ;;  %v2575_v28 = vld [vmem:[#allocation2 + $0x68] sm:$0xff] }
  0x1c   :  { %2173 = vmatprep.subr.bf16.mxu0 %v2329_v13  ;;  %2062 = vmatmul.mubr.msk.bf16.gmra.mrb[4].mxu1 %vm176_vm0, %v272_v22  ;;  %v858_v38 = vsel %vm830_vm2, %v853_v12, %v857_v30  ;;  %v861_v46 = vor.u32 %v860_v32, %v859_v31  ;;  %v295_v47 = vrot.slane %v293_v26, 1  ;;  %v301_v49 = vshll.u32 %v2515_v35, 16  ;;  %v2571_v22 = vld [vmem:[#allocation2 + $0x60] sm:$0xff] }
  0x1d   :  { %2065 = vmatprep.mubr.msk.bf16.mxu1 %vm176_vm0, %v280_v23  ;;  %v863_v44 = vrot.slane %v297_v33, 2  ;;  %v305_v50 = vshrl.u32 %v2515_v35, 16  ;;  %2094 = vmatpush3.bf16.msra.mxu1 %v2328_v7  ;;  %v309_v53 = vshll.u32 %v2524_v39, 16  ;;  %v313_v54 = vshrl.u32 %v2524_v39, 16 }
  0x1e   :  { %2142 = vmatmul.mubr.msk.bf16.gmra.mrb[4].mxu0 %vm176_vm0, %v854_v29  ;;  %2095 = vmatprep.subr.bf16.mxu1 %v2334_v45  ;;  %v288_v58 = vsel %vm236_vm1, %v283_v41, %v287_v25  ;;  %v862_v59 = vsel %vm830_vm2, %v857_v30, %v861_v46  ;;  %v296_v60 = vsel %vm236_vm1, %v291_v42, %v295_v47  ;;  %v868_v62 = vrot.slane %v301_v49, 3 }
  0x1f   :  { %2145 = vmatprep.mubr.msk.bf16.mxu0 %vm176_vm0, %v858_v38  ;;  %v865_v52 = vor.u32 %v864_v34, %v863_v44  ;;  %2174 = vmatpush3.bf16.msra.mxu0 %v2329_v13  ;;  %v867_v61 = vrot.slane %v305_v50, 2  ;;  %v871_v0 = vrot.slane %v313_v54, 2  ;;  %v872_v1 = vrot.slane %v309_v53, 3 }
  0x20   :  { %2175 = vmatprep.subr.bf16.mxu0 %v2335_v51  ;;  %v303_v3 = vrot.slane %v301_v49, 1  ;;  %v299_v5 = vor.u32 %v297_v33, %v295_v47  ;;  %v311_v6 = vrot.slane %v309_v53, 1  ;;  %v317_v9 = vshll.u32 %v2556_v2, 16  ;;  %v2591_v53 = vld [vmem:[#allocation2 + $0x78] sm:$0xff] }
  0x21   :  { %2096 = vmatpush3.bf16.msra.mxu1 %v2334_v45  ;;  %v866_v63 = vsel %vm830_vm2, %v861_v46, %v865_v52  ;;  %v869_v7 = vor.u32 %v868_v62, %v867_v61  ;;  %v321_v10 = vshrl.u32 %v2556_v2, 16  ;;  %v873_v11 = vor.u32 %v872_v1, %v871_v0 }
  0x22   :  { %v307_v8 = vor.u32 %v305_v50, %v303_v3  ;;  %v325_v13 = vshll.u32 %v2559_v4, 16  ;;  %v329_v14 = vshrl.u32 %v2559_v4, 16  ;;  %v304_v15 = vsel %vm236_vm1, %v299_v5, %v303_v3 }
  0x23   :  { %2176 = vmatpush3.bf16.msra.mxu0 %v2335_v51  ;;  %v870_v16 = vsel %vm830_vm2, %v865_v52, %v869_v7  ;;  %v875_v19 = vrot.slane %v321_v10, 2  ;;  %v876_v20 = vrot.slane %v317_v9, 3  ;;  %v874_v23 = vsel %vm830_vm2, %v869_v7, %v873_v11  ;;  %v2588_v51 = vld [vmem:[#allocation2 + $0x70] sm:$0xff] }
  0x24   :  { %2066 = vmatmul.mubr.msk.bf16.gmra.mrb[8].mxu1 %vm176_vm0, %v288_v58  ;;  %v312_v12 = vsel %vm236_vm1, %v307_v8, %v311_v6  ;;  %v879_v25 = vrot.slane %v329_v14, 2  ;;  %v880_v26 = vrot.slane %v325_v13, 3  ;;  %v319_v27 = vrot.slane %v317_v9, 1 }
  0x25   :  { %2069 = vmatprep.mubr.msk.bf16.mxu1 %vm176_vm0, %v296_v60  ;;  %v315_v29 = vor.u32 %v313_v54, %v311_v6  ;;  %v333_v30 = vshll.u32 %v2571_v22, 16  ;;  %v337_v31 = vshrl.u32 %v2571_v22, 16  ;;  %v877_v32 = vor.u32 %v876_v20, %v875_v19 }
  0x26   :  { %2146 = vmatmul.mubr.msk.bf16.gmra.mrb[8].mxu0 %vm176_vm0, %v862_v59  ;;  %v323_v33 = vor.u32 %v321_v10, %v319_v27  ;;  %v327_v34 = vrot.slane %v325_v13, 1  ;;  %v881_v36 = vor.u32 %v880_v26, %v879_v25  ;;  %v341_v38 = vshll.u32 %v2575_v28, 16 }
  0x27   :  { %2149 = vmatprep.mubr.msk.bf16.mxu0 %vm176_vm0, %v866_v63  ;;  %v345_v40 = vshrl.u32 %v2575_v28, 16  ;;  %v320_v41 = vsel %vm236_vm1, %v315_v29, %v319_v27  ;;  %v883_v42 = vrot.slane %v337_v31, 2  ;;  %v884_v44 = vrot.slane %v333_v30, 3 }
  0x28   :  { %v878_v45 = vsel %vm830_vm2, %v873_v11, %v877_v32  ;;  %v328_v46 = vsel %vm236_vm1, %v323_v33, %v327_v34  ;;  %v882_v47 = vsel %vm830_vm2, %v877_v32, %v881_v36  ;;  %v888_v50 = vrot.slane %v341_v38, 3  ;;  %v2604_v11 = vld [vmem:[#allocation2 + $0x80] sm:$0x7]  ;;  %v1173_v33 = vld [vmem:[#allocation2] sm:$0xf8] }
  0x29   :  { %v887_v49 = vrot.slane %v345_v40, 2  ;;  %v335_v52 = vrot.slane %v333_v30, 1  ;;  %v331_v54 = vor.u32 %v329_v14, %v327_v34  ;;  %v885_v55 = vor.u32 %v884_v44, %v883_v42 }
  0x2a   :  { %v343_v58 = vrot.slane %v341_v38, 1  ;;  %v349_v59 = vshll.u32 %v2588_v51, 16  ;;  %v353_v60 = vshrl.u32 %v2588_v51, 16  ;;  %v357_v62 = vshll.u32 %v2591_v53, 16 }
  0x2b   :  { %v339_v57 = vor.u32 %v337_v31, %v335_v52  ;;  %v889_v61 = vor.u32 %v888_v50, %v887_v49  ;;  %v361_v63 = vshrl.u32 %v2591_v53, 16  ;;  %v336_v0 = vsel %vm236_vm1, %v331_v54, %v335_v52 }
  0x2c   :  { %2070 = vmatmul.mubr.msk.bf16.gmra.mrb[12].mxu1 %vm176_vm0, %v304_v15  ;;  %v886_v1 = vsel %vm830_vm2, %v881_v36, %v885_v55  ;;  %v891_v5 = vrot.slane %v353_v60, 2  ;;  %v892_v6 = vrot.slane %v349_v59, 3  ;;  %v351_v8 = vrot.slane %v349_v59, 1 }
  0x2d   :  { %2073 = vmatprep.mubr.msk.bf16.mxu1 %vm176_vm0, %v312_v12  ;;  %v344_v3 = vsel %vm236_vm1, %v339_v57, %v343_v58  ;;  %v890_v7 = vsel %vm830_vm2, %v885_v55, %v889_v61  ;;  %v895_v9 = vrot.slane %v361_v63, 2  ;;  %v896_v10 = vrot.slane %v357_v62, 3  ;;  %v226_v12 = vld [vmem:[#allocation2 + $0x80] sm:$0x1] }
  0x2e   :  { %2150 = vmatmul.mubr.msk.bf16.gmra.mrb[12].mxu0 %vm176_vm0, %v870_v16  ;;  %v347_v13 = vor.u32 %v345_v40, %v343_v58  ;;  %v355_v14 = vor.u32 %v353_v60, %v351_v8  ;;  %v893_v15 = vor.u32 %v892_v6, %v891_v5  ;;  %v359_v16 = vrot.slane %v357_v62, 1 }
  0x2f   :  { %2153 = vmatprep.mubr.msk.bf16.mxu0 %vm176_vm0, %v874_v23  ;;  %v900_v19 = vshrl.u32 %v2604_v11, 16  ;;  %v903_v20 = vshll.u32 %v2604_v11, 16  ;;  %v897_v23 = vor.u32 %v896_v10, %v895_v9  ;;  %v365_v26 = vshll.u32 %v226_v12, 16  ;;  %v2712_v10 = vld [vmem:[%s2910_s4] ss:$0 sm:$0xff] }
  0x30   :  { %v352_v25 = vsel %vm236_vm1, %v347_v13, %v351_v8  ;;  %v894_v27 = vsel %vm830_vm2, %v889_v61, %v893_v15  ;;  %v360_v29 = vsel %vm236_vm1, %v355_v14, %v359_v16  ;;  %v363_v34 = vor.u32 %v361_v63, %v359_v16 }
  0x31   :  { %v902_v30 = vrot.slane %v900_v19, 2  ;;  %v905_v31 = vrot.slane %v903_v20, 3  ;;  %v898_v32 = vsel %vm830_vm2, %v893_v15, %v897_v23  ;;  %v367_v36 = vrot.slane %v365_v26, 1 }
  0x32   :  { %v1201_v40 = vrot.slane %v1173_v33, 3  ;;  %v1210_v52 = vrot.slane %v2453_v48, 3 }
  0x33   :  { %v906_v38 = vor.u32 %v905_v31, %v902_v30  ;;  %v368_v42 = vsel %vm236_vm1, %v363_v34, %v367_v36 }
  0x34   :  { %2074 = vmatmul.mubr.msk.bf16.gmra.mrb[16].mxu1 %vm176_vm0, %v320_v41  ;;  %v1202_v41 = vrot.slane %v2433_v18, 3 }
  0x35   :  { %2077 = vmatprep.mubr.msk.bf16.mxu1 %vm176_vm0, %v328_v46  ;;  %v907_v44 = vsel %vm830_vm2, %v897_v23, %v906_v38  ;;  %v1204_v46 = vrot.slane %v2440_v24, 3 }
  0x36   :  { %2154 = vmatmul.mubr.msk.bf16.gmra.mrb[16].mxu0 %vm176_vm0, %v878_v45  ;;  %v1203_v45 = vsel %vm1200_vm3, %v1201_v40, %v1202_v41 }
  0x37   :  { %2157 = vmatprep.mubr.msk.bf16.mxu0 %vm176_vm0, %v882_v47  ;;  %v1206_v47 = vrot.slane %v2444_v37, 3  ;;  %v1205_v49 = vsel %vm1200_vm3, %v1202_v41, %v1204_v46 }
  0x39   :  { %v1207_v50 = vsel %vm1200_vm3, %v1204_v46, %v1206_v47 }
  0x3c   :  { %2078 = vmatmul.mubr.msk.bf16.gmra.mrb[20].mxu1 %vm176_vm0, %v336_v0 }
  0x3d   :  { %2081 = vmatprep.mubr.msk.bf16.mxu1 %vm176_vm0, %v344_v3 }
  0x3e   :  { %2158 = vmatmul.mubr.msk.bf16.gmra.mrb[20].mxu0 %vm176_vm0, %v886_v1 }
  0x3f   :  { %2161 = vmatprep.mubr.msk.bf16.mxu0 %vm176_vm0, %v890_v7 }
  0x44   :  { %2082 = vmatmul.mubr.msk.bf16.gmra.mrb[24].mxu1 %vm176_vm0, %v352_v25 }
  0x45   :  { %2085 = vmatprep.mubr.msk.bf16.mxu1 %vm176_vm0, %v360_v29 }
  0x46   :  { %2162 = vmatmul.mubr.msk.bf16.gmra.mrb[24].mxu0 %vm176_vm0, %v894_v27 }
  0x47   :  { %2165 = vmatprep.mubr.msk.bf16.mxu0 %vm176_vm0, %v898_v32 }
  0x4c   :  { %2086 = vmatmul.mubr.msk.bf16.gmra.mrb[28].mxu1 %vm176_vm0, %v368_v42 }
  0x4d   :  { %2097 = vmatprep.mubr.msk.bf16.mxu1 %vm176_vm0, %v2431_v17  ;;  %v1208_v17 = vrot.slane %v2449_v43, 3 }
  0x4e   :  { %2166 = vmatmul.mubr.msk.bf16.gmra.mrb[28].mxu0 %vm176_vm0, %v907_v44 }
  0x4f   :  { %2177 = vmatprep.mubr.msk.bf16.mxu0 %vm176_vm0, %v1203_v45  ;;  %v1209_v54 = vsel %vm1200_vm3, %v1206_v47, %v1208_v17  ;;  %v1211_v55 = vsel %vm1200_vm3, %v1208_v17, %v1210_v52 }
  0x54   :  { %2098 = vmatmul.mubr.msk.bf16.vlgmr.msra.gmra.mrb[0].mxu1 %vm176_vm0, %v2433_v18  ;;  %v1212_v18 = vrot.slane %v2468_v56, 3 }
  0x55   :  { %2101 = vmatprep.mubr.msk.bf16.mxu1 %vm176_vm0, %v2440_v24  ;;  %v1214_v24 = vrot.slane %v2502_v21, 3 }
  0x56   :  { %2178 = vmatmul.mubr.msk.bf16.vlgmr.msra.gmra.mrb[0].mxu0 %vm176_vm0, %v1205_v49  ;;  %v1213_v57 = vsel %vm1200_vm3, %v1210_v52, %v1212_v18 }
  0x57   :  { %2181 = vmatprep.mubr.msk.bf16.mxu0 %vm176_vm0, %v1207_v50  ;;  %v1215_v58 = vsel %vm1200_vm3, %v1212_v18, %v1214_v24 }
  0x5c   :  { %2102 = vmatmul.mubr.msk.bf16.gmra.mrb[4].mxu1 %vm176_vm0, %v2444_v37  ;;  %v1216_v37 = vrot.slane %v2515_v35, 3 }
  0x5d   :  { %2105 = vmatprep.mubr.msk.bf16.mxu1 %vm176_vm0, %v2449_v43  ;;  %v1218_v43 = vrot.slane %v2524_v39, 3 }
  0x5e   :  { %2182 = vmatmul.mubr.msk.bf16.gmra.mrb[4].mxu0 %vm176_vm0, %v1209_v54  ;;  %v1217_v59 = vsel %vm1200_vm3, %v1214_v24, %v1216_v37 }
  0x5f   :  { %2185 = vmatprep.mubr.msk.bf16.mxu0 %vm176_vm0, %v1211_v55  ;;  %v1219_v60 = vsel %vm1200_vm3, %v1216_v37, %v1218_v43 }
  0x64   :  { %2106 = vmatmul.mubr.msk.bf16.gmra.mrb[8].mxu1 %vm176_vm0, %v2453_v48  ;;  %v1220_v48 = vrot.slane %v2556_v2, 3 }
  0x65   :  { %2109 = vmatprep.mubr.msk.bf16.mxu1 %vm176_vm0, %v2468_v56  ;;  %v1222_v56 = vrot.slane %v2559_v4, 3 }
  0x66   :  { %2186 = vmatmul.mubr.msk.bf16.gmra.mrb[8].mxu0 %vm176_vm0, %v1213_v57  ;;  %v1221_v61 = vsel %vm1200_vm3, %v1218_v43, %v1220_v48 }
  0x67   :  { %2189 = vmatprep.mubr.msk.bf16.mxu0 %vm176_vm0, %v1215_v58  ;;  %v1223_v62 = vsel %vm1200_vm3, %v1220_v48, %v1222_v56 }
  0x6c   :  { %2110 = vmatmul.mubr.msk.bf16.gmra.mrb[12].mxu1 %vm176_vm0, %v2502_v21  ;;  %v1224_v21 = vrot.slane %v2571_v22, 3 }
  0x6d   :  { %2113 = vmatprep.mubr.msk.bf16.mxu1 %vm176_vm0, %v2515_v35  ;;  %v1226_v35 = vrot.slane %v2575_v28, 3 }
  0x6e   :  { %2190 = vmatmul.mubr.msk.bf16.gmra.mrb[12].mxu0 %vm176_vm0, %v1217_v59  ;;  %v1225_v63 = vsel %vm1200_vm3, %v1222_v56, %v1224_v21 }
  0x6f   :  { %2193 = vmatprep.mubr.msk.bf16.mxu0 %vm176_vm0, %v1219_v60  ;;  %v1227_v0 = vsel %vm1200_vm3, %v1224_v21, %v1226_v35 }
  0x74   :  { %2114 = vmatmul.mubr.msk.bf16.gmra.mrb[16].mxu1 %vm176_vm0, %v2524_v39  ;;  %v1228_v39 = vrot.slane %v2588_v51, 3 }
  0x75   :  { %2117 = vmatprep.mubr.msk.bf16.mxu1 %vm176_vm0, %v2556_v2  ;;  %v1230_v2 = vrot.slane %v2591_v53, 3 }
  0x76   :  { %2194 = vmatmul.mubr.msk.bf16.gmra.mrb[16].mxu0 %vm176_vm0, %v1221_v61  ;;  %v1229_v1 = vsel %vm1200_vm3, %v1226_v35, %v1228_v39 }
  0x77   :  { %2197 = vmatprep.mubr.msk.bf16.mxu0 %vm176_vm0, %v1223_v62  ;;  %v1231_v3 = vsel %vm1200_vm3, %v1228_v39, %v1230_v2 }
  0x7c   :  { %2118 = vmatmul.mubr.msk.bf16.gmra.mrb[20].mxu1 %vm176_vm0, %v2559_v4  ;;  %v1232_v4 = vrot.slane %v2604_v11, 3 }
  0x7d   :  { %2121 = vmatprep.mubr.msk.bf16.mxu1 %vm176_vm0, %v2571_v22 }
  0x7e   :  { %2198 = vmatmul.mubr.msk.bf16.gmra.mrb[20].mxu0 %vm176_vm0, %v1225_v63  ;;  %v1233_v22 = vsel %vm1200_vm3, %v1230_v2, %v1232_v4 }
  0x7f   :  { %2201 = vmatprep.mubr.msk.bf16.mxu0 %vm176_vm0, %v1227_v0 }
  0x84   :  { %2122 = vmatmul.mubr.msk.bf16.gmra.mrb[24].mxu1 %vm176_vm0, %v2575_v28  ;;  %v2707_v28 = vld [vmem:[%s2909_s3] ss:$0 sm:$0xff] }
  0x85   :  { %2125 = vmatprep.mubr.msk.bf16.mxu1 %vm176_vm0, %v2588_v51 }
  0x86   :  { %2202 = vmatmul.mubr.msk.bf16.gmra.mrb[24].mxu0 %vm176_vm0, %v1229_v1 }
  0x87   :  { %2205 = vmatprep.mubr.msk.bf16.mxu0 %vm176_vm0, %v1231_v3 }
  0x8c   :  { %2126 = vmatmul.mubr.msk.bf16.gmra.mrb[28].mxu1 %vm176_vm0, %v2591_v53 }
  0x8e   :  { %2206 = vmatmul.mubr.msk.bf16.gmra.mrb[28].mxu0 %vm176_vm0, %v1233_v22 }
 0x127   :  { %v2099_v5 = vpop.f32.mrb[0].mxu1 }
 0x128   :  { %v692_v7 = vpop.f32.mrb[1].mxu1 }
 0x129   :  { %v2179_v6 = vpop.f32.mrb[0].mxu0  ;;  %v2100_v9 = vpop.f32.mrb[2].mxu1 }
 0x12a   :  { %v2209_v51 = vadd.f32 %v2179_v6, %v2099_v5  ;;  %v1340_v8 = vpop.f32.mrb[1].mxu0  ;;  %v695_v13 = vpop.f32.mrb[3].mxu1 }
 0x12b   :  { %v2210_v11 = vadd.f32 %v1340_v8, %v692_v7  ;;  %v2180_v53 = vpop.f32.mrb[2].mxu0 }
 0x12c   :  { %v1508_v14 = vmul.f32 %v2209_v51, %v2707_v28  ;;  %v2211_v15 = vadd.f32 %v2180_v53, %v2100_v9  ;;  %v1343_v16 = vpop.f32.mrb[3].mxu0 }
 0x12d   :  { %v1506_v12 = vmul.f32 %v2210_v11, %v2707_v28  ;;  %v2212_v19 = vadd.f32 %v1343_v16, %v695_v13 }
 0x12e   :  { %v1547_v20 = vadd.f32 %v2712_v10, %v1508_v14  ;;  %v1509_v23 = vmul.f32 %v2211_v15, %v2707_v28 }
 0x12f   :  { %v1545_v25 = vadd.f32 %v2712_v10, %v1506_v12  ;;  %v1507_v26 = vmul.f32 %v2212_v19, %v2707_v28  ;;  %v2103_v30 = vpop.f32.mrb[4].mxu1 }
 0x130   :  { %v1579_v27 = vmax.f32 %v1547_v20, 0.0  ;;  %v1548_v29 = vadd.f32 %v2712_v10, %v1509_v23  ;;  %v708_v34 = vpop.f32.mrb[5].mxu1 }
 0x131   :  { %v1577_v31 = vmax.f32 %v1545_v25, 0.0  ;;  %v1546_v32 = vadd.f32 %v2712_v10, %v1507_v26  ;;  %v2183_v33 = vpop.f32.mrb[4].mxu0  ;;  %v2104_v42 = vpop.f32.mrb[6].mxu1 }
 0x132   :  { %v1939_v36 = vpack.c.bf16 %v1579_v27, %v1579_v27  ;;  %v1580_v38 = vmax.f32 %v1548_v29, 0.0  ;;  %v2213_v40 = vadd.f32 %v2183_v33, %v2103_v30  ;;  %v1356_v41 = vpop.f32.mrb[5].mxu0  ;;  %v711_v49 = vpop.f32.mrb[7].mxu1 }
 0x133   :  { %v1937_v44 = vpack.c.bf16 %v1577_v31, %v1577_v31  ;;  %v1578_v45 = vmax.f32 %v1546_v32, 0.0  ;;  %v2214_v46 = vadd.f32 %v1356_v41, %v708_v34  ;;  %v2184_v47 = vpop.f32.mrb[6].mxu0 }
 0x134   :  { %1740 = vst.msk [vmem:[%s2911_s5 + $0x8] sm:$0xf] %vm1737_vm4, %v1939_v36  ;;  %v1940_v50 = vpack.c.bf16 %v1580_v38, %v1580_v38  ;;  %v1512_v17 = vmul.f32 %v2213_v40, %v2707_v28  ;;  %v2215_v52 = vadd.f32 %v2184_v47, %v2104_v42  ;;  %v1359_v54 = vpop.f32.mrb[7].mxu0 }
 0x135   :  { %1738 = vst.msk [vmem:[%s2911_s5] sm:$0xf] %vm1737_vm4, %v1937_v44  ;;  %v1938_v55 = vpack.c.bf16 %v1578_v45, %v1578_v45  ;;  %v1510_v18 = vmul.f32 %v2214_v46, %v2707_v28  ;;  %v2216_v24 = vadd.f32 %v1359_v54, %v711_v49 }
 0x136   :  { %1741 = vst.msk [vmem:[%s2911_s5 + $0xc] sm:$0xf] %vm1737_vm4, %v1940_v50  ;;  %v1551_v57 = vadd.f32 %v2712_v10, %v1512_v17  ;;  %v1513_v58 = vmul.f32 %v2215_v52, %v2707_v28 }
 0x137   :  { %1739 = vst.msk [vmem:[%s2911_s5 + $0x4] sm:$0xf] %vm1737_vm4, %v1938_v55  ;;  %v1549_v37 = vadd.f32 %v2712_v10, %v1510_v18  ;;  %v1511_v43 = vmul.f32 %v2216_v24, %v2707_v28  ;;  %v2107_v48 = vpop.f32.mrb[8].mxu1 }
 0x138   :  { %v1583_v59 = vmax.f32 %v1551_v57, 0.0  ;;  %v1552_v60 = vadd.f32 %v2712_v10, %v1513_v58  ;;  %v724_v21 = vpop.f32.mrb[9].mxu1 }
 0x139   :  { %v1581_v56 = vmax.f32 %v1549_v37, 0.0  ;;  %v1550_v61 = vadd.f32 %v2712_v10, %v1511_v43  ;;  %v2187_v62 = vpop.f32.mrb[8].mxu0  ;;  %v2108_v2 = vpop.f32.mrb[10].mxu1 }
 0x13a   :  { %v1943_v35 = vpack.c.bf16 %v1583_v59, %v1583_v59  ;;  %v1584_v63 = vmax.f32 %v1552_v60, 0.0  ;;  %v2217_v0 = vadd.f32 %v2187_v62, %v2107_v48  ;;  %v1372_v39 = vpop.f32.mrb[9].mxu0  ;;  %v727_v5 = vpop.f32.mrb[11].mxu1 }
 0x13b   :  { %v1941_v1 = vpack.c.bf16 %v1581_v56, %v1581_v56  ;;  %v1582_v3 = vmax.f32 %v1550_v61, 0.0  ;;  %v2218_v4 = vadd.f32 %v1372_v39, %v724_v21  ;;  %v2188_v22 = vpop.f32.mrb[10].mxu0 }
 0x13c   :  { %1744 = vst.msk [vmem:[%s2911_s5 + $0x18] sm:$0xf] %vm1737_vm4, %v1943_v35  ;;  %v1944_v6 = vpack.c.bf16 %v1584_v63, %v1584_v63  ;;  %v1516_v7 = vmul.f32 %v2217_v0, %v2707_v28  ;;  %v2219_v51 = vadd.f32 %v2188_v22, %v2108_v2  ;;  %v1375_v8 = vpop.f32.mrb[11].mxu0 }
 0x13d   :  { %1742 = vst.msk [vmem:[%s2911_s5 + $0x10] sm:$0xf] %vm1737_vm4, %v1941_v1  ;;  %v1942_v9 = vpack.c.bf16 %v1582_v3, %v1582_v3  ;;  %v1514_v11 = vmul.f32 %v2218_v4, %v2707_v28  ;;  %v2220_v53 = vadd.f32 %v1375_v8, %v727_v5 }
 0x13e   :  { %1745 = vst.msk [vmem:[%s2911_s5 + $0x1c] sm:$0xf] %vm1737_vm4, %v1944_v6  ;;  %v1555_v13 = vadd.f32 %v2712_v10, %v1516_v7  ;;  %v1517_v14 = vmul.f32 %v2219_v51, %v2707_v28 }
 0x13f   :  { %1743 = vst.msk [vmem:[%s2911_s5 + $0x14] sm:$0xf] %vm1737_vm4, %v1942_v9  ;;  %v1553_v15 = vadd.f32 %v2712_v10, %v1514_v11  ;;  %v1515_v16 = vmul.f32 %v2220_v53, %v2707_v28  ;;  %v2111_v20 = vpop.f32.mrb[12].mxu1 }
 0x140   :  { %v1587_v12 = vmax.f32 %v1555_v13, 0.0  ;;  %v1556_v19 = vadd.f32 %v2712_v10, %v1517_v14  ;;  %v740_v27 = vpop.f32.mrb[13].mxu1 }
 0x141   :  { %v1585_v23 = vmax.f32 %v1553_v15, 0.0  ;;  %v1554_v25 = vadd.f32 %v2712_v10, %v1515_v16  ;;  %v2191_v26 = vpop.f32.mrb[12].mxu0  ;;  %v2112_v33 = vpop.f32.mrb[14].mxu1 }
 0x142   :  { %v1947_v29 = vpack.c.bf16 %v1587_v12, %v1587_v12  ;;  %v1588_v30 = vmax.f32 %v1556_v19, 0.0  ;;  %v2221_v31 = vadd.f32 %v2191_v26, %v2111_v20  ;;  %v1388_v32 = vpop.f32.mrb[13].mxu0  ;;  %v743_v41 = vpop.f32.mrb[15].mxu1 }
 0x143   :  { %v1945_v34 = vpack.c.bf16 %v1585_v23, %v1585_v23  ;;  %v1586_v36 = vmax.f32 %v1554_v25, 0.0  ;;  %v2222_v38 = vadd.f32 %v1388_v32, %v740_v27  ;;  %v2192_v40 = vpop.f32.mrb[14].mxu0 }
 0x144   :  { %1748 = vst.msk [vmem:[%s2911_s5 + $0x28] sm:$0xf] %vm1737_vm4, %v1947_v29  ;;  %v1948_v42 = vpack.c.bf16 %v1588_v30, %v1588_v30  ;;  %v1520_v44 = vmul.f32 %v2221_v31, %v2707_v28  ;;  %v2223_v45 = vadd.f32 %v2192_v40, %v2112_v33  ;;  %v1391_v46 = vpop.f32.mrb[15].mxu0 }
 0x145   :  { %1746 = vst.msk [vmem:[%s2911_s5 + $0x20] sm:$0xf] %vm1737_vm4, %v1945_v34  ;;  %v1946_v47 = vpack.c.bf16 %v1586_v36, %v1586_v36  ;;  %v1518_v49 = vmul.f32 %v2222_v38, %v2707_v28  ;;  %v2224_v50 = vadd.f32 %v1391_v46, %v743_v41 }
 0x146   :  { %1749 = vst.msk [vmem:[%s2911_s5 + $0x2c] sm:$0xf] %vm1737_vm4, %v1948_v42  ;;  %v1559_v17 = vadd.f32 %v2712_v10, %v1520_v44  ;;  %v1521_v52 = vmul.f32 %v2223_v45, %v2707_v28 }
 0x147   :  { %1747 = vst.msk [vmem:[%s2911_s5 + $0x24] sm:$0xf] %vm1737_vm4, %v1946_v47  ;;  %v1557_v54 = vadd.f32 %v2712_v10, %v1518_v49  ;;  %v1519_v55 = vmul.f32 %v2224_v50, %v2707_v28  ;;  %v2115_v57 = vpop.f32.mrb[16].mxu1 }
 0x148   :  { %v1591_v18 = vmax.f32 %v1559_v17, 0.0  ;;  %v1560_v24 = vadd.f32 %v2712_v10, %v1521_v52  ;;  %v756_v59 = vpop.f32.mrb[17].mxu1 }
 0x149   :  { %v1589_v58 = vmax.f32 %v1557_v54, 0.0  ;;  %v1558_v37 = vadd.f32 %v2712_v10, %v1519_v55  ;;  %v2195_v43 = vpop.f32.mrb[16].mxu0  ;;  %v2116_v62 = vpop.f32.mrb[18].mxu1 }
 0x14a   :  { %v1951_v60 = vpack.c.bf16 %v1591_v18, %v1591_v18  ;;  %v1592_v48 = vmax.f32 %v1560_v24, 0.0  ;;  %v2225_v56 = vadd.f32 %v2195_v43, %v2115_v57  ;;  %v1404_v61 = vpop.f32.mrb[17].mxu0  ;;  %v759_v39 = vpop.f32.mrb[19].mxu1 }
 0x14b   :  { %v1949_v21 = vpack.c.bf16 %v1589_v58, %v1589_v58  ;;  %v1590_v35 = vmax.f32 %v1558_v37, 0.0  ;;  %v2226_v63 = vadd.f32 %v1404_v61, %v756_v59  ;;  %v2196_v0 = vpop.f32.mrb[18].mxu0 }
 0x14c   :  { %1752 = vst.msk [vmem:[%s2911_s5 + $0x38] sm:$0xf] %vm1737_vm4, %v1951_v60  ;;  %v1952_v2 = vpack.c.bf16 %v1592_v48, %v1592_v48  ;;  %v1524_v1 = vmul.f32 %v2225_v56, %v2707_v28  ;;  %v2227_v3 = vadd.f32 %v2196_v0, %v2116_v62  ;;  %v1407_v4 = vpop.f32.mrb[19].mxu0 }
 0x14d   :  { %1750 = vst.msk [vmem:[%s2911_s5 + $0x30] sm:$0xf] %vm1737_vm4, %v1949_v21  ;;  %v1950_v22 = vpack.c.bf16 %v1590_v35, %v1590_v35  ;;  %v1522_v5 = vmul.f32 %v2226_v63, %v2707_v28  ;;  %v2228_v6 = vadd.f32 %v1407_v4, %v759_v39 }
 0x14e   :  { %1753 = vst.msk [vmem:[%s2911_s5 + $0x3c] sm:$0xf] %vm1737_vm4, %v1952_v2  ;;  %v1563_v7 = vadd.f32 %v2712_v10, %v1524_v1  ;;  %v1525_v51 = vmul.f32 %v2227_v3, %v2707_v28 }
 0x14f   :  { %1751 = vst.msk [vmem:[%s2911_s5 + $0x34] sm:$0xf] %vm1737_vm4, %v1950_v22  ;;  %v1561_v8 = vadd.f32 %v2712_v10, %v1522_v5  ;;  %v1523_v9 = vmul.f32 %v2228_v6, %v2707_v28  ;;  %v2119_v13 = vpop.f32.mrb[20].mxu1 }
 0x150   :  { %v1595_v11 = vmax.f32 %v1563_v7, 0.0  ;;  %v1564_v53 = vadd.f32 %v2712_v10, %v1525_v51  ;;  %v772_v12 = vpop.f32.mrb[21].mxu1 }
 0x151   :  { %v1593_v14 = vmax.f32 %v1561_v8, 0.0  ;;  %v1562_v15 = vadd.f32 %v2712_v10, %v1523_v9  ;;  %v2199_v16 = vpop.f32.mrb[20].mxu0  ;;  %v2120_v26 = vpop.f32.mrb[22].mxu1 }
 0x152   :  { %v1955_v19 = vpack.c.bf16 %v1595_v11, %v1595_v11  ;;  %v1596_v20 = vmax.f32 %v1564_v53, 0.0  ;;  %v2229_v23 = vadd.f32 %v2199_v16, %v2119_v13  ;;  %v1420_v25 = vpop.f32.mrb[21].mxu0  ;;  %v775_v32 = vpop.f32.mrb[23].mxu1 }
 0x153   :  { %v1953_v27 = vpack.c.bf16 %v1593_v14, %v1593_v14  ;;  %v1594_v29 = vmax.f32 %v1562_v15, 0.0  ;;  %v2230_v30 = vadd.f32 %v1420_v25, %v772_v12  ;;  %v2200_v31 = vpop.f32.mrb[22].mxu0 }
 0x154   :  { %1756 = vst.msk [vmem:[%s2911_s5 + $0x48] sm:$0xf] %vm1737_vm4, %v1955_v19  ;;  %v1956_v33 = vpack.c.bf16 %v1596_v20, %v1596_v20  ;;  %v1528_v34 = vmul.f32 %v2229_v23, %v2707_v28  ;;  %v2231_v36 = vadd.f32 %v2200_v31, %v2120_v26  ;;  %v1423_v38 = vpop.f32.mrb[23].mxu0 }
 0x155   :  { %1754 = vst.msk [vmem:[%s2911_s5 + $0x40] sm:$0xf] %vm1737_vm4, %v1953_v27  ;;  %v1954_v40 = vpack.c.bf16 %v1594_v29, %v1594_v29  ;;  %v1526_v41 = vmul.f32 %v2230_v30, %v2707_v28  ;;  %v2232_v42 = vadd.f32 %v1423_v38, %v775_v32 }
 0x156   :  { %1757 = vst.msk [vmem:[%s2911_s5 + $0x4c] sm:$0xf] %vm1737_vm4, %v1956_v33  ;;  %v1567_v44 = vadd.f32 %v2712_v10, %v1528_v34  ;;  %v1529_v45 = vmul.f32 %v2231_v36, %v2707_v28 }
 0x157   :  { %1755 = vst.msk [vmem:[%s2911_s5 + $0x44] sm:$0xf] %vm1737_vm4, %v1954_v40  ;;  %v1565_v46 = vadd.f32 %v2712_v10, %v1526_v41  ;;  %v1527_v47 = vmul.f32 %v2232_v42, %v2707_v28  ;;  %v2123_v17 = vpop.f32.mrb[24].mxu1 }
 0x158   :  { %v1599_v49 = vmax.f32 %v1567_v44, 0.0  ;;  %v1568_v50 = vadd.f32 %v2712_v10, %v1529_v45  ;;  %v788_v18 = vpop.f32.mrb[25].mxu1 }
 0x159   :  { %v1597_v52 = vmax.f32 %v1565_v46, 0.0  ;;  %v1566_v54 = vadd.f32 %v2712_v10, %v1527_v47  ;;  %v2203_v55 = vpop.f32.mrb[24].mxu0  ;;  %v2124_v43 = vpop.f32.mrb[26].mxu1 }
 0x15a   :  { %v1959_v24 = vpack.c.bf16 %v1599_v49, %v1599_v49  ;;  %v1600_v57 = vmax.f32 %v1568_v50, 0.0  ;;  %v2233_v58 = vadd.f32 %v2203_v55, %v2123_v17  ;;  %v1436_v37 = vpop.f32.mrb[25].mxu0  ;;  %v791_v61 = vpop.f32.mrb[27].mxu1 }
 0x15b   :  { %v1957_v59 = vpack.c.bf16 %v1597_v52, %v1597_v52  ;;  %v1598_v60 = vmax.f32 %v1566_v54, 0.0  ;;  %v2234_v48 = vadd.f32 %v1436_v37, %v788_v18  ;;  %v2204_v56 = vpop.f32.mrb[26].mxu0 }
 0x15c   :  { %1760 = vst.msk [vmem:[%s2911_s5 + $0x58] sm:$0xf] %vm1737_vm4, %v1959_v24  ;;  %v1960_v62 = vpack.c.bf16 %v1600_v57, %v1600_v57  ;;  %v1532_v21 = vmul.f32 %v2233_v58, %v2707_v28  ;;  %v2235_v35 = vadd.f32 %v2204_v56, %v2124_v43  ;;  %v1439_v63 = vpop.f32.mrb[27].mxu0 }
 0x15d   :  { %1758 = vst.msk [vmem:[%s2911_s5 + $0x50] sm:$0xf] %vm1737_vm4, %v1957_v59  ;;  %v1958_v0 = vpack.c.bf16 %v1598_v60, %v1598_v60  ;;  %v1530_v39 = vmul.f32 %v2234_v48, %v2707_v28  ;;  %v2236_v2 = vadd.f32 %v1439_v63, %v791_v61 }
 0x15e   :  { %1761 = vst.msk [vmem:[%s2911_s5 + $0x5c] sm:$0xf] %vm1737_vm4, %v1960_v62  ;;  %v1571_v1 = vadd.f32 %v2712_v10, %v1532_v21  ;;  %v1533_v3 = vmul.f32 %v2235_v35, %v2707_v28 }
 0x15f   :  { %1759 = vst.msk [vmem:[%s2911_s5 + $0x54] sm:$0xf] %vm1737_vm4, %v1958_v0  ;;  %v1569_v4 = vadd.f32 %v2712_v10, %v1530_v39  ;;  %v1531_v22 = vmul.f32 %v2236_v2, %v2707_v28  ;;  %v2127_v7 = vpop.f32.mrb[28].mxu1 }
 0x160   :  { %v1603_v5 = vmax.f32 %v1571_v1, 0.0  ;;  %v1572_v6 = vadd.f32 %v2712_v10, %v1533_v3  ;;  %v804_v11 = vpop.f32.mrb[29].mxu1 }
 0x161   :  { %v1601_v51 = vmax.f32 %v1569_v4, 0.0  ;;  %v1570_v8 = vadd.f32 %v2712_v10, %v1531_v22  ;;  %v2207_v9 = vpop.f32.mrb[28].mxu0  ;;  %v2128_v16 = vpop.f32.mrb[30].mxu1 }
 0x162   :  { %v1963_v53 = vpack.c.bf16 %v1603_v5, %v1603_v5  ;;  %v1604_v13 = vmax.f32 %v1572_v6, 0.0  ;;  %v2237_v14 = vadd.f32 %v2207_v9, %v2127_v7  ;;  %v1452_v15 = vpop.f32.mrb[29].mxu0  ;;  %v807_v25 = vpop.f32.mrb[31].mxu1 }
 0x163   :  { %v1961_v12 = vpack.c.bf16 %v1601_v51, %v1601_v51  ;;  %v1602_v19 = vmax.f32 %v1570_v8, 0.0  ;;  %v2238_v20 = vadd.f32 %v1452_v15, %v804_v11  ;;  %v2208_v23 = vpop.f32.mrb[30].mxu0 }
 0x164   :  { %1764 = vst.msk [vmem:[%s2911_s5 + $0x68] sm:$0xf] %vm1737_vm4, %v1963_v53  ;;  %v1964_v26 = vpack.c.bf16 %v1604_v13, %v1604_v13  ;;  %v1536_v27 = vmul.f32 %v2237_v14, %v2707_v28  ;;  %v2239_v29 = vadd.f32 %v2208_v23, %v2128_v16  ;;  %v1455_v30 = vpop.f32.mrb[31].mxu0 }
 0x165   :  { %1762 = vst.msk [vmem:[%s2911_s5 + $0x60] sm:$0xf] %vm1737_vm4, %v1961_v12  ;;  %v1962_v31 = vpack.c.bf16 %v1602_v19, %v1602_v19  ;;  %v1534_v32 = vmul.f32 %v2238_v20, %v2707_v28  ;;  %v2240_v33 = vadd.f32 %v1455_v30, %v807_v25 }
 0x166   :  { %1765 = vst.msk [vmem:[%s2911_s5 + $0x6c] sm:$0xf] %vm1737_vm4, %v1964_v26  ;;  %v1575_v34 = vadd.f32 %v2712_v10, %v1536_v27  ;;  %v1537_v36 = vmul.f32 %v2239_v29, %v2707_v28 }
 0x167   :  { %1763 = vst.msk [vmem:[%s2911_s5 + $0x64] sm:$0xf] %vm1737_vm4, %v1962_v31  ;;  %v1573_v38 = vadd.f32 %v2712_v10, %v1534_v32  ;;  %v1535_v40 = vmul.f32 %v2240_v33, %v2707_v28 }
 0x168   :  { %v1607_v41 = vmax.f32 %v1575_v34, 0.0  ;;  %v1576_v42 = vadd.f32 %v2712_v10, %v1537_v36 }
 0x169   :  { %v1605_v44 = vmax.f32 %v1573_v38, 0.0  ;;  %v1574_v45 = vadd.f32 %v2712_v10, %v1535_v40 }
 0x16a   :  { %v1967_v46 = vpack.c.bf16 %v1607_v41, %v1607_v41  ;;  %v1608_v47 = vmax.f32 %v1576_v42, 0.0 }
 0x16b   :  { %v1965_v49 = vpack.c.bf16 %v1605_v44, %v1605_v44  ;;  %v1606_v50 = vmax.f32 %v1574_v45, 0.0 }
 0x16c   :  { %1768 = vst.msk [vmem:[%s2911_s5 + $0x78] sm:$0xf] %vm1737_vm4, %v1967_v46  ;;  %v1968_v17 = vpack.c.bf16 %v1608_v47, %v1608_v47 }
 0x16d   :  { %1766 = vst.msk [vmem:[%s2911_s5 + $0x70] sm:$0xf] %vm1737_vm4, %v1965_v49  ;;  %v1966_v28 = vpack.c.bf16 %v1606_v50, %v1606_v50 }
 0x16e   :  { %1769 = vst.msk [vmem:[%s2911_s5 + $0x7c] sm:$0xf] %vm1737_vm4, %v1968_v17 }
 0x16f   :  { %1767 = vst.msk [vmem:[%s2911_s5 + $0x74] sm:$0xf] %vm1737_vm4, %v1966_v28 }

// kernel: _lambda_.8
= control target key start
LH: loop header
LB: loop body
LE: loop exit
PB: predicated region body
PF: predicated region fallthrough
CT: control target
= control target key end

     0   :  { %v290_v34 = vlaneseq  ;;  %s538_s1 = inlined_call_operand.vmem [shape: bf16[256,256], index: 1, kind: input, shape index: {}]   ;;  %s539_s0 = inlined_call_operand.vmem [shape: bf16[16,256], index: 0, kind: input, shape index: {}]   ;;  %s540_s2 = inlined_call_operand.vmem [shape: f32[1,256], index: 2, kind: input, shape index: {}]   ;;  %s541_s3 = inlined_call_operand.vmem [shape: f32[16,256], index: 3, kind: output, shape index: {}]  }
   0x1   :  { %v350_v0 = vld [vmem:[%s538_s1 + $0x4] ss:$8 sps:$4 sm:$0xff]   ;;  %v352_v1 = vld [vmem:[%s538_s1] ss:$8 sps:$4 sm:$0xff]   ;;  %v353_v2 = vld [vmem:[%s538_s1 + $0x14] ss:$8 sps:$4 sm:$0xff]  }
   0x2   :  { %230 = vmatprep.subr.bf16.mxu0 %v350_v0  ;;  %v355_v3 = vld [vmem:[%s538_s1 + $0x10] ss:$8 sps:$4 sm:$0xff]   ;;  %v356_v4 = vld [vmem:[%s538_s1 + $0x24] ss:$8 sps:$4 sm:$0xff]   ;;  %v358_v5 = vld [vmem:[%s538_s1 + $0x20] ss:$8 sps:$4 sm:$0xff]  }
   0x3   :  { %231 = vmatpush1.bf16.msra.mxu0 %v352_v1  ;;  %v359_v6 = vld [vmem:[%s538_s1 + $0x34] ss:$8 sps:$4 sm:$0xff]   ;;  %v361_v7 = vld [vmem:[%s538_s1 + $0x30] ss:$8 sps:$4 sm:$0xff]   ;;  %v362_v8 = vld [vmem:[%s538_s1 + $0x44] ss:$8 sps:$4 sm:$0xff]  }
   0x4   :  { %232 = vmatprep.subr.bf16.mxu0 %v353_v2  ;;  %v364_v9 = vld [vmem:[%s538_s1 + $0x40] ss:$8 sps:$4 sm:$0xff]   ;;  %v365_v10 = vld [vmem:[%s538_s1 + $0x54] ss:$8 sps:$4 sm:$0xff]   ;;  %v367_v11 = vld [vmem:[%s538_s1 + $0x50] ss:$8 sps:$4 sm:$0xff]  }
   0x5   :  { %v368_v12 = vld [vmem:[%s538_s1 + $0x64] ss:$8 sps:$4 sm:$0xff]   ;;  %v370_v14 = vld [vmem:[%s538_s1 + $0x60] ss:$8 sps:$4 sm:$0xff]   ;;  %v371_v15 = vld [vmem:[%s538_s1 + $0x74] ss:$8 sps:$4 sm:$0xff]  }
   0x6   :  { %v400_v13 = vld [vmem:[%s539_s0 + $0x4] ss:$8 sps:$4 sm:$0xff]   ;;  %v373_v16 = vld [vmem:[%s538_s1 + $0x70] ss:$8 sps:$4 sm:$0xff]   ;;  %v376_v18 = vld [vmem:[%s538_s1 + $0x80] ss:$8 sps:$4 sm:$0xff]  }
   0x7   :  { %233 = vmatpush1.bf16.msra.mxu0 %v355_v3  ;;  %262 = vmatprep.mubr.bf16.mxu0 %v400_v13  ;;  %v374_v17 = vld [vmem:[%s538_s1 + $0x84] ss:$8 sps:$4 sm:$0xff]   ;;  %v377_v19 = vld [vmem:[%s538_s1 + $0x94] ss:$8 sps:$4 sm:$0xff]   ;;  %v379_v20 = vld [vmem:[%s538_s1 + $0x90] ss:$8 sps:$4 sm:$0xff]  }
   0x8   :  { %234 = vmatprep.subr.bf16.mxu0 %v356_v4  ;;  %v380_v21 = vld [vmem:[%s538_s1 + $0xa4] ss:$8 sps:$4 sm:$0xff]   ;;  %v382_v22 = vld [vmem:[%s538_s1 + $0xa0] ss:$8 sps:$4 sm:$0xff]   ;;  %v383_v23 = vld [vmem:[%s538_s1 + $0xb4] ss:$8 sps:$4 sm:$0xff]  }
   0x9   :  { %v385_v24 = vld [vmem:[%s538_s1 + $0xb0] ss:$8 sps:$4 sm:$0xff]   ;;  %v386_v25 = vld [vmem:[%s538_s1 + $0xc4] ss:$8 sps:$4 sm:$0xff]   ;;  %v388_v26 = vld [vmem:[%s538_s1 + $0xc0] ss:$8 sps:$4 sm:$0xff]  }
   0xa   :  { %v389_v27 = vld [vmem:[%s538_s1 + $0xd4] ss:$8 sps:$4 sm:$0xff]   ;;  %v391_v28 = vld [vmem:[%s538_s1 + $0xd0] ss:$8 sps:$4 sm:$0xff]   ;;  %v392_v29 = vld [vmem:[%s538_s1 + $0xe4] ss:$8 sps:$4 sm:$0xff]  }
   0xb   :  { %235 = vmatpush1.bf16.msra.mxu0 %v358_v5  ;;  %v394_v30 = vld [vmem:[%s538_s1 + $0xe0] ss:$8 sps:$4 sm:$0xff]   ;;  %v395_v31 = vld [vmem:[%s538_s1 + $0xf4] ss:$8 sps:$4 sm:$0xff]   ;;  %v397_v32 = vld [vmem:[%s538_s1 + $0xf0] ss:$8 sps:$4 sm:$0xff]  }
   0xc   :  { %236 = vmatprep.subr.bf16.mxu0 %v359_v6  ;;  %v398_v33 = vld [vmem:[%s539_s0] ss:$8 sps:$4 sm:$0xff]   ;;  %v291_v35 = vshrl.u32 %v290_v34, 7 }
   0xd   :  { %v288_v37 = vld [vmem:[%s540_s2] sm:$0x3] }
   0xe   :  { %v292_v36 = vsub.s32 0, %v291_v35  ;;  %v296_v38 = vsub.s32 1, %v291_v35 }
   0xf   :  { %237 = vmatpush1.bf16.msra.mxu0 %v361_v7 }
  0x10   :  { %238 = vmatprep.subr.bf16.mxu0 %v362_v8  ;;  %v293_v39 = vrot.slane %v288_v37, %v292_v36  ;;  %v297_v40 = vrot.slane %v288_v37, %v296_v38 }
  0x13   :  { %239 = vmatpush1.bf16.msra.mxu0 %v364_v9 }
  0x14   :  { %240 = vmatprep.subr.bf16.mxu0 %v365_v10 }
  0x17   :  { %241 = vmatpush1.bf16.msra.mxu0 %v367_v11 }
  0x18   :  { %242 = vmatprep.subr.bf16.mxu0 %v368_v12 }
  0x1b   :  { %243 = vmatpush1.bf16.msra.mxu0 %v370_v14 }
  0x1c   :  { %244 = vmatprep.subr.bf16.mxu0 %v371_v15 }
  0x1f   :  { %245 = vmatpush1.bf16.msra.mxu0 %v373_v16 }
  0x20   :  { %246 = vmatprep.subr.bf16.mxu0 %v374_v17 }
  0x23   :  { %247 = vmatpush1.bf16.msra.mxu0 %v376_v18 }
  0x24   :  { %248 = vmatprep.subr.bf16.mxu0 %v377_v19 }
  0x27   :  { %249 = vmatpush1.bf16.msra.mxu0 %v379_v20 }
  0x28   :  { %250 = vmatprep.subr.bf16.mxu0 %v380_v21 }
  0x2b   :  { %251 = vmatpush1.bf16.msra.mxu0 %v382_v22 }
  0x2c   :  { %252 = vmatprep.subr.bf16.mxu0 %v383_v23 }
  0x2f   :  { %253 = vmatpush1.bf16.msra.mxu0 %v385_v24 }
  0x30   :  { %254 = vmatprep.subr.bf16.mxu0 %v386_v25 }
  0x33   :  { %255 = vmatpush1.bf16.msra.mxu0 %v388_v26 }
  0x34   :  { %256 = vmatprep.subr.bf16.mxu0 %v389_v27 }
  0x37   :  { %257 = vmatpush1.bf16.msra.mxu0 %v391_v28 }
  0x38   :  { %258 = vmatprep.subr.bf16.mxu0 %v392_v29 }
  0x3b   :  { %259 = vmatpush1.bf16.msra.mxu0 %v394_v30 }
  0x3c   :  { %260 = vmatprep.subr.bf16.mxu0 %v395_v31 }
  0x3f   :  { %261 = vmatpush1.bf16.msra.mxu0 %v397_v32 }
  0x42   :  { %263 = vmatmul.mubr.bf16.vlgmr.msra.gmra.mrb[0].mxu0 %v398_v33 }
 0x115   :  { %v264_v41 = vpop.f32.mrb[0].mxu0 }
 0x116   :  { %v300_v42 = vadd.f32 %v293_v39, %v264_v41  ;;  %v266_v43 = vpop.f32.mrb[1].mxu0 }
 0x117   :  { %v301_v44 = vadd.f32 %v297_v40, %v266_v43  ;;  %v268_v45 = vpop.f32.mrb[2].mxu0 }
 0x118   :  { %v304_v46 = vmax.f32 %v300_v42, 0.0  ;;  %v302_v47 = vadd.f32 %v293_v39, %v268_v45  ;;  %v270_v48 = vpop.f32.mrb[3].mxu0 }
 0x119   :  { %v305_v49 = vmax.f32 %v301_v44, 0.0  ;;  %v303_v50 = vadd.f32 %v297_v40, %v270_v48 }
 0x11a   :  { %308 = vst [vmem:[%s541_s3] sm:$0xff] %v304_v46  ;;  %v306_v51 = vmax.f32 %v302_v47, 0.0 }
 0x11b   :  { %309 = vst [vmem:[%s541_s3 + $0x8] sm:$0xff] %v305_v49  ;;  %v307_v52 = vmax.f32 %v303_v50, 0.0 }
 0x11c   :  { %310 = vst [vmem:[%s541_s3 + $0x10] sm:$0xff] %v306_v51 }
 0x11d   :  { %311 = vst [vmem:[%s541_s3 + $0x18] sm:$0xff] %v307_v52 }

// kernel: _lambda_.9
= control target key start
LH: loop header
LB: loop body
LE: loop exit
PB: predicated region body
PF: predicated region fallthrough
CT: control target
= control target key end

     0   :  { %s371_s1 = inlined_call_operand.vmem [shape: bf16[256,128], index: 1, kind: input, shape index: {}]   ;;  %s372_s0 = inlined_call_operand.vmem [shape: bf16[16,256], index: 0, kind: input, shape index: {}]   ;;  %s373_s2 = inlined_call_operand.vmem [shape: f32[1,128], index: 2, kind: input, shape index: {}]   ;;  %s374_s3 = inlined_call_operand.vmem [shape: f32[16,128], index: 3, kind: output, shape index: {}]  }
   0x1   :  { %v269_v0 = vld [vmem:[%s371_s1 + $0x40] sm:$0xff]   ;;  %v271_v2 = vld [vmem:[%s371_s1 + $0x48] sm:$0xff]   ;;  %v273_v4 = vld [vmem:[%s371_s1 + $0x50] sm:$0xff]  }
   0x2   :  { %v270_v1 = vld [vmem:[%s371_s1] sm:$0xff]   ;;  %247 = vmatprep.subr.bf16.mxu0 %v269_v0  ;;  %v272_v3 = vld [vmem:[%s371_s1 + $0x8] sm:$0xff]   ;;  %v274_v5 = vld [vmem:[%s371_s1 + $0x10] sm:$0xff]  }
   0x3   :  { %248 = vmatpush3.bf16.msra.mxu0 %v270_v1  ;;  %v275_v6 = vld [vmem:[%s371_s1 + $0x58] sm:$0xff]   ;;  %v277_v8 = vld [vmem:[%s371_s1 + $0x60] sm:$0xff]   ;;  %v279_v10 = vld [vmem:[%s371_s1 + $0x68] sm:$0xff]  }
   0x4   :  { %249 = vmatprep.subr.bf16.mxu0 %v271_v2  ;;  %v276_v7 = vld [vmem:[%s371_s1 + $0x18] sm:$0xff]   ;;  %v278_v9 = vld [vmem:[%s371_s1 + $0x20] sm:$0xff]   ;;  %v280_v12 = vld [vmem:[%s371_s1 + $0x28] sm:$0xff]  }
   0x5   :  { %v287_v11 = vld [vmem:[%s372_s0 + $0x4] ss:$8 sps:$4 sm:$0xff]   ;;  %v281_v13 = vld [vmem:[%s371_s1 + $0x70] sm:$0xff]   ;;  %v283_v15 = vld [vmem:[%s371_s1 + $0x78] sm:$0xff]  }
   0x6   :  { %195 = vmatprep.mubr.bf16.mxu0 %v287_v11  ;;  %v282_v14 = vld [vmem:[%s371_s1 + $0x30] sm:$0xff]   ;;  %v284_v16 = vld [vmem:[%s371_s1 + $0x38] sm:$0xff]   ;;  %v285_v17 = vld [vmem:[%s372_s0] ss:$8 sps:$4 sm:$0xff]  }
   0x7   :  { %250 = vmatpush3.bf16.msra.mxu0 %v272_v3  ;;  %v246_v20 = vld [vmem:[%s373_s2] ss:$0 sm:$0xff] }
   0x8   :  { %251 = vmatprep.subr.bf16.mxu0 %v273_v4 }
   0xb   :  { %252 = vmatpush3.bf16.msra.mxu0 %v274_v5 }
   0xc   :  { %253 = vmatprep.subr.bf16.mxu0 %v275_v6 }
   0xf   :  { %254 = vmatpush3.bf16.msra.mxu0 %v276_v7 }
  0x10   :  { %255 = vmatprep.subr.bf16.mxu0 %v277_v8 }
  0x13   :  { %256 = vmatpush3.bf16.msra.mxu0 %v278_v9 }
  0x14   :  { %257 = vmatprep.subr.bf16.mxu0 %v279_v10 }
  0x17   :  { %258 = vmatpush3.bf16.msra.mxu0 %v280_v12 }
  0x18   :  { %259 = vmatprep.subr.bf16.mxu0 %v281_v13 }
  0x1b   :  { %260 = vmatpush3.bf16.msra.mxu0 %v282_v14 }
  0x1c   :  { %261 = vmatprep.subr.bf16.mxu0 %v283_v15 }
  0x1f   :  { %262 = vmatpush3.bf16.msra.mxu0 %v284_v16 }
  0x22   :  { %196 = vmatmul.mubr.bf16.vlgmr.msra.gmra.mrb[0].mxu0 %v285_v17 }
  0xf5   :  { %v263_v18 = vpop.f32.mrb[0].mxu0 }
  0xf6   :  { %v264_v19 = vpop.f32.mrb[1].mxu0 }
  0xf7   :  { %v265_v21 = vadd.f32 %v264_v19, %v263_v18  ;;  %v266_v22 = vpop.f32.mrb[2].mxu0 }
  0xf8   :  { %v267_v23 = vpop.f32.mrb[3].mxu0 }
  0xf9   :  { %v220_v24 = vadd.f32 %v265_v21, %v246_v20  ;;  %v268_v25 = vadd.f32 %v267_v23, %v266_v22 }
  0xfb   :  { %222 = vst [vmem:[%s374_s3] sm:$0xff] %v220_v24  ;;  %v221_v26 = vadd.f32 %v268_v25, %v246_v20 }
  0xfd   :  { %223 = vst [vmem:[%s374_s3 + $0x8] sm:$0xff] %v221_v26 }

// kernel: _lambda_.7
= control target key start
LH: loop header
LB: loop body
LE: loop exit
PB: predicated region body
PF: predicated region fallthrough
CT: control target
= control target key end

     0   :  { %vm267_vm0 = vsmask.f32 7424  ;;  %vm853_vm1 = vsmask.f32 6400  ;;  %vm1223_vm2 = vcmask 1045504   ;;  %vm1752_vm3 = vcmask 519168   ;;  %s2925_s2 = inlined_call_operand.vmem [shape: bf16[4,128,64], index: 2, kind: input, shape index: {}]   ;;  %s2926_s0 = inlined_call_operand.vmem [shape: bf16[272,128], index: 0, kind: input, shape index: {}, may-alias: {0,1}]   ;;  %s2927_s1 = inlined_call_operand.vmem [shape: bf16[272,128], index: 1, kind: input, shape index: {}, may-alias: {0,1}]   ;;  %s2928_s3 = inlined_call_operand.vmem [shape: f32[1,64], index: 3, kind: input, shape index: {}]   ;;  %s2929_s4 = inlined_call_operand.vmem [shape: f32[1,64], index: 4, kind: input, shape index: {}]   ;;  %s2930_s5 = inlined_call_operand.vmem [shape: bf16[256,64], index: 5, kind: output, shape index: {}]  }
   0x1   :  { %v2344_v0 = vld [vmem:[%s2925_s2 + $0x40] sm:$0xff]   ;;  %v2346_v2 = vld [vmem:[%s2925_s2 + $0x48] sm:$0xff]   ;;  %v2348_v4 = vld [vmem:[%s2925_s2 + $0x50] sm:$0xff]  }
   0x2   :  { %v2345_v1 = vld [vmem:[%s2925_s2 + $0x80] sm:$0xff]   ;;  %2056 = vmatprep.subr.bf16.mxu1 %v2344_v0  ;;  %v2347_v3 = vld [vmem:[%s2925_s2 + $0x88] sm:$0xff]   ;;  %v2349_v5 = vld [vmem:[%s2925_s2 + $0x90] sm:$0xff]  }
   0x3   :  { %2152 = vmatprep.subr.bf16.mxu0 %v2345_v1  ;;  %2057 = vmatpush3.bf16.msra.mxu1 %v2344_v0  ;;  %v2350_v6 = vld [vmem:[%s2925_s2 + $0x58] sm:$0xff]   ;;  %v2352_v8 = vld [vmem:[%s2925_s2 + $0x60] sm:$0xff]   ;;  %v2354_v10 = vld [vmem:[%s2925_s2 + $0x68] sm:$0xff]  }
   0x4   :  { %2153 = vmatpush3.bf16.msra.mxu0 %v2345_v1  ;;  %2058 = vmatprep.subr.bf16.mxu1 %v2346_v2  ;;  %v2351_v7 = vld [vmem:[%s2925_s2 + $0x98] sm:$0xff]   ;;  %v2353_v9 = vld [vmem:[%s2925_s2 + $0xa0] sm:$0xff]   ;;  %v2355_v11 = vld [vmem:[%s2925_s2 + $0xa8] sm:$0xff]  }
   0x5   :  { %2154 = vmatprep.subr.bf16.mxu0 %v2347_v3  ;;  %v2462_v12 = vld [vmem:[%s2926_s0] sm:$0xff]   ;;  %v2467_v13 = vld [vmem:[%s2926_s0 + $0x8] sm:$0xff]   ;;  %v2472_v14 = vld [vmem:[%s2926_s0 + $0x10] sm:$0xff]  }
   0x6   :  { %176 = vst [vmem:[#allocation2] sm:$0xff] %v2462_v12  ;;  %v269_v15 = vshrl.u32 %v2462_v12, 16  ;;  %v271_v16 = vshll.u32 %v2462_v12, 16  ;;  %v276_v17 = vshll.u32 %v2467_v13, 16  ;;  %v280_v18 = vshrl.u32 %v2467_v13, 16  ;;  %v2356_v19 = vld [vmem:[%s2925_s2 + $0x70] sm:$0xff]  }
   0x7   :  { %2059 = vmatpush3.bf16.msra.mxu1 %v2346_v2  ;;  %v284_v20 = vshll.u32 %v2472_v14, 16  ;;  %v288_v21 = vshrl.u32 %v2472_v14, 16  ;;  %v2357_v22 = vld [vmem:[%s2925_s2 + $0xb0] sm:$0xff]   ;;  %v2358_v25 = vld [vmem:[%s2925_s2 + $0x78] sm:$0xff]   ;;  %v2503_v35 = vld [vmem:[%s2926_s0 + $0x20] sm:$0xff]  }
   0x8   :  { %2155 = vmatpush3.bf16.msra.mxu0 %v2347_v3  ;;  %2060 = vmatprep.subr.bf16.mxu1 %v2348_v4  ;;  %v273_v23 = vrot.slane %v271_v16, 1  ;;  %v278_v24 = vrot.slane %v276_v17, 1  ;;  %v862_v26 = vrot.slane %v280_v18, 1  ;;  %v863_v27 = vrot.slane %v276_v17, 2  ;;  %v2493_v29 = vld [vmem:[%s2926_s0 + $0x18] sm:$0xff]   ;;  %v2363_v44 = vld [vmem:[%s2925_s2] sm:$0xff]  }
   0x9   :  { %2156 = vmatprep.subr.bf16.mxu0 %v2349_v5  ;;  %v866_v28 = vrot.slane %v288_v21, 1  ;;  %v2359_v30 = vld [vmem:[%s2925_s2 + $0xb8] sm:$0xff]   ;;  %v867_v32 = vrot.slane %v284_v20, 2  ;;  %v292_v33 = vshll.u32 %v2493_v29, 16  ;;  %v296_v34 = vshrl.u32 %v2493_v29, 16  ;;  %v2514_v49 = vld [vmem:[%s2926_s0 + $0x28] sm:$0xff]  }
   0xa   :  { %v274_v31 = vor.u32 %v273_v23, %v269_v15  ;;  %v286_v38 = vrot.slane %v284_v20, 1  ;;  %v282_v43 = vor.u32 %v280_v18, %v278_v24  ;;  %v300_v45 = vshll.u32 %v2503_v35, 16  ;;  %v2364_v52 = vld [vmem:[%s2925_s2 + $0xc0] sm:$0xff]   ;;  %v2524_v58 = vld [vmem:[%s2926_s0 + $0x30] sm:$0xff]   ;;  %v2367_v61 = vld [vmem:[%s2925_s2 + $0x8] sm:$0xff]  }
   0xb   :  { %2061 = vmatpush3.bf16.msra.mxu1 %v2348_v4  ;;  %v870_v39 = vrot.slane %v296_v34, 1  ;;  %v871_v40 = vrot.slane %v292_v33, 2  ;;  %v864_v46 = vor.u32 %v863_v27, %v862_v26  ;;  %v868_v47 = vor.u32 %v867_v32, %v866_v28  ;;  %v2368_v2 = vld [vmem:[%s2925_s2 + $0xc8] sm:$0xff]   ;;  %v2371_v15 = vld [vmem:[%s2925_s2 + $0x10] sm:$0xff]   ;;  %v2550_v16 = vld [vmem:[%s2926_s0 + $0x40] sm:$0xff]  }
   0xc   :  { %2157 = vmatpush3.bf16.msra.mxu0 %v2349_v5  ;;  %2062 = vmatprep.subr.bf16.mxu1 %v2350_v6  ;;  %v279_v36 = vsel %vm267_vm0, %v274_v31, %v278_v24  ;;  %v304_v48 = vshrl.u32 %v2503_v35, 16  ;;  %v290_v53 = vor.u32 %v288_v21, %v286_v38  ;;  %v294_v54 = vrot.slane %v292_v33, 1  ;;  %v2372_v20 = vld [vmem:[%s2925_s2 + $0xd0] sm:$0xff]   ;;  %v2375_v28 = vld [vmem:[%s2925_s2 + $0x18] sm:$0xff]  }
   0xd   :  { %2158 = vmatprep.subr.bf16.mxu0 %v2351_v7  ;;  %2072 = vmatprep.mubr.bf16.mxu1 %v279_v36  ;;  %v834_v37 = vld [vmem:[#allocation2] sm:$0xfe]  ;;  %v872_v55 = vor.u32 %v871_v40, %v870_v39  ;;  %v308_v56 = vshll.u32 %v2514_v49, 16  ;;  %v312_v57 = vshrl.u32 %v2514_v49, 16  ;;  %v287_v60 = vsel %vm267_vm0, %v282_v43, %v286_v38  ;;  %v2571_v32 = vld [vmem:[%s2926_s0 + $0x50] sm:$0xff]   ;;  %v2376_v39 = vld [vmem:[%s2925_s2 + $0xd8] sm:$0xff]  }
   0xe   :  { %v855_v41 = vshrl.u32 %v834_v37, 16  ;;  %v858_v42 = vshll.u32 %v834_v37, 16  ;;  %v869_v62 = vsel %vm853_vm1, %v864_v46, %v868_v47  ;;  %v302_v63 = vrot.slane %v300_v45, 1 }
   0xf   :  { %2063 = vmatpush3.bf16.msra.mxu1 %v2350_v6  ;;  %v874_v0 = vrot.slane %v304_v48, 1  ;;  %v875_v1 = vrot.slane %v300_v45, 2  ;;  %v295_v4 = vsel %vm267_vm0, %v290_v53, %v294_v54  ;;  %v878_v5 = vrot.slane %v312_v57, 1 }
  0x10   :  { %2159 = vmatpush3.bf16.msra.mxu0 %v2351_v7  ;;  %2064 = vmatprep.subr.bf16.mxu1 %v2352_v8  ;;  %v857_v50 = vrot.slane %v855_v41, 1  ;;  %v860_v51 = vrot.slane %v858_v42, 2  ;;  %v879_v6 = vrot.slane %v308_v56, 2  ;;  %v873_v7 = vsel %vm853_vm1, %v868_v47, %v872_v55  ;;  %v2379_v47 = vld [vmem:[%s2925_s2 + $0x20] sm:$0xff]  }
  0x11   :  { %2160 = vmatprep.subr.bf16.mxu0 %v2353_v9  ;;  %v876_v17 = vor.u32 %v875_v1, %v874_v0  ;;  %v306_v18 = vor.u32 %v304_v48, %v302_v63  ;;  %v332_v42 = vshll.u32 %v2550_v16, 16  ;;  %v336_v43 = vshrl.u32 %v2550_v16, 16  ;;  %v2384_v0 = vld [vmem:[%s2925_s2 + $0xe8] sm:$0xff]  }
  0x12   :  { %v861_v59 = vor.u32 %v860_v51, %v857_v50  ;;  %v880_v21 = vor.u32 %v879_v6, %v878_v5  ;;  %v2592_v51 = vld [vmem:[%s2926_s0 + $0x60] sm:$0xff]   ;;  %v348_v5 = vshll.u32 %v2571_v32, 16 }
  0x13   :  { %2065 = vmatpush3.bf16.msra.mxu1 %v2352_v8  ;;  %v320_v8 = vshrl.u32 %v2524_v58, 16  ;;  %v334_v1 = vrot.slane %v332_v42, 1 }
  0x14   :  { %2161 = vmatpush3.bf16.msra.mxu0 %v2353_v9  ;;  %2066 = vmatprep.subr.bf16.mxu1 %v2354_v10  ;;  %v865_v3 = vsel %vm853_vm1, %v861_v59, %v864_v46  ;;  %v2541_v9 = vld [vmem:[%s2926_s0 + $0x38] sm:$0xff]   ;;  %v881_v33 = vsel %vm853_vm1, %v876_v17, %v880_v21 }
  0x15   :  { %2162 = vmatprep.subr.bf16.mxu0 %v2355_v11  ;;  %2168 = vmatprep.mubr.bf16.mxu0 %v865_v3  ;;  %v328_v23 = vshrl.u32 %v2541_v9, 16  ;;  %v882_v24 = vrot.slane %v320_v8, 1 }
  0x17   :  { %2067 = vmatpush3.bf16.msra.mxu1 %v2354_v10  ;;  %v298_v10 = vor.u32 %v296_v34, %v294_v54  ;;  %v886_v34 = vrot.slane %v328_v23, 1 }
  0x18   :  { %2163 = vmatpush3.bf16.msra.mxu0 %v2355_v11  ;;  %2068 = vmatprep.subr.bf16.mxu1 %v2356_v19  ;;  %v316_v11 = vshll.u32 %v2524_v58, 16 }
  0x19   :  { %2164 = vmatprep.subr.bf16.mxu0 %v2357_v22  ;;  %v303_v26 = vsel %vm267_vm0, %v298_v10, %v302_v63 }
  0x1a   :  { %v883_v27 = vrot.slane %v316_v11, 2  ;;  %v318_v38 = vrot.slane %v316_v11, 1 }
  0x1b   :  { %2069 = vmatpush3.bf16.msra.mxu1 %v2356_v19  ;;  %v310_v19 = vrot.slane %v308_v56, 1  ;;  %v890_v56 = vrot.slane %v336_v43, 1 }
  0x1c   :  { %2165 = vmatpush3.bf16.msra.mxu0 %v2357_v22  ;;  %2070 = vmatprep.subr.bf16.mxu1 %v2358_v25  ;;  %v324_v22 = vshll.u32 %v2541_v9, 16  ;;  %v884_v40 = vor.u32 %v883_v27, %v882_v24  ;;  %v322_v45 = vor.u32 %v320_v8, %v318_v38  ;;  %v352_v8 = vshrl.u32 %v2571_v32, 16 }
  0x1d   :  { %2166 = vmatprep.subr.bf16.mxu0 %v2359_v30  ;;  %v311_v31 = vsel %vm267_vm0, %v306_v18, %v310_v19  ;;  %v314_v37 = vor.u32 %v312_v57, %v310_v19  ;;  %v891_v57 = vrot.slane %v332_v42, 2  ;;  %v2629_v18 = vld [vmem:[%s2926_s0 + $0x78] sm:$0xff]   ;;  %v350_v19 = vrot.slane %v348_v5, 1 }
  0x1e   :  { %v887_v36 = vrot.slane %v324_v22, 2  ;;  %v326_v41 = vrot.slane %v324_v22, 1  ;;  %v885_v54 = vsel %vm853_vm1, %v880_v21, %v884_v40  ;;  %v899_v22 = vrot.slane %v348_v5, 2 }
  0x1f   :  { %2071 = vmatpush3.bf16.msra.mxu1 %v2358_v25  ;;  %v2560_v25 = vld [vmem:[%s2926_s0 + $0x48] sm:$0xff]   ;;  %v319_v53 = vsel %vm267_vm0, %v314_v37, %v318_v38  ;;  %v892_v6 = vor.u32 %v891_v57, %v890_v56  ;;  %v898_v27 = vrot.slane %v352_v8, 1  ;;  %v354_v37 = vor.u32 %v352_v8, %v350_v19 }
  0x20   :  { %2167 = vmatpush3.bf16.msra.mxu0 %v2359_v30  ;;  %2104 = vmatprep.subr.bf16.mxu1 %v2363_v44  ;;  %v877_v30 = vsel %vm853_vm1, %v872_v55, %v876_v17  ;;  %v344_v46 = vshrl.u32 %v2560_v25, 16  ;;  %v888_v48 = vor.u32 %v887_v36, %v886_v34  ;;  %v340_v50 = vshll.u32 %v2560_v25, 16  ;;  %v2387_v17 = vld [vmem:[%s2925_s2 + $0x30] sm:$0xff]   ;;  %v2392_v34 = vld [vmem:[%s2925_s2 + $0xf8] sm:$0xff]  }
  0x21   :  { %2200 = vmatprep.subr.bf16.mxu0 %v2364_v52  ;;  %v327_v55 = vsel %vm267_vm0, %v322_v45, %v326_v41  ;;  %v330_v3 = vor.u32 %v328_v23, %v326_v41  ;;  %v2390_v23 = vld [vmem:[%s2927_s1 + $0x80] sm:$0xff]   ;;  %v900_v38 = vor.u32 %v899_v22, %v898_v27  ;;  %v368_v41 = vshrl.u32 %v2592_v51, 16 }
  0x22   :  { %2073 = vmatmul.mubr.bf16.vlgmr.msra.gmra.mrb[0].mxu1 %v287_v60  ;;  %v894_v59 = vrot.slane %v344_v46, 1  ;;  %v2383_v60 = vld [vmem:[%s2925_s2 + $0x28] sm:$0xff]   ;;  %v895_v63 = vrot.slane %v340_v50, 2  ;;  %v893_v24 = vsel %vm853_vm1, %v888_v48, %v892_v6  ;;  %200 = vst [vmem:[#allocation2 + $0x80] sm:$0xff] %v2390_v23 }
  0x23   :  { %2169 = vmatmul.mubr.bf16.vlgmr.msra.gmra.mrb[0].mxu0 %v869_v62  ;;  %2105 = vmatpush3.bf16.msra.mxu1 %v2363_v44  ;;  %v2582_v44 = vld [vmem:[%s2926_s0 + $0x58] sm:$0xff]   ;;  %v889_v62 = vsel %vm853_vm1, %v884_v40, %v888_v48  ;;  %v335_v21 = vsel %vm267_vm0, %v330_v3, %v334_v1  ;;  %v364_v40 = vshll.u32 %v2592_v51, 16  ;;  %v388_v3 = vshll.u32 %v2629_v18, 16 }
  0x24   :  { %2201 = vmatpush3.bf16.msra.mxu0 %v2364_v52  ;;  %2076 = vmatprep.mubr.bf16.mxu1 %v295_v4  ;;  %v2380_v52 = vld [vmem:[%s2925_s2 + $0xe0] sm:$0xff]   ;;  %v342_v4 = vrot.slane %v340_v50, 1  ;;  %v360_v10 = vshrl.u32 %v2582_v44, 16  ;;  %v896_v11 = vor.u32 %v895_v63, %v894_v59  ;;  %v906_v50 = vrot.slane %v368_v41, 1 }
  0x25   :  { %2172 = vmatprep.mubr.bf16.mxu0 %v873_v7  ;;  %2106 = vmatprep.subr.bf16.mxu1 %v2367_v61  ;;  %v338_v7 = vor.u32 %v336_v43, %v334_v1 }
  0x26   :  { %2202 = vmatprep.subr.bf16.mxu0 %v2368_v2  ;;  %v346_v36 = vor.u32 %v344_v46, %v342_v4  ;;  %v901_v46 = vsel %vm853_vm1, %v896_v11, %v900_v38 }
  0x27   :  { %2107 = vmatpush3.bf16.msra.mxu1 %v2367_v61  ;;  %v2608_v61 = vld [vmem:[%s2926_s0 + $0x68] sm:$0xff]  }
  0x28   :  { %2203 = vmatpush3.bf16.msra.mxu0 %v2368_v2  ;;  %2108 = vmatprep.subr.bf16.mxu1 %v2371_v15  ;;  %v2617_v2 = vld [vmem:[%s2926_s0 + $0x70] sm:$0xff]   ;;  %v372_v43 = vshll.u32 %v2608_v61, 16  ;;  %v376_v45 = vshrl.u32 %v2608_v61, 16 }
  0x29   :  { %2204 = vmatprep.subr.bf16.mxu0 %v2372_v20  ;;  %v380_v63 = vshll.u32 %v2617_v2, 16 }
  0x2a   :  { %2077 = vmatmul.mubr.bf16.gmra.mrb[4].mxu1 %v303_v26  ;;  %v343_v26 = vsel %vm267_vm0, %v338_v7, %v342_v4  ;;  %v911_v56 = vrot.slane %v372_v43, 2  ;;  %v392_v4 = vshrl.u32 %v2629_v18, 16 }
  0x2b   :  { %2173 = vmatmul.mubr.bf16.gmra.mrb[4].mxu0 %v877_v30  ;;  %2080 = vmatprep.mubr.bf16.mxu1 %v311_v31  ;;  %v897_v30 = vsel %vm853_vm1, %v892_v6, %v896_v11 }
  0x2c   :  { %2176 = vmatprep.mubr.bf16.mxu0 %v881_v33  ;;  %2109 = vmatpush3.bf16.msra.mxu1 %v2371_v15  ;;  %v356_v15 = vshll.u32 %v2582_v44, 16  ;;  %v2391_v33 = vld [vmem:[%s2925_s2 + $0x38] sm:$0xff]  }
  0x2d   :  { %2205 = vmatpush3.bf16.msra.mxu0 %v2372_v20  ;;  %2110 = vmatprep.subr.bf16.mxu1 %v2375_v28  ;;  %v2388_v20 = vld [vmem:[%s2925_s2 + $0xf0] sm:$0xff]  }
  0x2e   :  { %2206 = vmatprep.subr.bf16.mxu0 %v2376_v39  ;;  %v903_v31 = vrot.slane %v356_v15, 2 }
  0x30   :  { %2111 = vmatpush3.bf16.msra.mxu1 %v2375_v28  ;;  %v902_v28 = vrot.slane %v360_v10, 1 }
  0x31   :  { %2207 = vmatpush3.bf16.msra.mxu0 %v2376_v39  ;;  %2112 = vmatprep.subr.bf16.mxu1 %v2379_v47  ;;  %v358_v39 = vrot.slane %v356_v15, 1  ;;  %v382_v15 = vrot.slane %v380_v63, 1 }
  0x32   :  { %2081 = vmatmul.mubr.bf16.gmra.mrb[8].mxu1 %v319_v53  ;;  %2208 = vmatprep.subr.bf16.mxu0 %v2380_v52  ;;  %v904_v42 = vor.u32 %v903_v31, %v902_v28 }
  0x33   :  { %2177 = vmatmul.mubr.bf16.gmra.mrb[8].mxu0 %v885_v54  ;;  %2084 = vmatprep.mubr.bf16.mxu1 %v327_v55  ;;  %v359_v48 = vsel %vm267_vm0, %v354_v37, %v358_v39  ;;  %v366_v54 = vrot.slane %v364_v40, 1  ;;  %v910_v55 = vrot.slane %v376_v45, 1  ;;  %v362_v57 = vor.u32 %v360_v10, %v358_v39 }
  0x34   :  { %2180 = vmatprep.mubr.bf16.mxu0 %v889_v62  ;;  %2113 = vmatpush3.bf16.msra.mxu1 %v2379_v47  ;;  %v351_v47 = vsel %vm267_vm0, %v346_v36, %v350_v19  ;;  %v905_v53 = vsel %vm853_vm1, %v900_v38, %v904_v42  ;;  %v374_v62 = vrot.slane %v372_v43, 1  ;;  %v915_v10 = vrot.slane %v380_v63, 2 }
  0x35   :  { %2209 = vmatpush3.bf16.msra.mxu0 %v2380_v52  ;;  %2114 = vmatprep.subr.bf16.mxu1 %v2383_v60  ;;  %v907_v52 = vrot.slane %v364_v40, 2  ;;  %v370_v59 = vor.u32 %v368_v41, %v366_v54  ;;  %v912_v1 = vor.u32 %v911_v56, %v910_v55  ;;  %v367_v5 = vsel %vm267_vm0, %v362_v57, %v366_v54  ;;  %v1188_v40 = vld [vmem:[#allocation2] sm:$0xfc] }
  0x36   :  { %2210 = vmatprep.subr.bf16.mxu0 %v2384_v0  ;;  %v919_v19 = vrot.slane %v388_v3, 2  ;;  %v1231_v56 = vrot.slane %v2503_v35, 2  ;;  %v1233_v57 = vrot.slane %v2514_v49, 2  ;;  %v1241_v63 = vrot.slane %v2560_v25, 2 }
  0x37   :  { %v375_v7 = vsel %vm267_vm0, %v370_v59, %v374_v62 }
  0x38   :  { %2115 = vmatpush3.bf16.msra.mxu1 %v2383_v60  ;;  %v908_v60 = vor.u32 %v907_v52, %v906_v50  ;;  %v1227_v52 = vrot.slane %v2472_v14, 2  ;;  %v1234_v59 = vsel %vm1223_vm2, %v1231_v56, %v1233_v57 }
  0x39   :  { %2211 = vmatpush3.bf16.msra.mxu0 %v2384_v0  ;;  %2116 = vmatprep.subr.bf16.mxu1 %v2387_v17  ;;  %v384_v0 = vshrl.u32 %v2617_v2, 16 }
  0x3a   :  { %2085 = vmatmul.mubr.bf16.gmra.mrb[12].mxu1 %v335_v21  ;;  %2212 = vmatprep.subr.bf16.mxu0 %v2388_v20  ;;  %v909_v6 = vsel %vm853_vm1, %v904_v42, %v908_v60  ;;  %v913_v11 = vsel %vm853_vm1, %v908_v60, %v912_v1  ;;  %v378_v21 = vor.u32 %v376_v45, %v374_v62  ;;  %v1224_v45 = vrot.slane %v1188_v40, 2 }
  0x3b   :  { %2181 = vmatmul.mubr.bf16.gmra.mrb[12].mxu0 %v893_v24  ;;  %2088 = vmatprep.mubr.bf16.mxu1 %v343_v26  ;;  %v914_v8 = vrot.slane %v384_v0, 1  ;;  %v386_v22 = vor.u32 %v384_v0, %v382_v15  ;;  %v390_v24 = vrot.slane %v388_v3, 1  ;;  %v249_v26 = vld [vmem:[#allocation2 + $0x80] sm:$0x1]  ;;  %v1237_v60 = vrot.slane %v2541_v9, 2 }
  0x3c   :  { %2184 = vmatprep.mubr.bf16.mxu0 %v897_v30  ;;  %2117 = vmatpush3.bf16.msra.mxu1 %v2387_v17  ;;  %v918_v17 = vrot.slane %v392_v4, 1  ;;  %v383_v31 = vsel %vm267_vm0, %v378_v21, %v382_v15 }
  0x3d   :  { %2213 = vmatpush3.bf16.msra.mxu0 %v2388_v20  ;;  %2118 = vmatprep.subr.bf16.mxu1 %v2391_v33  ;;  %v2665_v20 = vld [vmem:[#allocation2 + $0x80] sm:$0x3]  ;;  %v916_v23 = vor.u32 %v915_v10, %v914_v8  ;;  %v391_v36 = vsel %vm267_vm0, %v386_v22, %v390_v24  ;;  %v394_v41 = vor.u32 %v392_v4, %v390_v24  ;;  %v1249_v4 = vrot.slane %v2608_v61, 2 }
  0x3e   :  { %2214 = vmatprep.subr.bf16.mxu0 %v2392_v34  ;;  %v923_v27 = vshrl.u32 %v2665_v20, 16  ;;  %v926_v28 = vshll.u32 %v2665_v20, 16  ;;  %v920_v30 = vor.u32 %v919_v19, %v918_v17 }
  0x40   :  { %2119 = vmatpush3.bf16.msra.mxu1 %v2391_v33  ;;  %v396_v33 = vshll.u32 %v249_v26, 16  ;;  %v925_v37 = vrot.slane %v923_v27, 1  ;;  %v928_v38 = vrot.slane %v926_v28, 2  ;;  %v921_v39 = vsel %vm853_vm1, %v916_v23, %v920_v30 }
  0x41   :  { %2215 = vmatpush3.bf16.msra.mxu0 %v2392_v34  ;;  %v917_v34 = vsel %vm853_vm1, %v912_v1, %v916_v23  ;;  %v1245_v1 = vrot.slane %v2582_v44, 2 }
  0x42   :  { %2089 = vmatmul.mubr.bf16.gmra.mrb[16].mxu1 %v351_v47  ;;  %v398_v42 = vrot.slane %v396_v33, 1  ;;  %v929_v43 = vor.u32 %v928_v38, %v925_v37  ;;  %v1225_v47 = vrot.slane %v2467_v13, 2 }
  0x43   :  { %2185 = vmatmul.mubr.bf16.gmra.mrb[16].mxu0 %v901_v46  ;;  %2092 = vmatprep.mubr.bf16.mxu1 %v359_v48 }
  0x44   :  { %2188 = vmatprep.mubr.bf16.mxu0 %v905_v53  ;;  %v399_v46 = vsel %vm267_vm0, %v394_v41, %v398_v42  ;;  %v930_v48 = vsel %vm853_vm1, %v920_v30, %v929_v43  ;;  %v1226_v50 = vsel %vm1223_vm2, %v1224_v45, %v1225_v47  ;;  %v1229_v53 = vrot.slane %v2493_v29, 2 }
  0x45   :  { %v1228_v54 = vsel %vm1223_vm2, %v1225_v47, %v1227_v52 }
  0x46   :  { %v1230_v55 = vsel %vm1223_vm2, %v1227_v52, %v1229_v53 }
  0x4a   :  { %2093 = vmatmul.mubr.bf16.gmra.mrb[20].mxu1 %v367_v5 }
  0x4b   :  { %2189 = vmatmul.mubr.bf16.gmra.mrb[20].mxu0 %v909_v6  ;;  %2096 = vmatprep.mubr.bf16.mxu1 %v375_v7  ;;  %v1253_v6 = vrot.slane %v2629_v18, 2 }
  0x4c   :  { %2192 = vmatprep.mubr.bf16.mxu0 %v913_v11  ;;  %v2726_v11 = vld [vmem:[%s2928_s3] ss:$0 sm:$0xff] }
  0x52   :  { %2097 = vmatmul.mubr.bf16.gmra.mrb[24].mxu1 %v383_v31 }
  0x53   :  { %2193 = vmatmul.mubr.bf16.gmra.mrb[24].mxu0 %v917_v34  ;;  %2100 = vmatprep.mubr.bf16.mxu1 %v391_v36 }
  0x54   :  { %2196 = vmatprep.mubr.bf16.mxu0 %v921_v39 }
  0x5a   :  { %2101 = vmatmul.mubr.bf16.gmra.mrb[28].mxu1 %v399_v46 }
  0x5b   :  { %2197 = vmatmul.mubr.bf16.gmra.mrb[28].mxu0 %v930_v48  ;;  %2120 = vmatprep.mubr.bf16.mxu1 %v2462_v12  ;;  %v1232_v12 = vsel %vm1223_vm2, %v1229_v53, %v1231_v56 }
  0x5c   :  { %2216 = vmatprep.mubr.bf16.mxu0 %v1226_v50 }
  0x62   :  { %2121 = vmatmul.mubr.bf16.vlgmr.msra.gmra.mrb[0].mxu1 %v2467_v13  ;;  %v1235_v13 = vrot.slane %v2524_v58, 2 }
  0x63   :  { %2217 = vmatmul.mubr.bf16.vlgmr.msra.gmra.mrb[0].mxu0 %v1228_v54  ;;  %2124 = vmatprep.mubr.bf16.mxu1 %v2472_v14 }
  0x64   :  { %2220 = vmatprep.mubr.bf16.mxu0 %v1230_v55  ;;  %v1236_v14 = vsel %vm1223_vm2, %v1233_v57, %v1235_v13  ;;  %v1238_v62 = vsel %vm1223_vm2, %v1235_v13, %v1237_v60 }
  0x6a   :  { %2125 = vmatmul.mubr.bf16.gmra.mrb[4].mxu1 %v2493_v29  ;;  %v1239_v29 = vrot.slane %v2550_v16, 2 }
  0x6b   :  { %2221 = vmatmul.mubr.bf16.gmra.mrb[4].mxu0 %v1232_v12  ;;  %2128 = vmatprep.mubr.bf16.mxu1 %v2503_v35 }
  0x6c   :  { %2224 = vmatprep.mubr.bf16.mxu0 %v1234_v59  ;;  %v1240_v35 = vsel %vm1223_vm2, %v1237_v60, %v1239_v29  ;;  %v1242_v0 = vsel %vm1223_vm2, %v1239_v29, %v1241_v63 }
  0x72   :  { %2129 = vmatmul.mubr.bf16.gmra.mrb[8].mxu1 %v2514_v49  ;;  %v1243_v49 = vrot.slane %v2571_v32, 2 }
  0x73   :  { %2225 = vmatmul.mubr.bf16.gmra.mrb[8].mxu0 %v1236_v14  ;;  %2132 = vmatprep.mubr.bf16.mxu1 %v2524_v58 }
  0x74   :  { %2228 = vmatprep.mubr.bf16.mxu0 %v1238_v62  ;;  %v1244_v58 = vsel %vm1223_vm2, %v1241_v63, %v1243_v49  ;;  %v1246_v3 = vsel %vm1223_vm2, %v1243_v49, %v1245_v1 }
  0x7a   :  { %2133 = vmatmul.mubr.bf16.gmra.mrb[12].mxu1 %v2541_v9  ;;  %v1247_v9 = vrot.slane %v2592_v51, 2 }
  0x7b   :  { %2229 = vmatmul.mubr.bf16.gmra.mrb[12].mxu0 %v1240_v35  ;;  %2136 = vmatprep.mubr.bf16.mxu1 %v2550_v16 }
  0x7c   :  { %2232 = vmatprep.mubr.bf16.mxu0 %v1242_v0  ;;  %v1248_v16 = vsel %vm1223_vm2, %v1245_v1, %v1247_v9  ;;  %v1250_v5 = vsel %vm1223_vm2, %v1247_v9, %v1249_v4 }
  0x82   :  { %2137 = vmatmul.mubr.bf16.gmra.mrb[16].mxu1 %v2560_v25  ;;  %v1251_v25 = vrot.slane %v2617_v2, 2 }
  0x83   :  { %2233 = vmatmul.mubr.bf16.gmra.mrb[16].mxu0 %v1244_v58  ;;  %2140 = vmatprep.mubr.bf16.mxu1 %v2571_v32 }
  0x84   :  { %2236 = vmatprep.mubr.bf16.mxu0 %v1246_v3  ;;  %v1252_v32 = vsel %vm1223_vm2, %v1249_v4, %v1251_v25  ;;  %v1254_v7 = vsel %vm1223_vm2, %v1251_v25, %v1253_v6 }
  0x8a   :  { %2141 = vmatmul.mubr.bf16.gmra.mrb[20].mxu1 %v2582_v44  ;;  %v1255_v44 = vrot.slane %v2665_v20, 2 }
  0x8b   :  { %2237 = vmatmul.mubr.bf16.gmra.mrb[20].mxu0 %v1248_v16  ;;  %2144 = vmatprep.mubr.bf16.mxu1 %v2592_v51 }
  0x8c   :  { %2240 = vmatprep.mubr.bf16.mxu0 %v1250_v5  ;;  %v1256_v8 = vsel %vm1223_vm2, %v1253_v6, %v1255_v44 }
  0x92   :  { %2145 = vmatmul.mubr.bf16.gmra.mrb[24].mxu1 %v2608_v61 }
  0x93   :  { %2241 = vmatmul.mubr.bf16.gmra.mrb[24].mxu0 %v1252_v32  ;;  %2148 = vmatprep.mubr.bf16.mxu1 %v2617_v2  ;;  %v2731_v2 = vld [vmem:[%s2929_s4] ss:$0 sm:$0xff] }
  0x94   :  { %2244 = vmatprep.mubr.bf16.mxu0 %v1254_v7 }
  0x9a   :  { %2149 = vmatmul.mubr.bf16.gmra.mrb[28].mxu1 %v2629_v18 }
  0x9b   :  { %2245 = vmatmul.mubr.bf16.gmra.mrb[28].mxu0 %v1256_v8 }
 0x135   :  { %v2122_v51 = vpop.f32.mrb[0].mxu1 }
 0x136   :  { %v2218_v10 = vpop.f32.mrb[0].mxu0  ;;  %v707_v15 = vpop.f32.mrb[1].mxu1 }
 0x137   :  { %v2248_v61 = vadd.f32 %v2218_v10, %v2122_v51  ;;  %v1355_v17 = vpop.f32.mrb[1].mxu0  ;;  %v2123_v19 = vpop.f32.mrb[2].mxu1 }
 0x138   :  { %v2249_v20 = vadd.f32 %v1355_v17, %v707_v15  ;;  %v2219_v21 = vpop.f32.mrb[2].mxu0  ;;  %v710_v18 = vpop.f32.mrb[3].mxu1 }
 0x139   :  { %v1523_v22 = vmul.f32 %v2248_v61, %v2726_v11  ;;  %v2250_v23 = vadd.f32 %v2219_v21, %v2123_v19  ;;  %v1358_v24 = vpop.f32.mrb[3].mxu0 }
 0x13a   :  { %v1521_v26 = vmul.f32 %v2249_v20, %v2726_v11  ;;  %v2251_v27 = vadd.f32 %v1358_v24, %v710_v18 }
 0x13b   :  { %v1562_v28 = vadd.f32 %v2731_v2, %v1523_v22  ;;  %v1524_v30 = vmul.f32 %v2250_v23, %v2726_v11 }
 0x13c   :  { %v1560_v31 = vadd.f32 %v2731_v2, %v1521_v26  ;;  %v1522_v33 = vmul.f32 %v2251_v27, %v2726_v11 }
 0x13d   :  { %v1594_v34 = vmax.f32 %v1562_v28, 0.0  ;;  %v1563_v36 = vadd.f32 %v2731_v2, %v1524_v30  ;;  %v2126_v37 = vpop.f32.mrb[4].mxu1 }
 0x13e   :  { %v1592_v38 = vmax.f32 %v1560_v31, 0.0  ;;  %v1561_v39 = vadd.f32 %v2731_v2, %v1522_v33  ;;  %v2222_v40 = vpop.f32.mrb[4].mxu0  ;;  %v723_v41 = vpop.f32.mrb[5].mxu1 }
 0x13f   :  { %v1930_v42 = vpack.c.bf16 %v1594_v34, %v1594_v34  ;;  %v1595_v43 = vmax.f32 %v1563_v36, 0.0  ;;  %v2252_v45 = vadd.f32 %v2222_v40, %v2126_v37  ;;  %v1371_v47 = vpop.f32.mrb[5].mxu0  ;;  %v2127_v46 = vpop.f32.mrb[6].mxu1 }
 0x140   :  { %v1928_v48 = vpack.c.bf16 %v1592_v38, %v1592_v38  ;;  %v1593_v50 = vmax.f32 %v1561_v39, 0.0  ;;  %v2253_v52 = vadd.f32 %v1371_v47, %v723_v41  ;;  %v2223_v53 = vpop.f32.mrb[6].mxu0  ;;  %v726_v54 = vpop.f32.mrb[7].mxu1 }
 0x141   :  { %1755 = vst.msk [vmem:[%s2930_s5 + $0x8] sm:$0xf] %vm1752_vm3, %v1930_v42  ;;  %v1931_v55 = vpack.c.bf16 %v1595_v43, %v1595_v43  ;;  %v1527_v56 = vmul.f32 %v2252_v45, %v2726_v11  ;;  %v2254_v57 = vadd.f32 %v2223_v53, %v2127_v46  ;;  %v1374_v12 = vpop.f32.mrb[7].mxu0 }
 0x142   :  { %1753 = vst.msk [vmem:[%s2930_s5] sm:$0xf] %vm1752_vm3, %v1928_v48  ;;  %v1929_v59 = vpack.c.bf16 %v1593_v50, %v1593_v50  ;;  %v1525_v13 = vmul.f32 %v2253_v52, %v2726_v11  ;;  %v2255_v60 = vadd.f32 %v1374_v12, %v726_v54 }
 0x143   :  { %1756 = vst.msk [vmem:[%s2930_s5 + $0xc] sm:$0xf] %vm1752_vm3, %v1931_v55  ;;  %v1566_v14 = vadd.f32 %v2731_v2, %v1527_v56  ;;  %v1528_v62 = vmul.f32 %v2254_v57, %v2726_v11 }
 0x144   :  { %1754 = vst.msk [vmem:[%s2930_s5 + $0x4] sm:$0xf] %vm1752_vm3, %v1929_v59  ;;  %v1564_v29 = vadd.f32 %v2731_v2, %v1525_v13  ;;  %v1526_v63 = vmul.f32 %v2255_v60, %v2726_v11 }
 0x145   :  { %v1598_v35 = vmax.f32 %v1566_v14, 0.0  ;;  %v1567_v0 = vadd.f32 %v2731_v2, %v1528_v62  ;;  %v2130_v49 = vpop.f32.mrb[8].mxu1 }
 0x146   :  { %v1596_v1 = vmax.f32 %v1564_v29, 0.0  ;;  %v1565_v58 = vadd.f32 %v2731_v2, %v1526_v63  ;;  %v2226_v3 = vpop.f32.mrb[8].mxu0  ;;  %v739_v9 = vpop.f32.mrb[9].mxu1 }
 0x147   :  { %v1934_v4 = vpack.c.bf16 %v1598_v35, %v1598_v35  ;;  %v1599_v16 = vmax.f32 %v1567_v0, 0.0  ;;  %v2256_v5 = vadd.f32 %v2226_v3, %v2130_v49  ;;  %v1387_v25 = vpop.f32.mrb[9].mxu0  ;;  %v2131_v6 = vpop.f32.mrb[10].mxu1 }
 0x148   :  { %v1932_v32 = vpack.c.bf16 %v1596_v1, %v1596_v1  ;;  %v1597_v7 = vmax.f32 %v1565_v58, 0.0  ;;  %v2257_v44 = vadd.f32 %v1387_v25, %v739_v9  ;;  %v2227_v8 = vpop.f32.mrb[10].mxu0  ;;  %v742_v51 = vpop.f32.mrb[11].mxu1 }
 0x149   :  { %1759 = vst.msk [vmem:[%s2930_s5 + $0x18] sm:$0xf] %vm1752_vm3, %v1934_v4  ;;  %v1935_v10 = vpack.c.bf16 %v1599_v16, %v1599_v16  ;;  %v1531_v15 = vmul.f32 %v2256_v5, %v2726_v11  ;;  %v2258_v61 = vadd.f32 %v2227_v8, %v2131_v6  ;;  %v1390_v17 = vpop.f32.mrb[11].mxu0 }
 0x14a   :  { %1757 = vst.msk [vmem:[%s2930_s5 + $0x10] sm:$0xf] %vm1752_vm3, %v1932_v32  ;;  %v1933_v19 = vpack.c.bf16 %v1597_v7, %v1597_v7  ;;  %v1529_v20 = vmul.f32 %v2257_v44, %v2726_v11  ;;  %v2259_v21 = vadd.f32 %v1390_v17, %v742_v51 }
 0x14b   :  { %1760 = vst.msk [vmem:[%s2930_s5 + $0x1c] sm:$0xf] %vm1752_vm3, %v1935_v10  ;;  %v1570_v18 = vadd.f32 %v2731_v2, %v1531_v15  ;;  %v1532_v22 = vmul.f32 %v2258_v61, %v2726_v11 }
 0x14c   :  { %1758 = vst.msk [vmem:[%s2930_s5 + $0x14] sm:$0xf] %vm1752_vm3, %v1933_v19  ;;  %v1568_v23 = vadd.f32 %v2731_v2, %v1529_v20  ;;  %v1530_v24 = vmul.f32 %v2259_v21, %v2726_v11 }
 0x14d   :  { %v1602_v26 = vmax.f32 %v1570_v18, 0.0  ;;  %v1571_v27 = vadd.f32 %v2731_v2, %v1532_v22  ;;  %v2134_v28 = vpop.f32.mrb[12].mxu1 }
 0x14e   :  { %v1600_v30 = vmax.f32 %v1568_v23, 0.0  ;;  %v1569_v31 = vadd.f32 %v2731_v2, %v1530_v24  ;;  %v2230_v33 = vpop.f32.mrb[12].mxu0  ;;  %v755_v34 = vpop.f32.mrb[13].mxu1 }
 0x14f   :  { %v1938_v36 = vpack.c.bf16 %v1602_v26, %v1602_v26  ;;  %v1603_v37 = vmax.f32 %v1571_v27, 0.0  ;;  %v2260_v38 = vadd.f32 %v2230_v33, %v2134_v28  ;;  %v1403_v39 = vpop.f32.mrb[13].mxu0  ;;  %v2135_v40 = vpop.f32.mrb[14].mxu1 }
 0x150   :  { %v1936_v41 = vpack.c.bf16 %v1600_v30, %v1600_v30  ;;  %v1601_v42 = vmax.f32 %v1569_v31, 0.0  ;;  %v2261_v43 = vadd.f32 %v1403_v39, %v755_v34  ;;  %v2231_v45 = vpop.f32.mrb[14].mxu0  ;;  %v758_v47 = vpop.f32.mrb[15].mxu1 }
 0x151   :  { %1763 = vst.msk [vmem:[%s2930_s5 + $0x28] sm:$0xf] %vm1752_vm3, %v1938_v36  ;;  %v1939_v46 = vpack.c.bf16 %v1603_v37, %v1603_v37  ;;  %v1535_v48 = vmul.f32 %v2260_v38, %v2726_v11  ;;  %v2262_v50 = vadd.f32 %v2231_v45, %v2135_v40  ;;  %v1406_v52 = vpop.f32.mrb[15].mxu0 }
 0x152   :  { %1761 = vst.msk [vmem:[%s2930_s5 + $0x20] sm:$0xf] %vm1752_vm3, %v1936_v41  ;;  %v1937_v53 = vpack.c.bf16 %v1601_v42, %v1601_v42  ;;  %v1533_v54 = vmul.f32 %v2261_v43, %v2726_v11  ;;  %v2263_v55 = vadd.f32 %v1406_v52, %v758_v47 }
 0x153   :  { %1764 = vst.msk [vmem:[%s2930_s5 + $0x2c] sm:$0xf] %vm1752_vm3, %v1939_v46  ;;  %v1574_v56 = vadd.f32 %v2731_v2, %v1535_v48  ;;  %v1536_v57 = vmul.f32 %v2262_v50, %v2726_v11 }
 0x154   :  { %1762 = vst.msk [vmem:[%s2930_s5 + $0x24] sm:$0xf] %vm1752_vm3, %v1937_v53  ;;  %v1572_v12 = vadd.f32 %v2731_v2, %v1533_v54  ;;  %v1534_v59 = vmul.f32 %v2263_v55, %v2726_v11 }
 0x155   :  { %v1606_v13 = vmax.f32 %v1574_v56, 0.0  ;;  %v1575_v60 = vadd.f32 %v2731_v2, %v1536_v57  ;;  %v2138_v14 = vpop.f32.mrb[16].mxu1 }
 0x156   :  { %v1604_v62 = vmax.f32 %v1572_v12, 0.0  ;;  %v1573_v29 = vadd.f32 %v2731_v2, %v1534_v59  ;;  %v2234_v63 = vpop.f32.mrb[16].mxu0  ;;  %v771_v35 = vpop.f32.mrb[17].mxu1 }
 0x157   :  { %v1942_v0 = vpack.c.bf16 %v1606_v13, %v1606_v13  ;;  %v1607_v49 = vmax.f32 %v1575_v60, 0.0  ;;  %v2264_v1 = vadd.f32 %v2234_v63, %v2138_v14  ;;  %v1419_v58 = vpop.f32.mrb[17].mxu0  ;;  %v2139_v3 = vpop.f32.mrb[18].mxu1 }
 0x158   :  { %v1940_v9 = vpack.c.bf16 %v1604_v62, %v1604_v62  ;;  %v1605_v4 = vmax.f32 %v1573_v29, 0.0  ;;  %v2265_v16 = vadd.f32 %v1419_v58, %v771_v35  ;;  %v2235_v5 = vpop.f32.mrb[18].mxu0  ;;  %v774_v25 = vpop.f32.mrb[19].mxu1 }
 0x159   :  { %1767 = vst.msk [vmem:[%s2930_s5 + $0x38] sm:$0xf] %vm1752_vm3, %v1942_v0  ;;  %v1943_v6 = vpack.c.bf16 %v1607_v49, %v1607_v49  ;;  %v1539_v32 = vmul.f32 %v2264_v1, %v2726_v11  ;;  %v2266_v7 = vadd.f32 %v2235_v5, %v2139_v3  ;;  %v1422_v44 = vpop.f32.mrb[19].mxu0 }
 0x15a   :  { %1765 = vst.msk [vmem:[%s2930_s5 + $0x30] sm:$0xf] %vm1752_vm3, %v1940_v9  ;;  %v1941_v8 = vpack.c.bf16 %v1605_v4, %v1605_v4  ;;  %v1537_v51 = vmul.f32 %v2265_v16, %v2726_v11  ;;  %v2267_v10 = vadd.f32 %v1422_v44, %v774_v25 }
 0x15b   :  { %1768 = vst.msk [vmem:[%s2930_s5 + $0x3c] sm:$0xf] %vm1752_vm3, %v1943_v6  ;;  %v1578_v15 = vadd.f32 %v2731_v2, %v1539_v32  ;;  %v1540_v61 = vmul.f32 %v2266_v7, %v2726_v11 }
 0x15c   :  { %1766 = vst.msk [vmem:[%s2930_s5 + $0x34] sm:$0xf] %vm1752_vm3, %v1941_v8  ;;  %v1576_v17 = vadd.f32 %v2731_v2, %v1537_v51  ;;  %v1538_v19 = vmul.f32 %v2267_v10, %v2726_v11 }
 0x15d   :  { %v1610_v20 = vmax.f32 %v1578_v15, 0.0  ;;  %v1579_v21 = vadd.f32 %v2731_v2, %v1540_v61  ;;  %v2142_v18 = vpop.f32.mrb[20].mxu1 }
 0x15e   :  { %v1608_v22 = vmax.f32 %v1576_v17, 0.0  ;;  %v1577_v23 = vadd.f32 %v2731_v2, %v1538_v19  ;;  %v2238_v24 = vpop.f32.mrb[20].mxu0  ;;  %v787_v26 = vpop.f32.mrb[21].mxu1 }
 0x15f   :  { %v1946_v27 = vpack.c.bf16 %v1610_v20, %v1610_v20  ;;  %v1611_v28 = vmax.f32 %v1579_v21, 0.0  ;;  %v2268_v30 = vadd.f32 %v2238_v24, %v2142_v18  ;;  %v1435_v31 = vpop.f32.mrb[21].mxu0  ;;  %v2143_v33 = vpop.f32.mrb[22].mxu1 }
 0x160   :  { %v1944_v34 = vpack.c.bf16 %v1608_v22, %v1608_v22  ;;  %v1609_v36 = vmax.f32 %v1577_v23, 0.0  ;;  %v2269_v37 = vadd.f32 %v1435_v31, %v787_v26  ;;  %v2239_v38 = vpop.f32.mrb[22].mxu0  ;;  %v790_v39 = vpop.f32.mrb[23].mxu1 }
 0x161   :  { %1771 = vst.msk [vmem:[%s2930_s5 + $0x48] sm:$0xf] %vm1752_vm3, %v1946_v27  ;;  %v1947_v40 = vpack.c.bf16 %v1611_v28, %v1611_v28  ;;  %v1543_v41 = vmul.f32 %v2268_v30, %v2726_v11  ;;  %v2270_v42 = vadd.f32 %v2239_v38, %v2143_v33  ;;  %v1438_v43 = vpop.f32.mrb[23].mxu0 }
 0x162   :  { %1769 = vst.msk [vmem:[%s2930_s5 + $0x40] sm:$0xf] %vm1752_vm3, %v1944_v34  ;;  %v1945_v45 = vpack.c.bf16 %v1609_v36, %v1609_v36  ;;  %v1541_v47 = vmul.f32 %v2269_v37, %v2726_v11  ;;  %v2271_v46 = vadd.f32 %v1438_v43, %v790_v39 }
 0x163   :  { %1772 = vst.msk [vmem:[%s2930_s5 + $0x4c] sm:$0xf] %vm1752_vm3, %v1947_v40  ;;  %v1582_v48 = vadd.f32 %v2731_v2, %v1543_v41  ;;  %v1544_v50 = vmul.f32 %v2270_v42, %v2726_v11 }
 0x164   :  { %1770 = vst.msk [vmem:[%s2930_s5 + $0x44] sm:$0xf] %vm1752_vm3, %v1945_v45  ;;  %v1580_v52 = vadd.f32 %v2731_v2, %v1541_v47  ;;  %v1542_v53 = vmul.f32 %v2271_v46, %v2726_v11 }
 0x165   :  { %v1614_v54 = vmax.f32 %v1582_v48, 0.0  ;;  %v1583_v55 = vadd.f32 %v2731_v2, %v1544_v50  ;;  %v2146_v56 = vpop.f32.mrb[24].mxu1 }
 0x166   :  { %v1612_v57 = vmax.f32 %v1580_v52, 0.0  ;;  %v1581_v12 = vadd.f32 %v2731_v2, %v1542_v53  ;;  %v2242_v59 = vpop.f32.mrb[24].mxu0  ;;  %v803_v13 = vpop.f32.mrb[25].mxu1 }
 0x167   :  { %v1950_v60 = vpack.c.bf16 %v1614_v54, %v1614_v54  ;;  %v1615_v14 = vmax.f32 %v1583_v55, 0.0  ;;  %v2272_v62 = vadd.f32 %v2242_v59, %v2146_v56  ;;  %v1451_v29 = vpop.f32.mrb[25].mxu0  ;;  %v2147_v63 = vpop.f32.mrb[26].mxu1 }
 0x168   :  { %v1948_v35 = vpack.c.bf16 %v1612_v57, %v1612_v57  ;;  %v1613_v0 = vmax.f32 %v1581_v12, 0.0  ;;  %v2273_v49 = vadd.f32 %v1451_v29, %v803_v13  ;;  %v2243_v1 = vpop.f32.mrb[26].mxu0  ;;  %v806_v58 = vpop.f32.mrb[27].mxu1 }
 0x169   :  { %1775 = vst.msk [vmem:[%s2930_s5 + $0x58] sm:$0xf] %vm1752_vm3, %v1950_v60  ;;  %v1951_v3 = vpack.c.bf16 %v1615_v14, %v1615_v14  ;;  %v1547_v9 = vmul.f32 %v2272_v62, %v2726_v11  ;;  %v2274_v4 = vadd.f32 %v2243_v1, %v2147_v63  ;;  %v1454_v16 = vpop.f32.mrb[27].mxu0 }
 0x16a   :  { %1773 = vst.msk [vmem:[%s2930_s5 + $0x50] sm:$0xf] %vm1752_vm3, %v1948_v35  ;;  %v1949_v5 = vpack.c.bf16 %v1613_v0, %v1613_v0  ;;  %v1545_v25 = vmul.f32 %v2273_v49, %v2726_v11  ;;  %v2275_v6 = vadd.f32 %v1454_v16, %v806_v58 }
 0x16b   :  { %1776 = vst.msk [vmem:[%s2930_s5 + $0x5c] sm:$0xf] %vm1752_vm3, %v1951_v3  ;;  %v1586_v32 = vadd.f32 %v2731_v2, %v1547_v9  ;;  %v1548_v7 = vmul.f32 %v2274_v4, %v2726_v11 }
 0x16c   :  { %1774 = vst.msk [vmem:[%s2930_s5 + $0x54] sm:$0xf] %vm1752_vm3, %v1949_v5  ;;  %v1584_v44 = vadd.f32 %v2731_v2, %v1545_v25  ;;  %v1546_v8 = vmul.f32 %v2275_v6, %v2726_v11 }
 0x16d   :  { %v1618_v51 = vmax.f32 %v1586_v32, 0.0  ;;  %v1587_v10 = vadd.f32 %v2731_v2, %v1548_v7  ;;  %v2150_v15 = vpop.f32.mrb[28].mxu1 }
 0x16e   :  { %v1616_v61 = vmax.f32 %v1584_v44, 0.0  ;;  %v1585_v17 = vadd.f32 %v2731_v2, %v1546_v8  ;;  %v2246_v19 = vpop.f32.mrb[28].mxu0  ;;  %v819_v20 = vpop.f32.mrb[29].mxu1 }
 0x16f   :  { %v1954_v21 = vpack.c.bf16 %v1618_v51, %v1618_v51  ;;  %v1619_v18 = vmax.f32 %v1587_v10, 0.0  ;;  %v2276_v22 = vadd.f32 %v2246_v19, %v2150_v15  ;;  %v1467_v23 = vpop.f32.mrb[29].mxu0  ;;  %v2151_v24 = vpop.f32.mrb[30].mxu1 }
 0x170   :  { %v1952_v26 = vpack.c.bf16 %v1616_v61, %v1616_v61  ;;  %v1617_v27 = vmax.f32 %v1585_v17, 0.0  ;;  %v2277_v28 = vadd.f32 %v1467_v23, %v819_v20  ;;  %v2247_v30 = vpop.f32.mrb[30].mxu0  ;;  %v822_v31 = vpop.f32.mrb[31].mxu1 }
 0x171   :  { %1779 = vst.msk [vmem:[%s2930_s5 + $0x68] sm:$0xf] %vm1752_vm3, %v1954_v21  ;;  %v1955_v33 = vpack.c.bf16 %v1619_v18, %v1619_v18  ;;  %v1551_v34 = vmul.f32 %v2276_v22, %v2726_v11  ;;  %v2278_v36 = vadd.f32 %v2247_v30, %v2151_v24  ;;  %v1470_v37 = vpop.f32.mrb[31].mxu0 }
 0x172   :  { %1777 = vst.msk [vmem:[%s2930_s5 + $0x60] sm:$0xf] %vm1752_vm3, %v1952_v26  ;;  %v1953_v38 = vpack.c.bf16 %v1617_v27, %v1617_v27  ;;  %v1549_v39 = vmul.f32 %v2277_v28, %v2726_v11  ;;  %v2279_v40 = vadd.f32 %v1470_v37, %v822_v31 }
 0x173   :  { %1780 = vst.msk [vmem:[%s2930_s5 + $0x6c] sm:$0xf] %vm1752_vm3, %v1955_v33  ;;  %v1590_v41 = vadd.f32 %v2731_v2, %v1551_v34  ;;  %v1552_v42 = vmul.f32 %v2278_v36, %v2726_v11 }
 0x174   :  { %1778 = vst.msk [vmem:[%s2930_s5 + $0x64] sm:$0xf] %vm1752_vm3, %v1953_v38  ;;  %v1588_v43 = vadd.f32 %v2731_v2, %v1549_v39  ;;  %v1550_v45 = vmul.f32 %v2279_v40, %v2726_v11 }
 0x175   :  { %v1622_v47 = vmax.f32 %v1590_v41, 0.0  ;;  %v1591_v46 = vadd.f32 %v2731_v2, %v1552_v42 }
 0x176   :  { %v1620_v48 = vmax.f32 %v1588_v43, 0.0  ;;  %v1589_v50 = vadd.f32 %v2731_v2, %v1550_v45 }
 0x177   :  { %v1958_v52 = vpack.c.bf16 %v1622_v47, %v1622_v47  ;;  %v1623_v53 = vmax.f32 %v1591_v46, 0.0 }
 0x178   :  { %v1956_v54 = vpack.c.bf16 %v1620_v48, %v1620_v48  ;;  %v1621_v55 = vmax.f32 %v1589_v50, 0.0 }
 0x179   :  { %1783 = vst.msk [vmem:[%s2930_s5 + $0x78] sm:$0xf] %vm1752_vm3, %v1958_v52  ;;  %v1959_v56 = vpack.c.bf16 %v1623_v53, %v1623_v53 }
 0x17a   :  { %1781 = vst.msk [vmem:[%s2930_s5 + $0x70] sm:$0xf] %vm1752_vm3, %v1956_v54  ;;  %v1957_v11 = vpack.c.bf16 %v1621_v55, %v1621_v55 }
 0x17b   :  { %1784 = vst.msk [vmem:[%s2930_s5 + $0x7c] sm:$0xf] %vm1752_vm3, %v1959_v56 }
 0x17c   :  { %1782 = vst.msk [vmem:[%s2930_s5 + $0x74] sm:$0xf] %vm1752_vm3, %v1957_v11 }

</bundles_post_ra>
